<compile_context>
chip_gen: v7x
topology: tpu7x:2x2x1
jax: 0.10.0
libtpu: 0.0.40
codegen_flags: <defaults>
</compile_context>

<pallas_src>
import jax
import jax.numpy as jnp
from jax.experimental import pallas as pl
from jax.experimental.pallas import tpu as pltpu

# Kernel (Mosaic or interpret) and the pure-JAX reference both use full f32
# matmul precision -> they agree to ~1e-5 instead of bf16-pass noise.
jax.config.update("jax_default_matmul_precision", "highest")

GROUP = 8            # rows per independent module invocation (softmax group)
INPUT_DIM = 32
HIDDEN_DIM = 64
ATTN_DIM = 64        # SelfAttention default attention_dim
LN_EPS = 1e-5        # nn.LayerNorm default eps
LANE = 128
_INV_SQRT_ATTN = 1.0 / float(ATTN_DIM) ** 0.5

# Column offsets inside the packed slabs (all 128-lane aligned).
A_W1, A_WQ, A_WK, A_WV = 0, 128, 256, 384          # wa slab (32, 512)
B_W2, B_WO = 0, 128                                 # wb slab (64, 256)
V_B1, V_G1, V_BE1 = 0, 128, 256                     # vec slab (1, 1280)
V_B2, V_G2, V_BE2 = 384, 512, 640
V_BQ, V_BK, V_BV, V_BO = 768, 896, 1024, 1152


# ------------------------- shared numeric helpers ---------------------------
def _silu(h):
    # exact h * sigmoid(h); exp(-h)->inf for very negative h gives 0 (correct).
    return h / (1.0 + jnp.exp(-h))


def _layernorm(h, gamma, beta):
    mu = jnp.mean(h, axis=-1, keepdims=True)
    var = jnp.mean(jnp.square(h - mu), axis=-1, keepdims=True)
    return (h - mu) * jax.lax.rsqrt(var + LN_EPS) * gamma + beta


# --------------------------------- kernel -----------------------------------
def residual_block_kernel(x_ref, wa_ref, wb_ref, vec_ref, o_ref):
    rows, din = x_ref.shape                     # (groups_per_tile * 8, 32)
    groups = rows // GROUP
    x = x_ref[...]                              # (M, 32)

    # ---- linear1 -> LayerNorm -> SiLU  (dropout1 = eval identity) ----------
    h = jnp.dot(x, wa_ref[:, A_W1:A_W1 + LANE],
                preferred_element_type=jnp.float32)                  # (M, 128)
    h = h[:, :HIDDEN_DIM] + vec_ref[:, V_B1:V_B1 + HIDDEN_DIM]       # (M, 64)
    h = _layernorm(h, vec_ref[:, V_G1:V_G1 + HIDDEN_DIM],
                   vec_ref[:, V_BE1:V_BE1 + HIDDEN_DIM])
    h = _silu(h)

    # ---- linear2 -> LayerNorm -> + residual  (dropout2 = identity) ---------
    out = jnp.dot(h, wb_ref[:, B_W2:B_W2 + LANE],
                  preferred_element_type=jnp.float32)                # (M, 128)
    out = out[:, :din] + vec_ref[:, V_B2:V_B2 + din]                 # (M, 32)
    out = _layernorm(out, vec_ref[:, V_G2:V_G2 + din],
                     vec_ref[:, V_BE2:V_BE2 + din])
    out = out + x                                                    # (M, 32)

    # ---- SelfAttention: fused QKV projection (one MXU matmul) --------------
    qkv = jnp.dot(out, wa_ref[:, A_WQ:A_WV + LANE],
                  preferred_element_type=jnp.float32)                # (M, 384)
    q = qkv[:, 0:ATTN_DIM] + vec_ref[:, V_BQ:V_BQ + ATTN_DIM]
    k = qkv[:, LANE:LANE + ATTN_DIM] + vec_ref[:, V_BK:V_BK + ATTN_DIM]
    v = qkv[:, 2 * LANE:2 * LANE + ATTN_DIM] + vec_ref[:, V_BV:V_BV + ATTN_DIM]

    # Per-row q.k score; softmax across each 8-row group (PyTorch softmax-
    # over-batch quirk, segmented so gridding over groups stays exact).
    prod = (q * k).reshape(groups, GROUP, ATTN_DIM)
    s = jnp.sum(prod, axis=-1, keepdims=True) * _INV_SQRT_ATTN       # (G, 8, 1)
    e = jnp.exp(s - jnp.max(s, axis=1, keepdims=True))
    w = e / jnp.sum(e, axis=1, keepdims=True)                        # (G, 8, 1)
    wv = (w * v.reshape(groups, GROUP, ATTN_DIM)).reshape(rows, ATTN_DIM)

    att = jnp.dot(wv, wb_ref[:, B_WO:B_WO + LANE],
                  preferred_element_type=jnp.float32)                # (M, 128)
    att = att[:, :din] + vec_ref[:, V_BO:V_BO + din]                 # (M, 32)

    # ---- attention residual + final SiLU ------------------------------------
    o_ref[...] = _silu(att + out)
    # TODO(synk): dropout1 / dropout2 / attention dropout are eval-mode
    # identity and therefore omitted.


# ------------------------------- host wrapper --------------------------------
def optimized_residual_block(x_groups, wa, wb, vec, *, groups_per_tile=16):
    """x_groups: (G, 8, 32) f32 -- G independent 8-row batches of the module."""
    G, grp, din = x_groups.shape
    assert grp == GROUP and din == INPUT_DIM
    gpt = max(1, min(groups_per_tile, G))
    while G % gpt:           # shrink until it divides G (keeps the demo robust)
        gpt -= 1
    rows_per_tile = gpt * GROUP

    x2 = x_groups.reshape(G * GROUP, INPUT_DIM)
    out2 = pl.pallas_call(
        residual_block_kernel,
        grid=(G // gpt,),
        in_specs=[
            pl.BlockSpec((rows_per_tile, INPUT_DIM), lambda i: (i, 0)),
            pl.BlockSpec(wa.shape, lambda i: (0, 0)),     # resident weight slab
            pl.BlockSpec(wb.shape, lambda i: (0, 0)),     # resident weight slab
            pl.BlockSpec(vec.shape, lambda i: (0, 0)),    # resident bias/LN slab
        ],
        out_specs=pl.BlockSpec((rows_per_tile, INPUT_DIM), lambda i: (i, 0)),
        out_shape=jax.ShapeDtypeStruct((G * GROUP, INPUT_DIM), x_groups.dtype),
        compiler_params=pltpu.CompilerParams(
            dimension_semantics=("parallel",)),           # v7x megacore sharding
    )(x2, wa, wb, vec)
    return out2.reshape(G, GROUP, INPUT_DIM)


# --------------------------- parameter construction --------------------------
def init_params(key):
    """Logical (PyTorch-shaped) parameters.  Linear weights stored as (in, out)."""
    ks = jax.random.split(key, 8)
    f32 = jnp.float32

    # kaiming_normal_(fan_in, relu): std = sqrt(2 / fan_in); bias = 0
    w1 = jax.random.normal(ks[0], (INPUT_DIM, HIDDEN_DIM), f32) * (2.0 / INPUT_DIM) ** 0.5
    b1 = jnp.zeros((1, HIDDEN_DIM), f32)
    w2 = jax.random.normal(ks[1], (HIDDEN_DIM, INPUT_DIM), f32) * (2.0 / HIDDEN_DIM) ** 0.5
    b2 = jnp.zeros((1, INPUT_DIM), f32)

    # LayerNorm defaults: gamma = 1, beta = 0
    g1, be1 = jnp.ones((1, HIDDEN_DIM), f32), jnp.zeros((1, HIDDEN_DIM), f32)
    g2, be2 = jnp.ones((1, INPUT_DIM), f32), jnp.zeros((1, INPUT_DIM), f32)

    # SelfAttention linears: PyTorch default uniform(-1/sqrt(fan_in), 1/sqrt(fan_in))
    def lin(k, fan_in, fan_out):
        kw, kb = jax.random.split(k)
        bound = 1.0 / float(fan_in) ** 0.5
        w = jax.random.uniform(kw, (fan_in, fan_out), f32, -bound, bound)
        b = jax.random.uniform(kb, (1, fan_out), f32, -bound, bound)
        return w, b

    wq, bq = lin(ks[2], INPUT_DIM, ATTN_DIM)
    wk, bk = lin(ks[3], INPUT_DIM, ATTN_DIM)
    wv, bv = lin(ks[4], INPUT_DIM, ATTN_DIM)
    wo, bo = lin(ks[5], ATTN_DIM, INPUT_DIM)

    return (w1, b1, g1, be1, w2, b2, g2, be2,
            wq, bq, wk, bk, wv, bv, wo, bo)


def pack_params(params):
    """Pack the 16 logical params into dense, lane-aligned f32 slabs.

    Kernel correctness does NOT depend on pad values (outputs are sliced back
    to true widths), only on the column offsets below.
    """
    (w1, b1, g1, be1, w2, b2, g2, be2,
     wq, bq, wk, bk, wv, bv, wo, bo) = params
    f32 = jnp.float32

    def lane_pad(w):                       # (in, out) -> (in, 128)
        return jnp.zeros((w.shape[0], LANE), f32).at[:, :w.shape[1]].set(w)

    def vec_pad(v):                        # (1, n) -> (1, 128)
        v = jnp.asarray(v, f32).reshape(1, -1)
        return jnp.zeros((1, LANE), f32).at[:, :v.shape[1]].set(v)

    wa = jnp.concatenate(
        [lane_pad(w1), lane_pad(wq), lane_pad(wk), lane_pad(wv)], axis=1)   # (32, 512)
    wb = jnp.concatenate([lane_pad(w2), lane_pad(wo)], axis=1)              # (64, 256)
    vec = jnp.concatenate(
        [vec_pad(b1), vec_pad(g1), vec_pad(be1),
         vec_pad(b2), vec_pad(g2), vec_pad(be2),
         vec_pad(bq), vec_pad(bk), vec_pad(bv), vec_pad(bo)], axis=1)       # (1, 1280)
    return wa, wb, vec


# ------------------------------ pure-JAX reference ---------------------------
def reference_forward(xg, params):
    """Exact mirror of the PyTorch forward (eval mode) on one (8, 32) batch."""
    (w1, b1, g1, be1, w2, b2, g2, be2,
     wq, bq, wk, bk, wv, bv, wo, bo) = params

    h = _silu(_layernorm(xg @ w1 + b1, g1, be1))
    out = _layernorm(h @ w2 + b2, g2, be2) + xg
    q = out @ wq + bq
    k = out @ wk + bk
    v = out @ wv + bv
    scores = jnp.sum(q * k, axis=-1, keepdims=True) * _INV_SQRT_ATTN   # (8, 1)
    e = jnp.exp(scores - jnp.max(scores, axis=0, keepdims=True))       # softmax over batch
    weights = e / jnp.sum(e, axis=0, keepdims=True)
    att = (weights * v) @ wo + bo
    return _silu(att + out)


if __name__ == "__main__":
    key = jax.random.PRNGKey(0)
    kx, kp = jax.random.split(key)

    num_groups = 64                      # 64 independent 8-row batches = 512 rows
    x_groups = jax.random.normal(kx, (num_groups, GROUP, INPUT_DIM), jnp.float32)
    params = init_params(kp)
    wa, wb, vec = pack_params(params)

    out = optimized_residual_block(x_groups, wa, wb, vec, groups_per_tile=16)
    out = jax.block_until_ready(out)

    ref = jax.vmap(reference_forward, in_axes=(0, None))(x_groups, params)
    assert out.shape == (num_groups, GROUP, INPUT_DIM)
    # Exact sigmoid / softmax / LayerNorm and pinned matmul precision keep the
    # kernel within ~1e-5 of the reference; 5e-3 leaves headroom for
    # backend-specific exp / rsqrt implementations.
    assert jnp.allclose(out, ref, atol=5e-3, rtol=5e-3), "kernel mismatch vs reference"

    print("KERNEL_OK")
</pallas_src>

<mosaic_0001>
module attributes {stable_mosaic.version = 11 : i64} {
  func.func @residual_block_kernel(%arg0: i32, %arg1: memref<128x32xf32, #tpu.memory_space<vmem>>, %arg2: memref<32x512xf32, #tpu.memory_space<vmem>>, %arg3: memref<64x256xf32, #tpu.memory_space<vmem>>, %arg4: memref<1x1280xf32, #tpu.memory_space<vmem>>, %arg5: memref<128x32xf32, #tpu.memory_space<vmem>>) attributes {dimension_semantics = [#tpu.dimension_semantics<parallel>], iteration_bounds = array<i64: 4>, scalar_prefetch = 0 : i64, scratch_operands = 0 : i64, tpu.core_type = #tpu.core_type<tc>, window_params = [{transform_indices = @transform_0, window_bounds = array<i64: 128, 32>}, {pipeline_mode = #tpu.pipeline_mode<synchronous>, transform_indices = @transform_1, window_bounds = array<i64: 32, 512>}, {pipeline_mode = #tpu.pipeline_mode<synchronous>, transform_indices = @transform_2, window_bounds = array<i64: 64, 256>}, {pipeline_mode = #tpu.pipeline_mode<synchronous>, transform_indices = @transform_3, window_bounds = array<i64: 1, 1280>}, {transform_indices = @transform_4, window_bounds = array<i64: 128, 32>}]} {
    %c0 = arith.constant 0 : index
    %c0_0 = arith.constant 0 : index
    %0 = vector.load %arg1[%c0, %c0_0] : memref<128x32xf32, #tpu.memory_space<vmem>>, vector<128x32xf32>
    %c0_1 = arith.constant 0 : index
    %c0_2 = arith.constant 0 : index
    %1 = vector.load %arg2[%c0_1, %c0_2] : memref<32x512xf32, #tpu.memory_space<vmem>>, vector<32x128xf32>
    %cst = arith.constant dense<0.000000e+00> : vector<128x128xf32>
    %2 = tpu.matmul %0, %1, %cst {dimension_numbers = #tpu.dot_dimension_numbers<[1], [0], [0], [1], [0, 0, 1, 1], [], []>, precision = #tpu.contract_precision<fp32>} : vector<128x32xf32>, vector<32x128xf32>, vector<128x128xf32> -> vector<128x128xf32>
    %3 = vector.extract_strided_slice %2 {offsets = [0, 0], sizes = [128, 64], strides = [1, 1]} : vector<128x128xf32> to vector<128x64xf32>
    %c0_3 = arith.constant 0 : index
    %c0_4 = arith.constant 0 : index
    %4 = vector.load %arg4[%c0_3, %c0_4] : memref<1x1280xf32, #tpu.memory_space<vmem>>, vector<1x64xf32>
    %5 = vector.broadcast %4 : vector<1x64xf32> to vector<128x64xf32>
    %6 = arith.addf %3, %5 : vector<128x64xf32>
    %c0_5 = arith.constant 0 : index
    %c128 = arith.constant 128 : index
    %7 = vector.load %arg4[%c0_5, %c128] : memref<1x1280xf32, #tpu.memory_space<vmem>>, vector<1x64xf32>
    %c0_6 = arith.constant 0 : index
    %c256 = arith.constant 256 : index
    %8 = vector.load %arg4[%c0_6, %c256] : memref<1x1280xf32, #tpu.memory_space<vmem>>, vector<1x64xf32>
    %cst_7 = arith.constant dense<0.000000e+00> : vector<128xf32>
    %9 = vector.multi_reduction <add>, %6, %cst_7 [1] : vector<128x64xf32> to vector<128xf32>
    %10 = vector.shape_cast %9 : vector<128xf32> to vector<128x1xf32>
    %cst_8 = arith.constant 6.400000e+01 : f32
    %11 = vector.broadcast %cst_8 : f32 to vector<128x1xf32>
    %12 = arith.divf %10, %11 : vector<128x1xf32>
    %13 = vector.broadcast %12 : vector<128x1xf32> to vector<128x64xf32>
    %14 = arith.subf %6, %13 : vector<128x64xf32>
    %15 = arith.mulf %14, %14 : vector<128x64xf32>
    %cst_9 = arith.constant dense<0.000000e+00> : vector<128xf32>
    %16 = vector.multi_reduction <add>, %15, %cst_9 [1] : vector<128x64xf32> to vector<128xf32>
    %17 = vector.shape_cast %16 : vector<128xf32> to vector<128x1xf32>
    %cst_10 = arith.constant 6.400000e+01 : f32
    %18 = vector.broadcast %cst_10 : f32 to vector<128x1xf32>
    %19 = arith.divf %17, %18 : vector<128x1xf32>
    %20 = vector.broadcast %12 : vector<128x1xf32> to vector<128x64xf32>
    %21 = arith.subf %6, %20 : vector<128x64xf32>
    %cst_11 = arith.constant 9.99999974E-6 : f32
    %22 = vector.broadcast %cst_11 : f32 to vector<128x1xf32>
    %23 = arith.addf %19, %22 : vector<128x1xf32>
    %24 = math.rsqrt %23 : vector<128x1xf32>
    %25 = vector.broadcast %24 : vector<128x1xf32> to vector<128x64xf32>
    %26 = arith.mulf %21, %25 : vector<128x64xf32>
    %27 = vector.broadcast %7 : vector<1x64xf32> to vector<128x64xf32>
    %28 = arith.mulf %26, %27 : vector<128x64xf32>
    %29 = vector.broadcast %8 : vector<1x64xf32> to vector<128x64xf32>
    %30 = arith.addf %28, %29 : vector<128x64xf32>
    %cst_12 = arith.constant 0.000000e+00 : f32
    %31 = vector.broadcast %cst_12 : f32 to vector<128x64xf32>
    %32 = arith.subf %31, %30 : vector<128x64xf32>
    %33 = math.exp %32 : vector<128x64xf32>
    %cst_13 = arith.constant 1.000000e+00 : f32
    %34 = vector.broadcast %cst_13 : f32 to vector<128x64xf32>
    %35 = arith.addf %34, %33 : vector<128x64xf32>
    %36 = arith.divf %30, %35 : vector<128x64xf32>
    %c0_14 = arith.constant 0 : index
    %c0_15 = arith.constant 0 : index
    %37 = vector.load %arg3[%c0_14, %c0_15] : memref<64x256xf32, #tpu.memory_space<vmem>>, vector<64x128xf32>
    %cst_16 = arith.constant dense<0.000000e+00> : vector<128x128xf32>
    %38 = tpu.matmul %36, %37, %cst_16 {dimension_numbers = #tpu.dot_dimension_numbers<[1], [0], [0], [1], [0, 0, 1, 1], [], []>, precision = #tpu.contract_precision<fp32>} : vector<128x64xf32>, vector<64x128xf32>, vector<128x128xf32> -> vector<128x128xf32>
    %39 = vector.extract_strided_slice %38 {offsets = [0, 0], sizes = [128, 32], strides = [1, 1]} : vector<128x128xf32> to vector<128x32xf32>
    %c0_17 = arith.constant 0 : index
    %c384 = arith.constant 384 : index
    %40 = vector.load %arg4[%c0_17, %c384] : memref<1x1280xf32, #tpu.memory_space<vmem>>, vector<1x32xf32>
    %41 = vector.broadcast %40 : vector<1x32xf32> to vector<128x32xf32>
    %42 = arith.addf %39, %41 : vector<128x32xf32>
    %c0_18 = arith.constant 0 : index
    %c512 = arith.constant 512 : index
    %43 = vector.load %arg4[%c0_18, %c512] : memref<1x1280xf32, #tpu.memory_space<vmem>>, vector<1x32xf32>
    %c0_19 = arith.constant 0 : index
    %c640 = arith.constant 640 : index
    %44 = vector.load %arg4[%c0_19, %c640] : memref<1x1280xf32, #tpu.memory_space<vmem>>, vector<1x32xf32>
    %cst_20 = arith.constant dense<0.000000e+00> : vector<128xf32>
    %45 = vector.multi_reduction <add>, %42, %cst_20 [1] : vector<128x32xf32> to vector<128xf32>
    %46 = vector.shape_cast %45 : vector<128xf32> to vector<128x1xf32>
    %cst_21 = arith.constant 3.200000e+01 : f32
    %47 = vector.broadcast %cst_21 : f32 to vector<128x1xf32>
    %48 = arith.divf %46, %47 : vector<128x1xf32>
    %49 = vector.broadcast %48 : vector<128x1xf32> to vector<128x32xf32>
    %50 = arith.subf %42, %49 : vector<128x32xf32>
    %51 = arith.mulf %50, %50 : vector<128x32xf32>
    %cst_22 = arith.constant dense<0.000000e+00> : vector<128xf32>
    %52 = vector.multi_reduction <add>, %51, %cst_22 [1] : vector<128x32xf32> to vector<128xf32>
    %53 = vector.shape_cast %52 : vector<128xf32> to vector<128x1xf32>
    %cst_23 = arith.constant 3.200000e+01 : f32
    %54 = vector.broadcast %cst_23 : f32 to vector<128x1xf32>
    %55 = arith.divf %53, %54 : vector<128x1xf32>
    %56 = vector.broadcast %48 : vector<128x1xf32> to vector<128x32xf32>
    %57 = arith.subf %42, %56 : vector<128x32xf32>
    %cst_24 = arith.constant 9.99999974E-6 : f32
    %58 = vector.broadcast %cst_24 : f32 to vector<128x1xf32>
    %59 = arith.addf %55, %58 : vector<128x1xf32>
    %60 = math.rsqrt %59 : vector<128x1xf32>
    %61 = vector.broadcast %60 : vector<128x1xf32> to vector<128x32xf32>
    %62 = arith.mulf %57, %61 : vector<128x32xf32>
    %63 = vector.broadcast %43 : vector<1x32xf32> to vector<128x32xf32>
    %64 = arith.mulf %62, %63 : vector<128x32xf32>
    %65 = vector.broadcast %44 : vector<1x32xf32> to vector<128x32xf32>
    %66 = arith.addf %64, %65 : vector<128x32xf32>
    %67 = arith.addf %66, %0 : vector<128x32xf32>
    %c0_25 = arith.constant 0 : index
    %c128_26 = arith.constant 128 : index
    %68 = vector.load %arg2[%c0_25, %c128_26] : memref<32x512xf32, #tpu.memory_space<vmem>>, vector<32x384xf32>
    %cst_27 = arith.constant dense<0.000000e+00> : vector<128x384xf32>
    %69 = tpu.matmul %67, %68, %cst_27 {dimension_numbers = #tpu.dot_dimension_numbers<[1], [0], [0], [1], [0, 0, 1, 1], [], []>, precision = #tpu.contract_precision<fp32>} : vector<128x32xf32>, vector<32x384xf32>, vector<128x384xf32> -> vector<128x384xf32>
    %70 = vector.extract_strided_slice %69 {offsets = [0, 0], sizes = [128, 64], strides = [1, 1]} : vector<128x384xf32> to vector<128x64xf32>
    %c0_28 = arith.constant 0 : index
    %c768 = arith.constant 768 : index
    %71 = vector.load %arg4[%c0_28, %c768] : memref<1x1280xf32, #tpu.memory_space<vmem>>, vector<1x64xf32>
    %72 = vector.broadcast %71 : vector<1x64xf32> to vector<128x64xf32>
    %73 = arith.addf %70, %72 : vector<128x64xf32>
    %74 = vector.extract_strided_slice %69 {offsets = [0, 128], sizes = [128, 64], strides = [1, 1]} : vector<128x384xf32> to vector<128x64xf32>
    %c0_29 = arith.constant 0 : index
    %c896 = arith.constant 896 : index
    %75 = vector.load %arg4[%c0_29, %c896] : memref<1x1280xf32, #tpu.memory_space<vmem>>, vector<1x64xf32>
    %76 = vector.broadcast %75 : vector<1x64xf32> to vector<128x64xf32>
    %77 = arith.addf %74, %76 : vector<128x64xf32>
    %78 = vector.extract_strided_slice %69 {offsets = [0, 256], sizes = [128, 64], strides = [1, 1]} : vector<128x384xf32> to vector<128x64xf32>
    %c0_30 = arith.constant 0 : index
    %c1024 = arith.constant 1024 : index
    %79 = vector.load %arg4[%c0_30, %c1024] : memref<1x1280xf32, #tpu.memory_space<vmem>>, vector<1x64xf32>
    %80 = vector.broadcast %79 : vector<1x64xf32> to vector<128x64xf32>
    %81 = arith.addf %78, %80 : vector<128x64xf32>
    %82 = arith.mulf %73, %77 : vector<128x64xf32>
    %83 = vector.shape_cast %82 : vector<128x64xf32> to vector<16x8x64xf32>
    %cst_31 = arith.constant dense<0.000000e+00> : vector<16x8xf32>
    %84 = vector.multi_reduction <add>, %83, %cst_31 [2] : vector<16x8x64xf32> to vector<16x8xf32>
    %85 = vector.shape_cast %84 : vector<16x8xf32> to vector<16x8x1xf32>
    %cst_32 = arith.constant 1.250000e-01 : f32
    %86 = vector.broadcast %cst_32 : f32 to vector<16x8x1xf32>
    %87 = arith.mulf %85, %86 : vector<16x8x1xf32>
    %cst_33 = arith.constant dense<0xFF800000> : vector<16x1xf32>
    %88 = vector.multi_reduction <maximumf>, %87, %cst_33 [1] : vector<16x8x1xf32> to vector<16x1xf32>
    %89 = vector.shape_cast %88 : vector<16x1xf32> to vector<16x1x1xf32>
    %90 = vector.broadcast %89 : vector<16x1x1xf32> to vector<16x8x1xf32>
    %91 = arith.subf %87, %90 : vector<16x8x1xf32>
    %92 = math.exp %91 : vector<16x8x1xf32>
    %cst_34 = arith.constant dense<0.000000e+00> : vector<16x1xf32>
    %93 = vector.multi_reduction <add>, %92, %cst_34 [1] : vector<16x8x1xf32> to vector<16x1xf32>
    %94 = vector.shape_cast %93 : vector<16x1xf32> to vector<16x1x1xf32>
    %95 = vector.broadcast %94 : vector<16x1x1xf32> to vector<16x8x1xf32>
    %96 = arith.divf %92, %95 : vector<16x8x1xf32>
    %97 = vector.shape_cast %81 : vector<128x64xf32> to vector<16x8x64xf32>
    %98 = vector.broadcast %96 : vector<16x8x1xf32> to vector<16x8x64xf32>
    %99 = arith.mulf %98, %97 : vector<16x8x64xf32>
    %100 = vector.shape_cast %99 : vector<16x8x64xf32> to vector<128x64xf32>
    %c0_35 = arith.constant 0 : index
    %c128_36 = arith.constant 128 : index
    %101 = vector.load %arg3[%c0_35, %c128_36] : memref<64x256xf32, #tpu.memory_space<vmem>>, vector<64x128xf32>
    %cst_37 = arith.constant dense<0.000000e+00> : vector<128x128xf32>
    %102 = tpu.matmul %100, %101, %cst_37 {dimension_numbers = #tpu.dot_dimension_numbers<[1], [0], [0], [1], [0, 0, 1, 1], [], []>, precision = #tpu.contract_precision<fp32>} : vector<128x64xf32>, vector<64x128xf32>, vector<128x128xf32> -> vector<128x128xf32>
    %103 = vector.extract_strided_slice %102 {offsets = [0, 0], sizes = [128, 32], strides = [1, 1]} : vector<128x128xf32> to vector<128x32xf32>
    %c0_38 = arith.constant 0 : index
    %c1152 = arith.constant 1152 : index
    %104 = vector.load %arg4[%c0_38, %c1152] : memref<1x1280xf32, #tpu.memory_space<vmem>>, vector<1x32xf32>
    %105 = vector.broadcast %104 : vector<1x32xf32> to vector<128x32xf32>
    %106 = arith.addf %103, %105 : vector<128x32xf32>
    %107 = arith.addf %106, %67 : vector<128x32xf32>
    %cst_39 = arith.constant 0.000000e+00 : f32
    %108 = vector.broadcast %cst_39 : f32 to vector<128x32xf32>
    %109 = arith.subf %108, %107 : vector<128x32xf32>
    %110 = math.exp %109 : vector<128x32xf32>
    %cst_40 = arith.constant 1.000000e+00 : f32
    %111 = vector.broadcast %cst_40 : f32 to vector<128x32xf32>
    %112 = arith.addf %111, %110 : vector<128x32xf32>
    %113 = arith.divf %107, %112 : vector<128x32xf32>
    %c0_41 = arith.constant 0 : index
    %c0_42 = arith.constant 0 : index
    %114 = vector.load %arg5[%c0_41, %c0_42] : memref<128x32xf32, #tpu.memory_space<vmem>>, vector<128x32xf32>
    tpu.vector_store %arg5[%c0_41, %c0_42], %113 {strides = array<i32>} : memref<128x32xf32, #tpu.memory_space<vmem>>, vector<128x32xf32>,
    return
  }
  func.func @transform_0(%arg0: i32) -> (i32, i32) {
    %c0_i32 = arith.constant 0 : i32
    %c0_i32_0 = arith.constant 0 : i32
    return %arg0, %c0_i32 : i32, i32
  }
  func.func @transform_1(%arg0: i32) -> (i32, i32) {
    %c0_i32 = arith.constant 0 : i32
    %c0_i32_0 = arith.constant 0 : i32
    %c0_i32_1 = arith.constant 0 : i32
    return %c0_i32, %c0_i32_0 : i32, i32
  }
  func.func @transform_2(%arg0: i32) -> (i32, i32) {
    %c0_i32 = arith.constant 0 : i32
    %c0_i32_0 = arith.constant 0 : i32
    %c0_i32_1 = arith.constant 0 : i32
    return %c0_i32, %c0_i32_0 : i32, i32
  }
  func.func @transform_3(%arg0: i32) -> (i32, i32) {
    %c0_i32 = arith.constant 0 : i32
    %c0_i32_0 = arith.constant 0 : i32
    %c0_i32_1 = arith.constant 0 : i32
    return %c0_i32, %c0_i32_0 : i32, i32
  }
  func.func @transform_4(%arg0: i32) -> (i32, i32) {
    %c0_i32 = arith.constant 0 : i32
    %c0_i32_0 = arith.constant 0 : i32
    return %arg0, %c0_i32 : i32, i32
  }
}

</mosaic_0001>

<bundles_post_ra>
// kernel: tpu_custom_call.1
= control target key start
LH: loop header
LB: loop body
LE: loop exit
PB: predicated region body
PF: predicated region fallthrough
CT: control target
= control target key end

     0   :  { %s10205_s15 = smov 0   ;;  %s13070_s0 = inlined_call_operand.vmem [shape: f32[512,32], index: 0, kind: input, shape index: {}]   ;;  %s13071_s1 = inlined_call_operand.vmem [shape: f32[32,512], index: 1, kind: input, shape index: {}]   ;;  %s13072_s2 = inlined_call_operand.vmem [shape: f32[64,256], index: 2, kind: input, shape index: {}]   ;;  %s13073_s3 = inlined_call_operand.vmem [shape: f32[1,1280], index: 3, kind: input, shape index: {}]   ;;  %s13074_s4 = inlined_call_operand.vmem [shape: f32[512,32], index: 4, kind: output, shape index: {}]  }
   0x1 LB: > { %s7657_s16 = sadd.s32 4294967295, %s10177_s15   ;;  %p7661_p0 = scmp.ge.s32.totalorder %s10177_s15, 1  ;;  %s10177_s15 = sphi %s10205_s15, %s14_s15  }
   0x2   : > { %p163_p1 = scmp.lt.s32.totalorder %s10177_s15, 5 }
   0x4   : > { %p164_p2 = pnand %p7661_p0, %p163_p1 }
   0x6   : > { %167 = sbr.rel (%p164_p2) target bundleno = 2704 (0xa90), region = 36 }
   0xd   : > { %v217_v0 = vld [vmem:[%s13071_s1] sm:$0xff]  ;;  %s7662_s23 = sshll.u32 %s7657_s16, 4  ;;  %vm221_vm0 = vcmask 261120   ;;  %vm1425_vm1 = vcmask 523264  }
   0xe   : > { %v218_v1 = vld [vmem:[%s13071_s1 + $0x20] sm:$0xff]  ;;  %v271_v3 = vand.u32 4294901760, %v217_v0  ;;  %p190_p3 = scmp.lt.s32.totalorder %s7662_s23, 63 }
   0xf   : > { %v219_v2 = vld [vmem:[%s13071_s1 + $0x40] sm:$0xff]  ;;  %v274_v4 = vand.u32 4294901760, %v218_v1 }
  0x10   : > { %v220_v5 = vld [vmem:[%s13071_s1 + $0x60] sm:$0xff]  ;;  %v277_v6 = vand.u32 4294901760, %v219_v2  ;;  %s13325_s23 = smov (!%p190_p3, %s7662_s23), 63  ;;  %v10229_v9 = vsub.f32 %v217_v0, %v271_v3 }
  0x11   : > { %v280_v7 = vand.u32 4294901760, %v220_v5  ;;  %v10225_v8 = vpack.c.bf16 %v274_v4, %v271_v3  ;;  %v10231_v10 = vsub.f32 %v218_v1, %v274_v4  ;;  %s7663_s26 = sshll.u32 %s13325_s23, 3 }
  0x12   : > { %v10233_v11 = vsub.f32 %v219_v2, %v277_v6  ;;  %v502_v14 = vand.u32 4294901760, %v10229_v9  ;;  %s10250_s29 = scalar_lea.vmem %s13070_s0, %s7663_s26  ;;  %s13012_s14 = scalar_lea.vmem %s13074_s4, %s7663_s26 }
  0x13   : > { %v10235_v12 = vpack.c.bf16 %v280_v7, %v277_v6  ;;  %v10237_v13 = vsub.f32 %v220_v5, %v280_v7  ;;  %9071 = vmatprep.subr.bf16.mxu0 %v10225_v8  ;;  %v509_v15 = vand.u32 4294901760, %v10231_v10  ;;  %v201_v18 = vld [vmem:[%s10250_s29] sm:$0xff]  ;;  %v202_v21 = vld [vmem:[%s10250_s29 + $0x8] sm:$0xff]  ;;  %v203_v22 = vld [vmem:[%s10250_s29 + $0x10] sm:$0xff] }
  0x14   : > { %v516_v16 = vand.u32 4294901760, %v10233_v11  ;;  %9073 = vmatpush3.bf16.msra.mxu0 %v10225_v8  ;;  %v503_v19 = vsub.f32 %v10229_v9, %v502_v14  ;;  %v223_v25 = vsel %vm221_vm0, %v201_v18, 0  ;;  %v226_v26 = vsel %vm221_vm0, %v202_v21, 0  ;;  %v204_v28 = vld [vmem:[%s10250_s29 + $0x18] sm:$0xff]  ;;  %v205_v29 = vld [vmem:[%s10250_s29 + $0x20] sm:$0xff]  ;;  %v206_v30 = vld [vmem:[%s10250_s29 + $0x28] sm:$0xff] }
  0x15   : > { %v523_v17 = vand.u32 4294901760, %v10237_v13  ;;  %9075 = vmatprep.subr.bf16.mxu0 %v10235_v12  ;;  %v510_v20 = vsub.f32 %v10231_v10, %v509_v15  ;;  %v10264_v24 = vpack.c.bf16 %v509_v15, %v502_v14  ;;  %v229_v27 = vsel %vm221_vm0, %v203_v22, 0  ;;  %v207_v36 = vld [vmem:[%s10250_s29 + $0x30] sm:$0xff]  ;;  %v208_v45 = vld [vmem:[%s10250_s29 + $0x38] sm:$0xff]  ;;  %v209_v2 = vld [vmem:[%s10250_s29 + $0x40] sm:$0xff] }
  0x16   : > { %v10262_v23 = vsub.f32 %v10233_v11, %v516_v16  ;;  %v10277_v32 = vand.u32 4294901760, %v223_v25  ;;  %v504_v33 = vand.u32 4294901760, %v503_v19  ;;  %v10279_v35 = vand.u32 4294901760, %v226_v26  ;;  %v210_v19 = vld [vmem:[%s10250_s29 + $0x48] sm:$0xff] }
  0x17   : > { %v10275_v31 = vsub.f32 %v10237_v13, %v523_v17  ;;  %v511_v34 = vand.u32 4294901760, %v510_v20  ;;  %v10283_v37 = vand.u32 4294901760, %v229_v27  ;;  %v232_v38 = vsel %vm221_vm0, %v204_v28, 0  ;;  %v211_v20 = vld [vmem:[%s10250_s29 + $0x50] sm:$0xff] }
  0x18   : > { %9077 = vmatpush3.bf16.msra.mxu0 %v10235_v12  ;;  %v235_v39 = vsel %vm221_vm0, %v205_v29, 0  ;;  %v238_v40 = vsel %vm221_vm0, %v206_v30, 0  ;;  %v10289_v41 = vsub.f32 %v223_v25, %v10277_v32  ;;  %v10292_v43 = vsub.f32 %v226_v26, %v10279_v35 }
  0x19   : > { %v9078_v42 = vpack.c.bf16 %v511_v34, %v504_v33  ;;  %v10294_v44 = vand.u32 4294901760, %v232_v38  ;;  %v10298_v46 = vsub.f32 %v229_v27, %v10283_v37  ;;  %v10300_v47 = vand.u32 4294901760, %v235_v39  ;;  %v212_v33 = vld [vmem:[%s10250_s29 + $0x58] sm:$0xff]  ;;  %v213_v34 = vld [vmem:[%s10250_s29 + $0x60] sm:$0xff] }
  0x1a   : > { %v10302_v48 = vand.u32 4294901760, %v238_v40  ;;  %v241_v49 = vsel %vm221_vm0, %v207_v36, 0  ;;  %v341_v50 = vand.u32 4294901760, %v10289_v41  ;;  %v351_v51 = vand.u32 4294901760, %v10292_v43  ;;  %v214_v36 = vld [vmem:[%s10250_s29 + $0x68] sm:$0xff] }
  0x1b   : > { %9079 = vmatprep.subr.bf16.mxu0 %v9078_v42  ;;  %v10308_v52 = vsub.f32 %v232_v38, %v10294_v44  ;;  %v10310_v53 = vand.u32 4294901760, %v241_v49  ;;  %v361_v54 = vand.u32 4294901760, %v10298_v46  ;;  %v10314_v55 = vsub.f32 %v235_v39, %v10300_v47 }
  0x1c   : > { %v10317_v56 = vsub.f32 %v238_v40, %v10302_v48  ;;  %v244_v57 = vsel %vm221_vm0, %v208_v45, 0  ;;  %v342_v58 = vsub.f32 %v10289_v41, %v341_v50  ;;  %v352_v59 = vsub.f32 %v10292_v43, %v351_v51 }
  0x1d   : > { %v371_v60 = vand.u32 4294901760, %v10308_v52  ;;  %v10328_v61 = vsub.f32 %v241_v49, %v10310_v53  ;;  %v362_v62 = vsub.f32 %v10298_v46, %v361_v54  ;;  %v381_v63 = vand.u32 4294901760, %v10314_v55 }
  0x1e   : > { %v391_v0 = vand.u32 4294901760, %v10317_v56  ;;  %v10335_v1 = vand.u32 4294901760, %v244_v57  ;;  %v343_v3 = vand.u32 4294901760, %v342_v58  ;;  %v353_v4 = vand.u32 4294901760, %v352_v59 }
  0x1f   : > { %v372_v5 = vsub.f32 %v10308_v52, %v371_v60  ;;  %v401_v6 = vand.u32 4294901760, %v10328_v61  ;;  %v363_v7 = vand.u32 4294901760, %v362_v62  ;;  %v382_v14 = vsub.f32 %v10314_v55, %v381_v63 }
  0x20   : > { %v392_v15 = vsub.f32 %v10317_v56, %v391_v0  ;;  %v10349_v18 = vsub.f32 %v244_v57, %v10335_v1  ;;  %8214 = vmatprep.mubr.f32.mxu0 %v343_v3  ;;  %v247_v22 = vsel %vm221_vm0, %v209_v2, 0  ;;  %v518_v25 = vand.u32 4294901760, %v10262_v23 }
  0x21   : > { %v373_v21 = vand.u32 4294901760, %v372_v5  ;;  %v10357_v26 = vpack.c.bf16 %v10231_v10, %v10229_v9  ;;  %8215 = vmatmul.mubr.f32.vlgmr.msra.gmra.mrb[0].mxu0 %v353_v4  ;;  %v383_v27 = vand.u32 4294901760, %v382_v14  ;;  %v402_v28 = vsub.f32 %v10328_v61, %v401_v6  ;;  %v216_v5 = vld [vmem:[%s10250_s29 + $0x78] sm:$0xff] }
  0x22   : > { %v411_v29 = vand.u32 4294901760, %v10349_v18  ;;  %v10363_v30 = vand.u32 4294901760, %v247_v22  ;;  %9081 = vmatpush3.bf16.msra.mxu0 %v9078_v42  ;;  %8217 = vmatprep.mubr.f32.mxu0 %v363_v7  ;;  %v393_v23 = vand.u32 4294901760, %v392_v15  ;;  %v525_v9 = vand.u32 4294901760, %v10275_v31  ;;  %v215_v42 = vld [vmem:[%s10250_s29 + $0x70] sm:$0xff] }
  0x23   : > { %v250_v10 = vsel %vm221_vm0, %v210_v19, 0  ;;  %v253_v38 = vsel %vm221_vm0, %v211_v20, 0  ;;  %v256_v31 = vsel %vm221_vm0, %v212_v33, 0  ;;  %v259_v58 = vsel %vm221_vm0, %v213_v34, 0 }
  0x24   : > { %v412_v39 = vsub.f32 %v10349_v18, %v411_v29  ;;  %v10375_v40 = vsub.f32 %v247_v22, %v10363_v30  ;;  %v10377_v45 = vand.u32 4294901760, %v250_v10  ;;  %v10379_v49 = vand.u32 4294901760, %v253_v38 }
  0x25   : > { %v9082_v57 = vpack.c.bf16 %v525_v9, %v518_v25  ;;  %v262_v59 = vsel %vm221_vm0, %v214_v36, 0  ;;  %8218 = vmatmul.mubr.f32.gmra.mrb[2].mxu0 %v373_v21  ;;  %v403_v62 = vand.u32 4294901760, %v402_v28  ;;  %v10393_v7 = vand.u32 4294901760, %v256_v31 }
  0x26   : > { %v421_v2 = vand.u32 4294901760, %v10375_v40  ;;  %v10387_v3 = vsub.f32 %v250_v10, %v10377_v45  ;;  %v10390_v4 = vsub.f32 %v253_v38, %v10379_v49  ;;  %8220 = vmatprep.mubr.f32.mxu0 %v383_v27  ;;  %v10395_v14 = vand.u32 4294901760, %v259_v58 }
  0x27   : > { %9083 = vmatprep.subr.bf16.mxu0 %v9082_v57  ;;  %v10397_v15 = vand.u32 4294901760, %v262_v59  ;;  %v265_v19 = vsel %vm221_vm0, %v215_v42, 0  ;;  %v413_v27 = vand.u32 4294901760, %v412_v39  ;;  %v10408_v28 = vsub.f32 %v256_v31, %v10393_v7 }
  0x28   : > { %v422_v20 = vsub.f32 %v10375_v40, %v421_v2  ;;  %v431_v21 = vand.u32 4294901760, %v10387_v3  ;;  %9085 = vmatpush3.bf16.msra.mxu0 %v9082_v57  ;;  %v441_v22 = vand.u32 4294901760, %v10390_v4  ;;  %v10405_v25 = vand.u32 4294901760, %v265_v19 }
  0x29   : > { %v10411_v33 = vsub.f32 %v259_v58, %v10395_v14  ;;  %v268_v34 = vsel %vm221_vm0, %v216_v5, 0  ;;  %9087 = vmatprep.subr.bf16.mxu0 %v10357_v26  ;;  %8221 = vmatmul.mubr.f32.gmra.mrb[4].mxu0 %v393_v23  ;;  %v10422_v38 = vsub.f32 %v262_v59, %v10397_v15  ;;  %v13075_v39 = vand.u32 4294901760, %v10408_v28 }
  0x2a   : > { %v423_v36 = vand.u32 4294901760, %v422_v20  ;;  %v432_v9 = vsub.f32 %v10387_v3, %v431_v21  ;;  %v442_v10 = vsub.f32 %v10390_v4, %v441_v22  ;;  %8223 = vmatprep.mubr.f32.mxu0 %v403_v62  ;;  %v10427_v57 = vsub.f32 %v265_v19, %v10405_v25 }
  0x2b   : > { %v461_v42 = vand.u32 4294901760, %v10411_v33  ;;  %v10429_v23 = vand.u32 4294901760, %v268_v34  ;;  %v10435_v31 = vpack.c.bf16 %v523_v17, %v516_v16  ;;  %v452_v59 = vsub.f32 %v10408_v28, %v13075_v39 }
  0x2c   : > { %v433_v58 = vand.u32 4294901760, %v432_v9  ;;  %v471_v62 = vand.u32 4294901760, %v10422_v38  ;;  %v443_v19 = vand.u32 4294901760, %v442_v10  ;;  %v481_v16 = vand.u32 4294901760, %v10427_v57 }
  0x2d   : > { %8224 = vmatmul.mubr.f32.gmra.mrb[6].mxu0 %v413_v27  ;;  %v10442_v5 = vsub.f32 %v268_v34, %v10429_v23  ;;  %v462_v20 = vsub.f32 %v10411_v33, %v461_v42  ;;  %v453_v17 = vand.u32 4294901760, %v452_v59 }
  0x2e   : > { %8226 = vmatprep.mubr.f32.mxu0 %v423_v36  ;;  %v472_v27 = vsub.f32 %v10422_v38, %v471_v62  ;;  %v482_v34 = vsub.f32 %v10427_v57, %v481_v16 }
  0x2f   : > { %v491_v9 = vand.u32 4294901760, %v10442_v5  ;;  %v463_v39 = vand.u32 4294901760, %v462_v20 }
  0x30   : > { %v473_v36 = vand.u32 4294901760, %v472_v27 }
  0x31   : > { %8227 = vmatmul.mubr.f32.gmra.mrb[8].mxu0 %v433_v58  ;;  %v492_v10 = vsub.f32 %v10442_v5, %v491_v9  ;;  %v483_v58 = vand.u32 4294901760, %v482_v34 }
  0x32   : > { %8229 = vmatprep.mubr.f32.mxu0 %v443_v19  ;;  %v9090_v19 = vpack.c.bf16 %v10237_v13, %v10233_v11  ;;  %v13183_v11 = vand.u32 4294901760, %v10408_v28 }
  0x33   : > { %v493_v59 = vand.u32 4294901760, %v492_v10 }
  0x35   : > { %8230 = vmatmul.mubr.f32.gmra.mrb[10].mxu0 %v453_v17 }
  0x36   : > { %8232 = vmatprep.mubr.f32.mxu0 %v463_v39 }
  0x39   : > { %8233 = vmatmul.mubr.f32.gmra.mrb[12].mxu0 %v473_v36 }
  0x3a   : > { %8235 = vmatprep.mubr.f32.mxu0 %v483_v58 }
  0x3d   : > { %8236 = vmatmul.mubr.f32.gmra.mrb[14].mxu0 %v493_v59 }
  0x3e   : > { %8246 = vmatprep.mubr.f32.mxu0 %v10277_v32 }
  0x41   : > { %8247 = vmatmul.mubr.f32.vlgmr.msra.gmra.mrb[0].mxu0 %v10279_v35 }
  0x42   : > { %9089 = vmatpush3.bf16.msra.mxu0 %v10357_v26  ;;  %8249 = vmatprep.mubr.f32.mxu0 %v10283_v37 }
  0x43   : > { %9091 = vmatprep.subr.bf16.mxu0 %v9090_v19 }
  0x45   : > { %8250 = vmatmul.mubr.f32.gmra.mrb[2].mxu0 %v10294_v44 }
  0x46   : > { %8252 = vmatprep.mubr.f32.mxu0 %v10300_v47  ;;  %9093 = vmatpush3.bf16.msra.mxu0 %v9090_v19 }
  0x47   : > { %9095 = vmatprep.subr.bf16.mxu0 %v10225_v8 }
  0x49   : > { %8253 = vmatmul.mubr.f32.gmra.mrb[4].mxu0 %v10302_v48 }
  0x4a   : > { %8255 = vmatprep.mubr.f32.mxu0 %v10310_v53 }
  0x4d   : > { %8256 = vmatmul.mubr.f32.gmra.mrb[6].mxu0 %v10335_v1 }
  0x4e   : > { %8258 = vmatprep.mubr.f32.mxu0 %v10363_v30 }
  0x51   : > { %8259 = vmatmul.mubr.f32.gmra.mrb[8].mxu0 %v10377_v45 }
  0x52   : > { %8261 = vmatprep.mubr.f32.mxu0 %v10379_v49 }
  0x55   : > { %8262 = vmatmul.mubr.f32.gmra.mrb[10].mxu0 %v10393_v7 }
  0x56   : > { %8264 = vmatprep.mubr.f32.mxu0 %v10395_v14 }
  0x59   : > { %8265 = vmatmul.mubr.f32.gmra.mrb[12].mxu0 %v10397_v15 }
  0x5a   : > { %8267 = vmatprep.mubr.f32.mxu0 %v10405_v25 }
  0x5d   : > { %8268 = vmatmul.mubr.f32.gmra.mrb[14].mxu0 %v10429_v23 }
  0x5e   : > { %8278 = vmatprep.mubr.f32.mxu0 %v10289_v41 }
  0x61   : > { %8279 = vmatmul.mubr.f32.vlgmr.msra.gmra.mrb[0].mxu0 %v10292_v43 }
  0x62   : > { %9097 = vmatpush3.bf16.msra.mxu0 %v10225_v8  ;;  %8281 = vmatprep.mubr.f32.mxu0 %v10298_v46 }
  0x63   : > { %9099 = vmatprep.subr.bf16.mxu0 %v10235_v12 }
  0x65   : > { %8282 = vmatmul.mubr.f32.gmra.mrb[2].mxu0 %v10308_v52 }
  0x66   : > { %8284 = vmatprep.mubr.f32.mxu0 %v10314_v55  ;;  %9101 = vmatpush3.bf16.msra.mxu0 %v10235_v12 }
  0x67   : > { %9103 = vmatprep.subr.bf16.mxu0 %v10264_v24 }
  0x69   : > { %8285 = vmatmul.mubr.f32.gmra.mrb[4].mxu0 %v10317_v56 }
  0x6a   : > { %8287 = vmatprep.mubr.f32.mxu0 %v10328_v61 }
  0x6d   : > { %8288 = vmatmul.mubr.f32.gmra.mrb[6].mxu0 %v10349_v18 }
  0x6e   : > { %8290 = vmatprep.mubr.f32.mxu0 %v10375_v40 }
  0x71   : > { %8291 = vmatmul.mubr.f32.gmra.mrb[8].mxu0 %v10387_v3 }
  0x72   : > { %8293 = vmatprep.mubr.f32.mxu0 %v10390_v4 }
  0x75   : > { %8294 = vmatmul.mubr.f32.gmra.mrb[10].mxu0 %v10408_v28 }
  0x76   : > { %8296 = vmatprep.mubr.f32.mxu0 %v10411_v33 }
  0x79   : > { %8297 = vmatmul.mubr.f32.gmra.mrb[12].mxu0 %v10422_v38 }
  0x7a   : > { %8299 = vmatprep.mubr.f32.mxu0 %v10427_v57 }
  0x7d   : > { %8300 = vmatmul.mubr.f32.gmra.mrb[14].mxu0 %v10442_v5 }
  0x7e   : > { %8310 = vmatprep.mubr.f32.mxu0 %v341_v50 }
  0x81   : > { %8311 = vmatmul.mubr.f32.vlgmr.msra.gmra.mrb[0].mxu0 %v351_v51 }
  0x82   : > { %9105 = vmatpush3.bf16.msra.mxu0 %v10264_v24  ;;  %8313 = vmatprep.mubr.f32.mxu0 %v361_v54 }
  0x83   : > { %9107 = vmatprep.subr.bf16.mxu0 %v10435_v31 }
  0x85   : > { %8314 = vmatmul.mubr.f32.gmra.mrb[2].mxu0 %v371_v60 }
  0x86   : > { %8316 = vmatprep.mubr.f32.mxu0 %v381_v63  ;;  %9109 = vmatpush3.bf16.msra.mxu0 %v10435_v31 }
  0x87   : > { %9111 = vmatprep.subr.bf16.mxu0 %v10225_v8 }
  0x89   : > { %8317 = vmatmul.mubr.f32.gmra.mrb[4].mxu0 %v391_v0 }
  0x8a   : > { %8319 = vmatprep.mubr.f32.mxu0 %v401_v6 }
  0x8d   : > { %8320 = vmatmul.mubr.f32.gmra.mrb[6].mxu0 %v411_v29 }
  0x8e   : > { %8322 = vmatprep.mubr.f32.mxu0 %v421_v2 }
  0x91   : > { %8323 = vmatmul.mubr.f32.gmra.mrb[8].mxu0 %v431_v21 }
  0x92   : > { %8325 = vmatprep.mubr.f32.mxu0 %v441_v22 }
  0x95   : > { %8326 = vmatmul.mubr.f32.gmra.mrb[10].mxu0 %v13183_v11 }
  0x96   : > { %8328 = vmatprep.mubr.f32.mxu0 %v461_v42 }
  0x99   : > { %8329 = vmatmul.mubr.f32.gmra.mrb[12].mxu0 %v471_v62 }
  0x9a   : > { %8331 = vmatprep.mubr.f32.mxu0 %v481_v16 }
  0x9d   : > { %8332 = vmatmul.mubr.f32.gmra.mrb[14].mxu0 %v491_v9 }
  0x9e   : > { %8342 = vmatprep.mubr.f32.mxu0 %v10277_v32 }
  0xa1   : > { %8343 = vmatmul.mubr.f32.vlgmr.msra.gmra.mrb[0].mxu0 %v10279_v35 }
  0xa2   : > { %9113 = vmatpush3.bf16.msra.mxu0 %v10225_v8  ;;  %8345 = vmatprep.mubr.f32.mxu0 %v10283_v37  ;;  %v7666_v8 = vld [vmem:[%s13073_s3] ss:$0 sm:$0xff] }
  0xa3   : > { %9115 = vmatprep.subr.bf16.mxu0 %v10235_v12 }
  0xa5   : > { %8346 = vmatmul.mubr.f32.gmra.mrb[2].mxu0 %v10294_v44 }
  0xa6   : > { %8348 = vmatprep.mubr.f32.mxu0 %v10300_v47  ;;  %9117 = vmatpush3.bf16.msra.mxu0 %v10235_v12 }
  0xa9   : > { %8349 = vmatmul.mubr.f32.gmra.mrb[4].mxu0 %v10302_v48 }
  0xaa   : > { %8351 = vmatprep.mubr.f32.mxu0 %v10310_v53 }
  0xad   : > { %8352 = vmatmul.mubr.f32.gmra.mrb[6].mxu0 %v10335_v1 }
  0xae   : > { %8354 = vmatprep.mubr.f32.mxu0 %v10363_v30 }
  0xb1   : > { %8355 = vmatmul.mubr.f32.gmra.mrb[8].mxu0 %v10377_v45 }
  0xb2   : > { %8357 = vmatprep.mubr.f32.mxu0 %v10379_v49 }
  0xb5   : > { %8358 = vmatmul.mubr.f32.gmra.mrb[10].mxu0 %v10393_v7 }
  0xb6   : > { %8360 = vmatprep.mubr.f32.mxu0 %v10395_v14 }
  0xb9   : > { %8361 = vmatmul.mubr.f32.gmra.mrb[12].mxu0 %v10397_v15 }
  0xba   : > { %8363 = vmatprep.mubr.f32.mxu0 %v10405_v25 }
  0xbd   : > { %8364 = vmatmul.mubr.f32.gmra.mrb[14].mxu0 %v10429_v23 }
  0xbe   : > { %8374 = vmatprep.mubr.f32.mxu0 %v10277_v32 }
  0xc1   : > { %8375 = vmatmul.mubr.f32.vlgmr.msra.gmra.mrb[0].mxu0 %v10279_v35 }
  0xc2   : > { %8377 = vmatprep.mubr.f32.mxu0 %v10283_v37 }
  0xc5   : > { %8378 = vmatmul.mubr.f32.gmra.mrb[2].mxu0 %v10294_v44 }
  0xc6   : > { %8380 = vmatprep.mubr.f32.mxu0 %v10300_v47 }
  0xc9   : > { %8381 = vmatmul.mubr.f32.gmra.mrb[4].mxu0 %v10302_v48 }
  0xca   : > { %8383 = vmatprep.mubr.f32.mxu0 %v10310_v53 }
  0xcd   : > { %8384 = vmatmul.mubr.f32.gmra.mrb[6].mxu0 %v10335_v1 }
  0xce   : > { %8386 = vmatprep.mubr.f32.mxu0 %v10363_v30 }
  0xd1   : > { %8387 = vmatmul.mubr.f32.gmra.mrb[8].mxu0 %v10377_v45 }
  0xd2   : > { %8389 = vmatprep.mubr.f32.mxu0 %v10379_v49 }
  0xd5   : > { %8390 = vmatmul.mubr.f32.gmra.mrb[10].mxu0 %v10393_v7 }
  0xd6   : > { %8392 = vmatprep.mubr.f32.mxu0 %v10395_v14 }
  0xd9   : > { %8393 = vmatmul.mubr.f32.gmra.mrb[12].mxu0 %v10397_v15 }
  0xda   : > { %8395 = vmatprep.mubr.f32.mxu0 %v10405_v25 }
  0xdd   : > { %8396 = vmatmul.mubr.f32.gmra.mrb[14].mxu0 %v10429_v23 }
 0x194   : > { %v8376_v12 = vpop.f32.mrb[0].mxu0 }
 0x195   : > { %v1306_v13 = vpop.f32.mrb[1].mxu0  ;;  %v10574_v32 = vadd.f32 %v8376_v12, %v7666_v8 }
 0x196   : > { %v10572_v24 = vadd.f32 %v7666_v8, %v1306_v13 }
 0x197   : > { %v1429_v47 = vsel %vm1425_vm1, %v10574_v32, 0.0 }
 0x198   : > { %v8379_v35 = vpop.f32.mrb[2].mxu0  ;;  %v1426_v37 = vsel %vm1425_vm1, %v10572_v24, 0.0 }
 0x199   : > { %1427 = vadd.xlane.f32.xlu0 %v1426_v37  ;;  %v1318_v41 = vpop.f32.mrb[3].mxu0  ;;  %v10580_v44 = vadd.f32 %v8379_v35, %v7666_v8 }
 0x19a   : > { %v10578_v43 = vadd.f32 %v7666_v8, %v1318_v41 }
 0x19b   : > { %v1435_v54 = vsel %vm1425_vm1, %v10580_v44, 0.0 }
 0x19c   : > { %v8382_v46 = vpop.f32.mrb[4].mxu0  ;;  %v1432_v48 = vsel %vm1425_vm1, %v10578_v43, 0.0 }
 0x19d   : > { %1430 = vadd.xlane.f32.xlu0 %v1429_v47  ;;  %1433 = vadd.xlane.f32.xlu1 %v1432_v48  ;;  %v1330_v50 = vpop.f32.mrb[5].mxu0  ;;  %v10588_v52 = vadd.f32 %v8382_v46, %v7666_v8 }
 0x19e   : > { %v10586_v51 = vadd.f32 %v7666_v8, %v1330_v50 }
 0x19f   : > { %v1441_v0 = vsel %vm1425_vm1, %v10588_v52, 0.0 }
 0x1a0   : > { %v8385_v53 = vpop.f32.mrb[6].mxu0  ;;  %v1438_v55 = vsel %vm1425_vm1, %v10586_v51, 0.0 }
 0x1a1   : > { %1436 = vadd.xlane.f32.xlu1 %v1435_v54  ;;  %1439 = vadd.xlane.f32.xlu0 %v1438_v55  ;;  %v1342_v56 = vpop.f32.mrb[7].mxu0  ;;  %v10596_v61 = vadd.f32 %v8385_v53, %v7666_v8 }
 0x1a2   : > { %v10594_v60 = vadd.f32 %v7666_v8, %v1342_v56 }
 0x1a3   : > { %v1447_v30 = vsel %vm1425_vm1, %v10596_v61, 0.0 }
 0x1a4   : > { %v8388_v63 = vpop.f32.mrb[8].mxu0  ;;  %v1444_v1 = vsel %vm1425_vm1, %v10594_v60, 0.0 }
 0x1a5   : > { %1442 = vadd.xlane.f32.xlu1 %v1441_v0  ;;  %1445 = vadd.xlane.f32.xlu0 %v1444_v1  ;;  %v1354_v6 = vpop.f32.mrb[9].mxu0  ;;  %v10604_v26 = vadd.f32 %v8388_v63, %v7666_v8 }
 0x1a6   : > { %v10602_v18 = vadd.f32 %v7666_v8, %v1354_v6 }
 0x1a7   : > { %v1453_v4 = vsel %vm1425_vm1, %v10604_v26, 0.0 }
 0x1a8   : > { %v8391_v29 = vpop.f32.mrb[10].mxu0  ;;  %v1450_v40 = vsel %vm1425_vm1, %v10602_v18, 0.0 }
 0x1a9   : > { %1448 = vadd.xlane.f32.xlu1 %v1447_v30  ;;  %1451 = vadd.xlane.f32.xlu0 %v1450_v40  ;;  %v1366_v45 = vpop.f32.mrb[11].mxu0  ;;  %v10612_v2 = vadd.f32 %v8391_v29, %v7666_v8 }
 0x1aa   : > { %v10610_v49 = vadd.f32 %v7666_v8, %v1366_v45 }
 0x1ab   : > { %v1459_v25 = vsel %vm1425_vm1, %v10612_v2, 0.0 }
 0x1ac   : > { %v8394_v3 = vpop.f32.mrb[12].mxu0  ;;  %v1456_v7 = vsel %vm1425_vm1, %v10610_v49, 0.0 }
 0x1ad   : > { %1454 = vadd.xlane.f32.xlu1 %v1453_v4  ;;  %1457 = vadd.xlane.f32.xlu0 %v1456_v7  ;;  %v1378_v14 = vpop.f32.mrb[13].mxu0  ;;  %v10620_v21 = vadd.f32 %v8394_v3, %v7666_v8 }
 0x1ae   : > { %v10618_v15 = vadd.f32 %v7666_v8, %v1378_v14 }
 0x1af   : > { %v1465_v42 = vsel %vm1425_vm1, %v10620_v21, 0.0 }
 0x1b0   : > { %v8397_v22 = vpop.f32.mrb[14].mxu0  ;;  %v1462_v28 = vsel %vm1425_vm1, %v10618_v15, 0.0 }
 0x1b1   : > { %1460 = vadd.xlane.f32.xlu1 %v1459_v25  ;;  %1463 = vadd.xlane.f32.xlu0 %v1462_v28  ;;  %v1390_v33 = vpop.f32.mrb[15].mxu0  ;;  %v10628_v39 = vadd.f32 %v8397_v22, %v7666_v8 }
 0x1b2   : > { %v10626_v38 = vadd.f32 %v7666_v8, %v1390_v33 }
 0x1b3   : > { %v1471_v23 = vsel %vm1425_vm1, %v10628_v39, 0.0 }
 0x1b4   : > { %v1468_v57 = vsel %vm1425_vm1, %v10626_v38, 0.0 }
 0x1b5   : > { %1466 = vadd.xlane.f32.xlu1 %v1465_v42  ;;  %1469 = vadd.xlane.f32.xlu0 %v1468_v57 }
 0x1b9   : > { %1472 = vadd.xlane.f32.xlu1 %v1471_v23 }
 0x226   : > { %v1428_v31 = vpop.xlane.xlu0 %1427 }
 0x227   : > { %v1475_v62 = vmul.f32 0.015625, %v1428_v31 }
 0x229   : > { %v10637_v5 = vsub.f32 %v10572_v24, %v1475_v62 }
 0x22a   : > { %v1431_v20 = vpop.xlane.xlu0 %1430  ;;  %v1434_v16 = vpop.xlane.xlu1 %1433 }
 0x22b   : > { %v1476_v17 = vmul.f32 0.015625, %v1431_v20  ;;  %v1477_v27 = vmul.f32 0.015625, %v1434_v16  ;;  %v1507_v9 = vmul.f32 %v10637_v5, %v10637_v5 }
 0x22d   : > { %v10642_v34 = vsub.f32 %v10574_v32, %v1476_v17  ;;  %v10645_v36 = vsub.f32 %v10578_v43, %v1477_v27  ;;  %v1523_v10 = vsel %vm1425_vm1, %v1507_v9, 0.0 }
 0x22e   : > { %v1437_v58 = vpop.xlane.xlu1 %1436  ;;  %v1440_v59 = vpop.xlane.xlu0 %1439  ;;  %1524 = vadd.xlane.f32.xlu0 %v1523_v10 }
 0x22f   : > { %v1478_v19 = vmul.f32 0.015625, %v1437_v58  ;;  %v1479_v11 = vmul.f32 0.015625, %v1440_v59  ;;  %v1508_v8 = vmul.f32 %v10642_v34, %v10642_v34  ;;  %v1509_v12 = vmul.f32 %v10645_v36, %v10645_v36 }
 0x231   : > { %v10653_v13 = vsub.f32 %v10580_v44, %v1478_v19  ;;  %v10656_v24 = vsub.f32 %v10586_v51, %v1479_v11  ;;  %v1526_v32 = vsel %vm1425_vm1, %v1508_v8, 0.0  ;;  %v1529_v35 = vsel %vm1425_vm1, %v1509_v12, 0.0 }
 0x232   : > { %v1443_v37 = vpop.xlane.xlu1 %1442  ;;  %v1446_v41 = vpop.xlane.xlu0 %1445  ;;  %1527 = vadd.xlane.f32.xlu1 %v1526_v32  ;;  %1530 = vadd.xlane.f32.xlu0 %v1529_v35 }
 0x233   : > { %v1480_v43 = vmul.f32 0.015625, %v1443_v37  ;;  %v1481_v46 = vmul.f32 0.015625, %v1446_v41  ;;  %v1510_v47 = vmul.f32 %v10653_v13, %v10653_v13  ;;  %v1511_v44 = vmul.f32 %v10656_v24, %v10656_v24  ;;  %v1775_v41 = vld [vmem:[%s13072_s2] sm:$0xff] }
 0x235   : > { %v10665_v48 = vsub.f32 %v10588_v52, %v1480_v43  ;;  %v10668_v50 = vsub.f32 %v10594_v60, %v1481_v46  ;;  %v1532_v51 = vsel %vm1425_vm1, %v1510_v47, 0.0  ;;  %v1535_v53 = vsel %vm1425_vm1, %v1511_v44, 0.0  ;;  %v1777_v44 = vld [vmem:[%s13072_s2 + $0x20] sm:$0xff] }
 0x236   : > { %v1449_v54 = vpop.xlane.xlu1 %1448  ;;  %v1452_v55 = vpop.xlane.xlu0 %1451  ;;  %1533 = vadd.xlane.f32.xlu1 %v1532_v51  ;;  %1536 = vadd.xlane.f32.xlu0 %v1535_v53  ;;  %v1832_v43 = vand.u32 4294901760, %v1775_v41  ;;  %v1778_v51 = vld [vmem:[%s13072_s2 + $0x30] sm:$0xff]  ;;  %v1779_v53 = vld [vmem:[%s13072_s2 + $0x40] sm:$0xff] }
 0x237   : > { %v1482_v56 = vmul.f32 0.015625, %v1449_v54  ;;  %v1483_v63 = vmul.f32 0.015625, %v1452_v55  ;;  %v1512_v0 = vmul.f32 %v10665_v48, %v10665_v48  ;;  %v1513_v52 = vmul.f32 %v10668_v50, %v10668_v50 }
 0x238   : > { %v1838_v54 = vand.u32 4294901760, %v1777_v44  ;;  %v1841_v55 = vand.u32 4294901760, %v1778_v51 }
 0x239   : > { %v10677_v1 = vsub.f32 %v10596_v61, %v1482_v56  ;;  %v10680_v60 = vsub.f32 %v10602_v18, %v1483_v63  ;;  %v1538_v6 = vsel %vm1425_vm1, %v1512_v0, 0.0  ;;  %v1541_v29 = vsel %vm1425_vm1, %v1513_v52, 0.0  ;;  %v1780_v56 = vld [vmem:[%s13072_s2 + $0x50] sm:$0xff]  ;;  %v1781_v0 = vld [vmem:[%s13072_s2 + $0x60] sm:$0xff] }
 0x23a   : > { %v1455_v30 = vpop.xlane.xlu1 %1454  ;;  %v1458_v40 = vpop.xlane.xlu0 %1457  ;;  %1539 = vadd.xlane.f32.xlu1 %v1538_v6  ;;  %1542 = vadd.xlane.f32.xlu0 %v1541_v29  ;;  %v1844_v63 = vand.u32 4294901760, %v1779_v53  ;;  %v1782_v52 = vld [vmem:[%s13072_s2 + $0x70] sm:$0xff]  ;;  %v1847_v6 = vand.u32 4294901760, %v1780_v56  ;;  %v10760_v29 = vpack.c.bf16 %v1841_v55, %v1838_v54 }
 0x23b   : > { %v1484_v45 = vmul.f32 0.015625, %v1455_v30  ;;  %v1485_v3 = vmul.f32 0.015625, %v1458_v40  ;;  %v1514_v4 = vmul.f32 %v10677_v1, %v10677_v1  ;;  %v1515_v61 = vmul.f32 %v10680_v60, %v10680_v60 }
 0x23c   : > { %v10762_v30 = vpack.c.bf16 %v1847_v6, %v1844_v63  ;;  %v1850_v40 = vand.u32 4294901760, %v1781_v0 }
 0x23d   : > { %v10689_v7 = vsub.f32 %v10604_v26, %v1484_v45  ;;  %v10692_v18 = vsub.f32 %v10610_v49, %v1485_v3  ;;  %v1544_v14 = vsel %vm1425_vm1, %v1514_v4, 0.0  ;;  %v1547_v22 = vsel %vm1425_vm1, %v1515_v61, 0.0 }
 0x23e   : > { %v1461_v25 = vpop.xlane.xlu1 %1460  ;;  %v1464_v28 = vpop.xlane.xlu0 %1463  ;;  %1545 = vadd.xlane.f32.xlu1 %v1544_v14  ;;  %1548 = vadd.xlane.f32.xlu0 %v1547_v22  ;;  %v1853_v45 = vand.u32 4294901760, %v1782_v52  ;;  %v10771_v4 = vsub.f32 %v1775_v41, %v1832_v43 }
 0x23f   : > { %v1486_v33 = vmul.f32 0.015625, %v1461_v25  ;;  %v1487_v42 = vmul.f32 0.015625, %v1464_v28  ;;  %v1516_v57 = vmul.f32 %v10689_v7, %v10689_v7  ;;  %v1517_v26 = vmul.f32 %v10692_v18, %v10692_v18 }
 0x240   : > { %v10767_v3 = vpack.c.bf16 %v1853_v45, %v1850_v40  ;;  %v2067_v14 = vand.u32 4294901760, %v10771_v4  ;;  %v10817_v41 = vsub.f32 %v1782_v52, %v1853_v45 }
 0x241   : > { %v10701_v23 = vsub.f32 %v10612_v2, %v1486_v33  ;;  %v10704_v49 = vsub.f32 %v10618_v15, %v1487_v42  ;;  %v1550_v31 = vsel %vm1425_vm1, %v1516_v57, 0.0  ;;  %v1553_v62 = vsel %vm1425_vm1, %v1517_v26, 0.0 }
 0x242   : > { %v1467_v20 = vpop.xlane.xlu1 %1466  ;;  %1551 = vadd.xlane.f32.xlu1 %v1550_v31  ;;  %1554 = vadd.xlane.f32.xlu0 %v1553_v62  ;;  %v1470_v16 = vpop.xlane.xlu0 %1469  ;;  %v2068_v25 = vsub.f32 %v10771_v4, %v2067_v14  ;;  %v10787_v26 = vsub.f32 %v1777_v44, %v1838_v54  ;;  %v10789_v31 = vsub.f32 %v1778_v51, %v1841_v55 }
 0x243   : > { %v1488_v17 = vmul.f32 0.015625, %v1467_v20  ;;  %v1489_v27 = vmul.f32 0.015625, %v1470_v16  ;;  %v1518_v9 = vmul.f32 %v10701_v23, %v10701_v23  ;;  %v1519_v2 = vmul.f32 %v10704_v49, %v10704_v49 }
 0x244   : > { %v2069_v33 = vand.u32 4294901760, %v2068_v25  ;;  %v2081_v62 = vand.u32 4294901760, %v10787_v26  ;;  %v2088_v20 = vand.u32 4294901760, %v10789_v31 }
 0x245   : > { %v10713_v10 = vsub.f32 %v10620_v21, %v1488_v17  ;;  %v10716_v15 = vsub.f32 %v10626_v38, %v1489_v27  ;;  %v1556_v58 = vsel %vm1425_vm1, %v1518_v9, 0.0  ;;  %v1559_v59 = vsel %vm1425_vm1, %v1519_v2, 0.0 }
 0x246   : > { %1557 = vadd.xlane.f32.xlu1 %v1556_v58  ;;  %v1473_v19 = vpop.xlane.xlu1 %1472  ;;  %1560 = vadd.xlane.f32.xlu0 %v1559_v59  ;;  %v2082_v16 = vsub.f32 %v10787_v26, %v2081_v62  ;;  %v2089_v17 = vsub.f32 %v10789_v31, %v2088_v20  ;;  %v10801_v58 = vsub.f32 %v1779_v53, %v1844_v63 }
 0x247   : > { %v1490_v11 = vmul.f32 0.015625, %v1473_v19  ;;  %v1520_v8 = vmul.f32 %v10713_v10, %v10713_v10  ;;  %v1521_v12 = vmul.f32 %v10716_v15, %v10716_v15  ;;  %v10803_v59 = vsub.f32 %v1780_v56, %v1847_v6 }
 0x248   : > { %v2083_v27 = vand.u32 4294901760, %v2082_v16  ;;  %v2090_v9 = vand.u32 4294901760, %v2089_v17  ;;  %v13079_v19 = vand.u32 4294901760, %v10801_v58  ;;  %v10835_v56 = vpack.c.bf16 %v10789_v31, %v10787_v26 }
 0x249   : > { %v10725_v21 = vsub.f32 %v10628_v39, %v1490_v11  ;;  %v1562_v38 = vsel %vm1425_vm1, %v1520_v8, 0.0  ;;  %v1565_v32 = vsel %vm1425_vm1, %v1521_v12, 0.0  ;;  %v1776_v39 = vld [vmem:[%s13072_s2 + $0x10] sm:$0xff]  ;;  %v13078_v11 = vand.u32 4294901760, %v10803_v59 }
 0x24a   : > { %1563 = vadd.xlane.f32.xlu1 %v1562_v38  ;;  %1566 = vadd.xlane.f32.xlu0 %v1565_v32  ;;  %v1835_v46 = vand.u32 4294901760, %v1776_v39  ;;  %v10799_v2 = vpack.c.bf16 %v2090_v9, %v2083_v27  ;;  %v2096_v8 = vsub.f32 %v10801_v58, %v13079_v19  ;;  %v10839_v63 = vpack.c.bf16 %v10803_v59, %v10801_v58 }
 0x24b   : > { %v1522_v35 = vmul.f32 %v10725_v21, %v10725_v21  ;;  %v2103_v12 = vsub.f32 %v10803_v59, %v13078_v11 }
 0x24c   : > { %v10738_v47 = vpack.c.bf16 %v1835_v46, %v1832_v43  ;;  %v10773_v61 = vsub.f32 %v1776_v39, %v1835_v46  ;;  %v2097_v38 = vand.u32 4294901760, %v2096_v8  ;;  %v13076_v43 = vand.u32 4294901760, %v10817_v41 }
 0x24d   : > { %v1568_v37 = vsel %vm1425_vm1, %v1522_v35, 0.0  ;;  %v2104_v32 = vand.u32 4294901760, %v2103_v12 }
 0x24e   : > { %1569 = vadd.xlane.f32.xlu1 %v1568_v37  ;;  %9119 = vmatprep.subr.bf16.mxu1 %v10738_v47  ;;  %v2074_v22 = vand.u32 4294901760, %v10773_v61  ;;  %v10815_v37 = vsub.f32 %v1781_v0, %v1850_v40  ;;  %v2117_v44 = vsub.f32 %v10817_v41, %v13076_v43  ;;  %v10831_v55 = vpack.c.bf16 %v10773_v61, %v10771_v4 }
 0x24f   : > { %9121 = vmatpush3.bf16.msra.mxu1 %v10738_v47  ;;  %v10813_v35 = vpack.c.bf16 %v2104_v32, %v2097_v38  ;;  %v9186_v4 = vpack.c.bf16 %v2088_v20, %v2081_v62  ;;  %v13191_v62 = vand.u32 4294901760, %v10817_v41 }
 0x250   : > { %9123 = vmatprep.subr.bf16.mxu1 %v10760_v29  ;;  %v2075_v28 = vsub.f32 %v10773_v61, %v2074_v22  ;;  %v13077_v39 = vand.u32 4294901760, %v10815_v37  ;;  %v2118_v53 = vand.u32 4294901760, %v2117_v44  ;;  %v10843_v25 = vpack.c.bf16 %v10817_v41, %v10815_v37 }
 0x251   : > { %v13190_v31 = vand.u32 4294901760, %v10815_v37 }
 0x252   : > { %v2076_v42 = vand.u32 4294901760, %v2075_v28  ;;  %v2110_v46 = vsub.f32 %v10815_v37, %v13077_v39 }
 0x253   : > { %9125 = vmatpush3.bf16.msra.mxu1 %v10760_v29  ;;  %v9194_v20 = vpack.c.bf16 %v13191_v62, %v13190_v31 }
 0x254   : > { %9127 = vmatprep.subr.bf16.mxu1 %v10762_v30  ;;  %v10784_v57 = vpack.c.bf16 %v2076_v42, %v2069_v33  ;;  %v2111_v51 = vand.u32 4294901760, %v2110_v46 }
 0x256   : > { %v10827_v54 = vpack.c.bf16 %v2118_v53, %v2111_v51 }
 0x257   : > { %9129 = vmatpush3.bf16.msra.mxu1 %v10762_v30 }
 0x258   : > { %9131 = vmatprep.subr.bf16.mxu1 %v10767_v3 }
 0x25b   : > { %9133 = vmatpush3.bf16.msra.mxu1 %v10767_v3 }
 0x25c   : > { %9135 = vmatprep.subr.bf16.mxu1 %v10784_v57 }
 0x2bb   : > { %v1525_v0 = vpop.xlane.xlu0 %1524 }
 0x2bc   : > { %v1571_v52 = vmul.f32 0.015625, %v1525_v0  ;;  %v10848_v0 = vld [vmem:[%s13073_s3 + $0x1] ss:$0 sm:$0xff] }
 0x2be   : > { %v1587_v6 = vadd.f32 1e-05, %v1571_v52 }
 0x2bf   : > { %v1528_v40 = vpop.xlane.xlu1 %1527  ;;  %v1531_v45 = vpop.xlane.xlu0 %1530 }
 0x2c0   : > { %9899 = vrsqrt.f32 %v1587_v6  ;;  %v1572_v28 = vmul.f32 0.015625, %v1528_v40  ;;  %v1573_v33 = vmul.f32 0.015625, %v1531_v45 }
 0x2c2   : > { %v1588_v42 = vadd.f32 1e-05, %v1572_v28  ;;  %v1589_v16 = vadd.f32 1e-05, %v1573_v33 }
 0x2c3   : > { %v1534_v17 = vpop.xlane.xlu1 %1533  ;;  %v1537_v27 = vpop.xlane.xlu0 %1536 }
 0x2c4   : > { %9901 = vrsqrt.f32 %v1588_v42  ;;  %v1574_v9 = vmul.f32 0.015625, %v1534_v17  ;;  %v1575_v8 = vmul.f32 0.015625, %v1537_v27 }
 0x2c5   : > { %9903 = vrsqrt.f32 %v1589_v16  ;;  %v10854_v16 = vld [vmem:[%s13073_s3 + $0x2] ss:$0 sm:$0xff] }
 0x2c6   : > { %v1590_v12 = vadd.f32 1e-05, %v1574_v9  ;;  %v1591_v38 = vadd.f32 1e-05, %v1575_v8 }
 0x2c7   : > { %v1540_v32 = vpop.xlane.xlu1 %1539  ;;  %v1543_v46 = vpop.xlane.xlu0 %1542 }
 0x2c8   : > { %9905 = vrsqrt.f32 %v1590_v12  ;;  %v1576_v44 = vmul.f32 0.015625, %v1540_v32  ;;  %v1577_v51 = vmul.f32 0.015625, %v1543_v46 }
 0x2c9   : > { %9907 = vrsqrt.f32 %v1591_v38 }
 0x2ca   : > { %v9900_v53 = vpop.eup %9899  ;;  %v1592_v52 = vadd.f32 1e-05, %v1576_v44  ;;  %v1593_v6 = vadd.f32 1e-05, %v1577_v51 }
 0x2cb   : > { %v1619_v40 = vmul.f32 %v9900_v53, %v10637_v5  ;;  %v1546_v45 = vpop.xlane.xlu1 %1545  ;;  %v1549_v28 = vpop.xlane.xlu0 %1548 }
 0x2cc   : > { %9909 = vrsqrt.f32 %v1592_v52  ;;  %v1578_v33 = vmul.f32 0.015625, %v1546_v45  ;;  %v1579_v42 = vmul.f32 0.015625, %v1549_v28 }
 0x2cd   : > { %9911 = vrsqrt.f32 %v1593_v6  ;;  %v1641_v17 = vmul.f32 %v10848_v0, %v1619_v40 }
 0x2ce   : > { %v9902_v27 = vpop.eup %9901  ;;  %v1594_v9 = vadd.f32 1e-05, %v1578_v33  ;;  %v1595_v8 = vadd.f32 1e-05, %v1579_v42 }
 0x2cf   : > { %v9904_v12 = vpop.eup %9903  ;;  %v1620_v38 = vmul.f32 %v9902_v27, %v10642_v34  ;;  %v1552_v5 = vpop.xlane.xlu1 %1551  ;;  %v10859_v46 = vadd.f32 %v10854_v16, %v1641_v17 }
 0x2d0   : > { %v1555_v32 = vpop.xlane.xlu0 %1554  ;;  %v1621_v44 = vmul.f32 %v9904_v12, %v10645_v36  ;;  %9913 = vrsqrt.f32 %v1594_v9  ;;  %v1580_v51 = vmul.f32 0.015625, %v1552_v5 }
 0x2d1   : > { %v1581_v53 = vmul.f32 0.015625, %v1555_v32  ;;  %v1642_v52 = vmul.f32 %v10848_v0, %v1620_v38  ;;  %9915 = vrsqrt.f32 %v1595_v8  ;;  %v1679_v6 = vsub.f32 0.0, %v10859_v46 }
 0x2d2   : > { %v9906_v40 = vpop.eup %9905  ;;  %v1643_v45 = vmul.f32 %v10848_v0, %v1621_v44  ;;  %v1596_v28 = vadd.f32 1e-05, %v1580_v51 }
 0x2d3   : > { %v1597_v34 = vadd.f32 1e-05, %v1581_v53  ;;  %v9908_v33 = vpop.eup %9907  ;;  %v1622_v42 = vmul.f32 %v9906_v40, %v10653_v13  ;;  %v1558_v17 = vpop.xlane.xlu1 %1557  ;;  %v1695_v43 = vmul.f32 1.442695, %v1679_v6  ;;  %v10867_v36 = vadd.f32 %v10854_v16, %v1642_v52 }
 0x2d4   : > { %v1561_v27 = vpop.xlane.xlu0 %1560  ;;  %v1623_v9 = vmul.f32 %v9908_v33, %v10656_v24  ;;  %9917 = vrsqrt.f32 %v1596_v28  ;;  %v1582_v8 = vmul.f32 0.015625, %v1558_v17  ;;  %v10873_v32 = vadd.f32 %v10854_v16, %v1643_v45 }
 0x2d5   : > { %v1583_v12 = vmul.f32 0.015625, %v1561_v27  ;;  %v1644_v38 = vmul.f32 %v10848_v0, %v1622_v42  ;;  %9919 = vrsqrt.f32 %v1597_v34  ;;  %v1680_v5 = vsub.f32 0.0, %v10867_v36 }
 0x2d6   : > { %v9910_v13 = vpop.eup %9909  ;;  %v1645_v44 = vmul.f32 %v10848_v0, %v1623_v9  ;;  %v1598_v51 = vadd.f32 1e-05, %v1582_v8  ;;  %9921 = vpow2.f32 %v1695_v43  ;;  %v1681_v33 = vsub.f32 0.0, %v10873_v32 }
 0x2d7   : > { %v1599_v53 = vadd.f32 1e-05, %v1583_v12  ;;  %v9912_v52 = vpop.eup %9911  ;;  %v1624_v24 = vmul.f32 %v9910_v13, %v10665_v48  ;;  %v1564_v6 = vpop.xlane.xlu1 %1563  ;;  %v1697_v28 = vmul.f32 1.442695, %v1680_v5  ;;  %v10879_v34 = vadd.f32 %v10854_v16, %v1644_v38 }
 0x2d8   : > { %v1567_v40 = vpop.xlane.xlu0 %1566  ;;  %v1625_v45 = vmul.f32 %v9912_v52, %v10668_v50  ;;  %9923 = vrsqrt.f32 %v1598_v51  ;;  %v1584_v42 = vmul.f32 0.015625, %v1564_v6  ;;  %v1699_v43 = vmul.f32 1.442695, %v1681_v33 }
 0x2d9   : > { %v1585_v17 = vmul.f32 0.015625, %v1567_v40  ;;  %v1646_v27 = vmul.f32 %v10848_v0, %v1624_v24  ;;  %9925 = vrsqrt.f32 %v1599_v53  ;;  %v1682_v9 = vsub.f32 0.0, %v10879_v34 }
 0x2da   : > { %v9914_v48 = vpop.eup %9913  ;;  %v1647_v8 = vmul.f32 %v10848_v0, %v1625_v45  ;;  %v1600_v12 = vadd.f32 1e-05, %v1584_v42  ;;  %9927 = vpow2.f32 %v1697_v28  ;;  %v10887_v51 = vadd.f32 %v10854_v16, %v1645_v44 }
 0x2db   : > { %v1601_v5 = vadd.f32 1e-05, %v1585_v17  ;;  %v9916_v13 = vpop.eup %9915  ;;  %v1626_v38 = vmul.f32 %v9914_v48, %v10677_v1  ;;  %v1570_v39 = vpop.xlane.xlu1 %1569  ;;  %9929 = vpow2.f32 %v1699_v43  ;;  %v1701_v50 = vmul.f32 1.442695, %v1682_v9 }
 0x2dc   : > { %v1627_v53 = vmul.f32 %v9916_v13, %v10680_v60  ;;  %9931 = vrsqrt.f32 %v1600_v12  ;;  %v1586_v52 = vmul.f32 0.015625, %v1570_v39  ;;  %v10891_v24 = vadd.f32 %v10854_v16, %v1646_v27 }
 0x2dd   : > { %v1648_v6 = vmul.f32 %v10848_v0, %v1626_v38  ;;  %9933 = vrsqrt.f32 %v1601_v5  ;;  %v1683_v40 = vsub.f32 0.0, %v10887_v51  ;;  %v10896_v1 = vadd.f32 %v10854_v16, %v1647_v8 }
 0x2de   : > { %v9918_v28 = vpop.eup %9917  ;;  %v1649_v33 = vmul.f32 %v10848_v0, %v1627_v53  ;;  %v1602_v44 = vadd.f32 1e-05, %v1586_v52  ;;  %9935 = vpow2.f32 %v1701_v50  ;;  %v1684_v60 = vsub.f32 0.0, %v10891_v24 }
 0x2df   : > { %v9920_v45 = vpop.eup %9919  ;;  %v1628_v39 = vmul.f32 %v9918_v28, %v10689_v7  ;;  %v1703_v42 = vmul.f32 1.442695, %v1683_v40  ;;  %v1685_v17 = vsub.f32 0.0, %v10896_v1  ;;  %v10903_v27 = vadd.f32 %v10854_v16, %v1648_v6 }
 0x2e0   : > { %v9922_v43 = vpop.eup %9921  ;;  %v1629_v9 = vmul.f32 %v9920_v45, %v10692_v18  ;;  %9937 = vrsqrt.f32 %v1602_v44  ;;  %v1705_v48 = vmul.f32 1.442695, %v1684_v60  ;;  %v10907_v8 = vadd.f32 %v10854_v16, %v1649_v33 }
 0x2e1   : > { %v1650_v12 = vmul.f32 %v10848_v0, %v1628_v39  ;;  %v1727_v5 = vadd.f32 1.0, %v9922_v43  ;;  %9939 = vpow2.f32 %v1703_v42  ;;  %v1707_v13 = vmul.f32 1.442695, %v1685_v17 }
 0x2e2   : > { %v9924_v7 = vpop.eup %9923  ;;  %v1651_v38 = vmul.f32 %v10848_v0, %v1629_v9  ;;  %9941 = vpow2.f32 %v1705_v48  ;;  %v1686_v50 = vsub.f32 0.0, %v10903_v27  ;;  %v1687_v53 = vsub.f32 0.0, %v10907_v8 }
 0x2e3   : > { %v9926_v52 = vpop.eup %9925  ;;  %v1630_v18 = vmul.f32 %v9924_v7, %v10701_v23  ;;  %9943 = vrcp.f32 %v1727_v5  ;;  %v10915_v6 = vadd.f32 %v10854_v16, %v1650_v12 }
 0x2e4   : > { %v9928_v40 = vpop.eup %9927  ;;  %v1631_v28 = vmul.f32 %v9926_v52, %v10704_v49  ;;  %9945 = vpow2.f32 %v1707_v13  ;;  %v1709_v33 = vmul.f32 1.442695, %v1686_v50  ;;  %v1711_v44 = vmul.f32 1.442695, %v1687_v53 }
 0x2e5   : > { %v9930_v60 = vpop.eup %9929  ;;  %v1652_v45 = vmul.f32 %v10848_v0, %v1630_v18  ;;  %v1728_v39 = vadd.f32 1.0, %v9928_v40  ;;  %v1688_v42 = vsub.f32 0.0, %v10915_v6  ;;  %v10921_v17 = vadd.f32 %v10854_v16, %v1651_v38 }
 0x2e6   : > { %v9932_v23 = vpop.eup %9931  ;;  %v1653_v43 = vmul.f32 %v10848_v0, %v1631_v28  ;;  %v1729_v9 = vadd.f32 1.0, %v9930_v60  ;;  %9947 = vpow2.f32 %v1709_v33 }
 0x2e7   : > { %v9934_v48 = vpop.eup %9933  ;;  %v1632_v49 = vmul.f32 %v9932_v23, %v10713_v10  ;;  %9949 = vrcp.f32 %v1728_v39  ;;  %v1713_v12 = vmul.f32 1.442695, %v1688_v42  ;;  %v1689_v5 = vsub.f32 0.0, %v10921_v17 }
 0x2e8   : > { %v9936_v13 = vpop.eup %9935  ;;  %v1633_v7 = vmul.f32 %v9934_v48, %v10716_v15  ;;  %9951 = vrcp.f32 %v1729_v9  ;;  %v10928_v50 = vadd.f32 %v10854_v16, %v1652_v45  ;;  %v10931_v38 = vadd.f32 %v10854_v16, %v1653_v43 }
 0x2e9   : > { %v1654_v53 = vmul.f32 %v10848_v0, %v1632_v49  ;;  %v1730_v52 = vadd.f32 1.0, %v9936_v13  ;;  %9953 = vpow2.f32 %v1711_v44  ;;  %v1715_v18 = vmul.f32 1.442695, %v1689_v5 }
 0x2ea   : > { %v9938_v10 = vpop.eup %9937  ;;  %v1655_v40 = vmul.f32 %v10848_v0, %v1633_v7  ;;  %9955 = vpow2.f32 %v1713_v12  ;;  %v1690_v28 = vsub.f32 0.0, %v10928_v50  ;;  %v1691_v15 = vsub.f32 0.0, %v10931_v38 }
 0x2eb   : > { %v9940_v33 = vpop.eup %9939  ;;  %v1634_v60 = vmul.f32 %v9938_v10, %v10725_v21  ;;  %9957 = vrcp.f32 %v1730_v52  ;;  %v10939_v45 = vadd.f32 %v10854_v16, %v1654_v53 }
 0x2ec   : > { %v9942_v39 = vpop.eup %9941  ;;  %v1731_v42 = vadd.f32 1.0, %v9940_v33  ;;  %9959 = vpow2.f32 %v1715_v18  ;;  %v1717_v44 = vmul.f32 1.442695, %v1690_v28  ;;  %v10943_v48 = vadd.f32 %v10854_v16, %v1655_v40 }
 0x2ed   : > { %v9944_v23 = vpop.eup %9943  ;;  %v1732_v43 = vadd.f32 1.0, %v9942_v39  ;;  %v1692_v9 = vsub.f32 0.0, %v10939_v45  ;;  %v1656_v12 = vmul.f32 %v10848_v0, %v1634_v60  ;;  %v1719_v5 = vmul.f32 1.442695, %v1691_v15 }
 0x2ee   : > { %v9946_v49 = vpop.eup %9945  ;;  %v1744_v21 = vmul.f32 %v9944_v23, %v10859_v46  ;;  %9961 = vrcp.f32 %v1731_v42  ;;  %v1693_v18 = vsub.f32 0.0, %v10943_v48 }
 0x2ef   : > { %9963 = vrcp.f32 %v1732_v43  ;;  %v1733_v13 = vadd.f32 1.0, %v9946_v49  ;;  %v1721_v52 = vmul.f32 1.442695, %v1692_v9  ;;  %v10953_v46 = vadd.f32 %v10854_v16, %v1656_v12 }
 0x2f0   : > { %v9948_v7 = vpop.eup %9947  ;;  %v1784_v53 = vsel %vm1425_vm1, %v1744_v21, 0  ;;  %9965 = vpow2.f32 %v1717_v44  ;;  %v1723_v43 = vmul.f32 1.442695, %v1693_v18 }
 0x2f1   : > { %v9950_v10 = vpop.eup %9949  ;;  %v10949_v28 = vand.u32 4294901760, %v1784_v53  ;;  %9967 = vrcp.f32 %v1733_v13  ;;  %v1734_v40 = vadd.f32 1.0, %v9948_v7  ;;  %v1694_v13 = vsub.f32 0.0, %v10953_v46 }
 0x2f2   : > { %v9952_v33 = vpop.eup %9951  ;;  %v1746_v0 = vmul.f32 %v9950_v10, %v10867_v36  ;;  %9969 = vpow2.f32 %v1719_v5 }
 0x2f3   : > { %v9954_v15 = vpop.eup %9953  ;;  %v10956_v60 = vsub.f32 %v1784_v53, %v10949_v28  ;;  %v1748_v39 = vmul.f32 %v9952_v33, %v10873_v32  ;;  %9971 = vrcp.f32 %v1734_v40 }
 0x2f4   : > { %v9956_v42 = vpop.eup %9955  ;;  %v1787_v44 = vsel %vm1425_vm1, %v1746_v0, 0  ;;  %v1735_v23 = vadd.f32 1.0, %v9954_v15  ;;  %9973 = vpow2.f32 %v1721_v52 }
 0x2f5   : > { %v9958_v9 = vpop.eup %9957  ;;  %v1906_v36 = vand.u32 4294901760, %v10956_v60  ;;  %v10961_v49 = vand.u32 4294901760, %v1787_v44  ;;  %v1790_v16 = vsel %vm1425_vm1, %v1748_v39, 0  ;;  %v1736_v12 = vadd.f32 1.0, %v9956_v42 }
 0x2f6   : > { %v9960_v21 = vpop.eup %9959  ;;  %v10964_v5 = vand.u32 4294901760, %v1790_v16  ;;  %v1750_v32 = vmul.f32 %v9958_v9, %v10879_v34  ;;  %9975 = vrcp.f32 %v1735_v23  ;;  %v1725_v9 = vmul.f32 1.442695, %v1694_v13 }
 0x2f7   : > { %v1907_v7 = vsub.f32 %v10956_v60, %v1906_v36  ;;  %v10972_v53 = vsub.f32 %v1787_v44, %v10961_v49  ;;  %9977 = vrcp.f32 %v1736_v12  ;;  %v1737_v52 = vadd.f32 1.0, %v9960_v21 }
 0x2f8   : > { %v9962_v18 = vpop.eup %9961  ;;  %v10975_v10 = vsub.f32 %v1790_v16, %v10964_v5  ;;  %v1793_v40 = vsel %vm1425_vm1, %v1750_v32, 0  ;;  %9979 = vpow2.f32 %v1723_v43 }
 0x2f9   : > { %v9964_v34 = vpop.eup %9963  ;;  %v1908_v33 = vand.u32 4294901760, %v1907_v7  ;;  %v13082_v0 = vand.u32 4294901760, %v10972_v53  ;;  %v10979_v15 = vand.u32 4294901760, %v1793_v40  ;;  %v1752_v39 = vmul.f32 %v9962_v18, %v10887_v51 }
 0x2fa   : > { %v9966_v42 = vpop.eup %9965  ;;  %v13080_v44 = vand.u32 4294901760, %v10975_v10  ;;  %v1754_v23 = vmul.f32 %v9964_v34, %v10891_v24  ;;  %9981 = vrcp.f32 %v1737_v52  ;;  %v13184_v61 = vand.u32 4294901760, %v10972_v53 }
 0x2fb   : > { %v9968_v16 = vpop.eup %9967  ;;  %8414 = vmatprep.mubr.f32.mxu1 %v1908_v33  ;;  %v1917_v43 = vsub.f32 %v10972_v53, %v13082_v0  ;;  %v10988_v12 = vsub.f32 %v1793_v40, %v10979_v15  ;;  %v1796_v21 = vsel %vm1425_vm1, %v1752_v39, 0  ;;  %v1738_v32 = vadd.f32 1.0, %v9966_v42 }
 0x2fc   : > { %v9970_v51 = vpop.eup %9969  ;;  %v1927_v7 = vsub.f32 %v10975_v10, %v13080_v44  ;;  %v10994_v24 = vand.u32 4294901760, %v1796_v21  ;;  %v1799_v13 = vsel %vm1425_vm1, %v1754_v23, 0  ;;  %v1756_v52 = vmul.f32 %v9968_v16, %v10896_v1 }
 0x2fd   : > { %v9972_v18 = vpop.eup %9971  ;;  %v1918_v34 = vand.u32 4294901760, %v1917_v43  ;;  %v13081_v33 = vand.u32 4294901760, %v10988_v12  ;;  %v10999_v40 = vand.u32 4294901760, %v1799_v13  ;;  %9983 = vrcp.f32 %v1738_v32 }
 0x2fe   : > { %v9974_v39 = vpop.eup %9973  ;;  %v1928_v42 = vand.u32 4294901760, %v1927_v7  ;;  %v11002_v11 = vsub.f32 %v1796_v21, %v10994_v24  ;;  %v1802_v19 = vsel %vm1425_vm1, %v1756_v52, 0  ;;  %v1758_v44 = vmul.f32 %v9972_v18, %v10903_v27 }
 0x2ff   : > { %8415 = vmatmul.mubr.f32.vlgmr.msra.gmra.mrb[0].mxu1 %v1918_v34  ;;  %v1937_v1 = vsub.f32 %v10988_v12, %v13081_v33  ;;  %v11010_v23 = vsub.f32 %v1799_v13, %v10999_v40  ;;  %v11012_v16 = vand.u32 4294901760, %v1802_v19  ;;  %v1739_v43 = vadd.f32 1.0, %v9970_v51 }
 0x300   : > { %v9976_v32 = vpop.eup %9975  ;;  %9137 = vmatpush3.bf16.msra.mxu1 %v10784_v57  ;;  %8417 = vmatprep.mubr.f32.mxu1 %v1928_v42  ;;  %v13091_v21 = vand.u32 4294901760, %v11002_v11  ;;  %v1805_v7 = vsel %vm1425_vm1, %v1758_v44, 0  ;;  %v1740_v27 = vadd.f32 1.0, %v9974_v39  ;;  %9985 = vpow2.f32 %v1725_v9 }
 0x301   : > { %v9978_v52 = vpop.eup %9977  ;;  %v1938_v18 = vand.u32 4294901760, %v1937_v1  ;;  %9139 = vmatprep.subr.bf16.mxu1 %v10799_v2  ;;  %v13083_v13 = vand.u32 4294901760, %v11010_v23  ;;  %v11020_v34 = vsub.f32 %v1802_v19, %v11012_v16  ;;  %v11022_v51 = vand.u32 4294901760, %v1805_v7 }
 0x302   : > { %v9980_v33 = vpop.eup %9979  ;;  %v1947_v57 = vsub.f32 %v11002_v11, %v13091_v21  ;;  %v1760_v44 = vmul.f32 %v9976_v32, %v10907_v8  ;;  %v1762_v9 = vmul.f32 %v9978_v52, %v10915_v6  ;;  %9987 = vrcp.f32 %v1739_v43 }
 0x303   : > { %8418 = vmatmul.mubr.f32.gmra.mrb[2].mxu1 %v1938_v18  ;;  %v1957_v39 = vsub.f32 %v11010_v23, %v13083_v13  ;;  %v13087_v19 = vand.u32 4294901760, %v11020_v34  ;;  %v11034_v42 = vsub.f32 %v1805_v7, %v11022_v51  ;;  %9989 = vrcp.f32 %v1740_v27 }
 0x304   : > { %v9982_v1 = vpop.eup %9981  ;;  %v1948_v0 = vand.u32 4294901760, %v1947_v57  ;;  %9141 = vmatpush3.bf16.msra.mxu1 %v10799_v2  ;;  %v1808_v8 = vsel %vm1425_vm1, %v1760_v44, 0  ;;  %v1811_v6 = vsel %vm1425_vm1, %v1762_v9, 0  ;;  %v1741_v43 = vadd.f32 1.0, %v9980_v33 }
 0x305   : > { %v1958_v32 = vand.u32 4294901760, %v1957_v39  ;;  %v1967_v52 = vsub.f32 %v11020_v34, %v13087_v19  ;;  %v13084_v18 = vand.u32 4294901760, %v11034_v42  ;;  %v11043_v13 = vand.u32 4294901760, %v1808_v8  ;;  %9143 = vmatprep.subr.bf16.mxu1 %v10813_v35 }
 0x306   : > { %8420 = vmatprep.mubr.f32.mxu1 %v1948_v0  ;;  %v11046_v7 = vand.u32 4294901760, %v1811_v6  ;;  %v1764_v2 = vmul.f32 %v9982_v1, %v10921_v17  ;;  %9991 = vrcp.f32 %v1741_v43  ;;  %v13189_v26 = vand.u32 4294901760, %v11002_v11 }
 0x307   : > { %v9984_v27 = vpop.eup %9983  ;;  %8421 = vmatmul.mubr.f32.gmra.mrb[4].mxu1 %v1958_v32  ;;  %v1968_v33 = vand.u32 4294901760, %v1967_v52  ;;  %v1977_v57 = vsub.f32 %v11034_v42, %v13084_v18  ;;  %v11053_v44 = vsub.f32 %v1808_v8, %v11043_v13 }
 0x308   : > { %v11056_v9 = vsub.f32 %v1811_v6, %v11046_v7  ;;  %9145 = vmatpush3.bf16.msra.mxu1 %v10813_v35  ;;  %v1814_v0 = vsel %vm1425_vm1, %v1764_v2, 0  ;;  %v1766_v17 = vmul.f32 %v9984_v27, %v10928_v50 }
 0x309   : > { %8423 = vmatprep.mubr.f32.mxu1 %v1968_v33  ;;  %v1978_v39 = vand.u32 4294901760, %v1977_v57  ;;  %v13085_v1 = vand.u32 4294901760, %v11053_v44  ;;  %v11062_v43 = vand.u32 4294901760, %v1814_v0  ;;  %9147 = vmatprep.subr.bf16.mxu1 %v10827_v54 }
 0x30a   : > { %v9986_v32 = vpop.eup %9985  ;;  %v13086_v8 = vand.u32 4294901760, %v11056_v9  ;;  %v1817_v6 = vsel %vm1425_vm1, %v1766_v17, 0  ;;  %v13196_v37 = vand.u32 4294901760, %v11056_v9 }
 0x30b   : > { %8424 = vmatmul.mubr.f32.gmra.mrb[6].mxu1 %v1978_v39  ;;  %v1987_v35 = vsub.f32 %v11053_v44, %v13085_v1  ;;  %v11071_v50 = vsub.f32 %v1814_v0, %v11062_v43  ;;  %v11073_v52 = vand.u32 4294901760, %v1817_v6  ;;  %v1742_v2 = vadd.f32 1.0, %v9986_v32 }
 0x30c   : > { %v9988_v27 = vpop.eup %9987  ;;  %v1997_v33 = vsub.f32 %v11056_v9, %v13086_v8  ;;  %9149 = vmatpush3.bf16.msra.mxu1 %v10827_v54 }
 0x30d   : > { %v9990_v57 = vpop.eup %9989  ;;  %v1988_v17 = vand.u32 4294901760, %v1987_v35  ;;  %v13089_v39 = vand.u32 4294901760, %v11071_v50  ;;  %v11081_v18 = vsub.f32 %v1817_v6, %v11073_v52  ;;  %v1768_v0 = vmul.f32 %v9988_v27, %v10931_v38  ;;  %9151 = vmatprep.subr.bf16.mxu1 %v10831_v55 }
 0x30e   : > { %v1998_v1 = vand.u32 4294901760, %v1997_v33  ;;  %v1770_v32 = vmul.f32 %v9990_v57, %v10939_v45  ;;  %9993 = vrcp.f32 %v1742_v2  ;;  %v13197_v41 = vand.u32 4294901760, %v11071_v50 }
 0x30f   : > { %8426 = vmatprep.mubr.f32.mxu1 %v1988_v17  ;;  %v2007_v54 = vsub.f32 %v11071_v50, %v13089_v39  ;;  %v13088_v35 = vand.u32 4294901760, %v11081_v18  ;;  %v1820_v8 = vsel %vm1425_vm1, %v1768_v0, 0 }
 0x310   : > { %v9992_v19 = vpop.eup %9991  ;;  %8427 = vmatmul.mubr.f32.gmra.mrb[8].mxu1 %v1998_v1  ;;  %v11091_v6 = vand.u32 4294901760, %v1820_v8  ;;  %v1823_v38 = vsel %vm1425_vm1, %v1770_v32, 0 }
 0x311   : > { %v2008_v27 = vand.u32 4294901760, %v2007_v54  ;;  %v2017_v45 = vsub.f32 %v11081_v18, %v13088_v35  ;;  %v11097_v2 = vand.u32 4294901760, %v1823_v38  ;;  %v1772_v33 = vmul.f32 %v9992_v19, %v10943_v48 }
 0x312   : > { %v11101_v57 = vsub.f32 %v1820_v8, %v11091_v6 }
 0x313   : > { %8429 = vmatprep.mubr.f32.mxu1 %v2008_v27  ;;  %v2018_v17 = vand.u32 4294901760, %v2017_v45  ;;  %v11104_v1 = vsub.f32 %v1823_v38, %v11097_v2  ;;  %v1826_v0 = vsel %vm1425_vm1, %v1772_v33, 0 }
 0x314   : > { %v13090_v32 = vand.u32 4294901760, %v11101_v57  ;;  %v11108_v54 = vand.u32 4294901760, %v1826_v0 }
 0x315   : > { %8430 = vmatmul.mubr.f32.gmra.mrb[10].mxu1 %v2018_v17  ;;  %v13092_v35 = vand.u32 4294901760, %v11104_v1 }
 0x316   : > { %v2027_v48 = vsub.f32 %v11101_v57, %v13090_v32  ;;  %v11115_v19 = vsub.f32 %v1826_v0, %v11108_v54 }
 0x317   : > { %v2037_v8 = vsub.f32 %v11104_v1, %v13092_v35 }
 0x318   : > { %v9994_v38 = vpop.eup %9993  ;;  %v2028_v27 = vand.u32 4294901760, %v2027_v48  ;;  %v2046_v45 = vand.u32 4294901760, %v11115_v19 }
 0x319   : > { %v2038_v33 = vand.u32 4294901760, %v2037_v8  ;;  %v1774_v17 = vmul.f32 %v9994_v38, %v10953_v46 }
 0x31a   : > { %8432 = vmatprep.mubr.f32.mxu1 %v2028_v27  ;;  %v2047_v39 = vsub.f32 %v11115_v19, %v2046_v45 }
 0x31b   : > { %8433 = vmatmul.mubr.f32.gmra.mrb[12].mxu1 %v2038_v33  ;;  %v1829_v0 = vsel %vm1425_vm1, %v1774_v17, 0 }
 0x31c   : > { %v2048_v32 = vand.u32 4294901760, %v2047_v39  ;;  %v11126_v21 = vand.u32 4294901760, %v1829_v0 }
 0x31e   : > { %8435 = vmatprep.mubr.f32.mxu1 %v2048_v32  ;;  %v11129_v35 = vsub.f32 %v1829_v0, %v11126_v21 }
 0x320   : > { %v2056_v48 = vand.u32 4294901760, %v11129_v35 }
 0x322   : > { %v2057_v46 = vsub.f32 %v11129_v35, %v2056_v48 }
 0x324   : > { %v2058_v8 = vand.u32 4294901760, %v2057_v46 }
 0x326   : > { %8436 = vmatmul.mubr.f32.gmra.mrb[14].mxu1 %v2058_v8 }
 0x327   : > { %8454 = vmatprep.mubr.f32.mxu1 %v10949_v28 }
 0x32a   : > { %8455 = vmatmul.mubr.f32.vlgmr.msra.gmra.mrb[0].mxu1 %v10961_v49 }
 0x32b   : > { %9153 = vmatpush3.bf16.msra.mxu1 %v10831_v55  ;;  %8457 = vmatprep.mubr.f32.mxu1 %v10964_v5  ;;  %v9182_v55 = vpack.c.bf16 %v2074_v22, %v2067_v14  ;;  %v13185_v14 = vand.u32 4294901760, %v10975_v10  ;;  %v13186_v22 = vand.u32 4294901760, %v10801_v58  ;;  %v13193_v58 = vand.u32 4294901760, %v11020_v34 }
 0x32c   : > { %9155 = vmatprep.subr.bf16.mxu1 %v10835_v56 }
 0x32e   : > { %8458 = vmatmul.mubr.f32.gmra.mrb[2].mxu1 %v10979_v15 }
 0x32f   : > { %8460 = vmatprep.mubr.f32.mxu1 %v10994_v24  ;;  %9157 = vmatpush3.bf16.msra.mxu1 %v10835_v56  ;;  %v13187_v56 = vand.u32 4294901760, %v10803_v59  ;;  %v13194_v59 = vand.u32 4294901760, %v11034_v42 }
 0x330   : > { %9159 = vmatprep.subr.bf16.mxu1 %v10839_v63 }
 0x332   : > { %8461 = vmatmul.mubr.f32.gmra.mrb[4].mxu1 %v10999_v40 }
 0x333   : > { %8463 = vmatprep.mubr.f32.mxu1 %v11012_v16  ;;  %9161 = vmatpush3.bf16.msra.mxu1 %v10839_v63  ;;  %v9190_v63 = vpack.c.bf16 %v13187_v56, %v13186_v22 }
 0x334   : > { %9163 = vmatprep.subr.bf16.mxu1 %v10843_v25 }
 0x336   : > { %8464 = vmatmul.mubr.f32.gmra.mrb[6].mxu1 %v11022_v51 }
 0x337   : > { %8466 = vmatprep.mubr.f32.mxu1 %v11043_v13  ;;  %9165 = vmatpush3.bf16.msra.mxu1 %v10843_v25  ;;  %v13188_v25 = vand.u32 4294901760, %v10988_v12 }
 0x338   : > { %9167 = vmatprep.subr.bf16.mxu1 %v10738_v47 }
 0x33a   : > { %8467 = vmatmul.mubr.f32.gmra.mrb[8].mxu1 %v11046_v7 }
 0x33b   : > { %8469 = vmatprep.mubr.f32.mxu1 %v11062_v43 }
 0x33e   : > { %8470 = vmatmul.mubr.f32.gmra.mrb[10].mxu1 %v11073_v52 }
 0x33f   : > { %8472 = vmatprep.mubr.f32.mxu1 %v11091_v6 }
 0x342   : > { %8473 = vmatmul.mubr.f32.gmra.mrb[12].mxu1 %v11097_v2 }
 0x343   : > { %8475 = vmatprep.mubr.f32.mxu1 %v11108_v54 }
 0x346   : > { %8476 = vmatmul.mubr.f32.gmra.mrb[14].mxu1 %v11126_v21 }
 0x347   : > { %8494 = vmatprep.mubr.f32.mxu1 %v10956_v60  ;;  %v13192_v60 = vand.u32 4294901760, %v11010_v23 }
 0x34a   : > { %8495 = vmatmul.mubr.f32.vlgmr.msra.gmra.mrb[0].mxu1 %v10972_v53  ;;  %v13199_v53 = vand.u32 4294901760, %v11101_v57 }
 0x34b   : > { %9169 = vmatpush3.bf16.msra.mxu1 %v10738_v47  ;;  %8497 = vmatprep.mubr.f32.mxu1 %v10975_v10  ;;  %v13200_v10 = vand.u32 4294901760, %v11104_v1 }
 0x34c   : > { %9171 = vmatprep.subr.bf16.mxu1 %v10760_v29 }
 0x34e   : > { %8498 = vmatmul.mubr.f32.gmra.mrb[2].mxu1 %v10988_v12 }
 0x34f   : > { %8500 = vmatprep.mubr.f32.mxu1 %v11002_v11  ;;  %9173 = vmatpush3.bf16.msra.mxu1 %v10760_v29  ;;  %v13195_v11 = vand.u32 4294901760, %v11053_v44 }
 0x350   : > { %9175 = vmatprep.subr.bf16.mxu1 %v10762_v30 }
 0x352   : > { %8501 = vmatmul.mubr.f32.gmra.mrb[4].mxu1 %v11010_v23 }
 0x353   : > { %8503 = vmatprep.mubr.f32.mxu1 %v11020_v34  ;;  %9177 = vmatpush3.bf16.msra.mxu1 %v10762_v30 }
 0x354   : > { %9179 = vmatprep.subr.bf16.mxu1 %v10767_v3 }
 0x356   : > { %8504 = vmatmul.mubr.f32.gmra.mrb[6].mxu1 %v11034_v42 }
 0x357   : > { %8506 = vmatprep.mubr.f32.mxu1 %v11053_v44  ;;  %9181 = vmatpush3.bf16.msra.mxu1 %v10767_v3 }
 0x358   : > { %9183 = vmatprep.subr.bf16.mxu1 %v9182_v55 }
 0x35a   : > { %8507 = vmatmul.mubr.f32.gmra.mrb[8].mxu1 %v11056_v9 }
 0x35b   : > { %8509 = vmatprep.mubr.f32.mxu1 %v11071_v50 }
 0x35e   : > { %8510 = vmatmul.mubr.f32.gmra.mrb[10].mxu1 %v11081_v18 }
 0x35f   : > { %8512 = vmatprep.mubr.f32.mxu1 %v11101_v57 }
 0x362   : > { %8513 = vmatmul.mubr.f32.gmra.mrb[12].mxu1 %v11104_v1 }
 0x363   : > { %8515 = vmatprep.mubr.f32.mxu1 %v11115_v19 }
 0x366   : > { %8516 = vmatmul.mubr.f32.gmra.mrb[14].mxu1 %v11129_v35 }
 0x367   : > { %8534 = vmatprep.mubr.f32.mxu1 %v1906_v36  ;;  %v13198_v36 = vand.u32 4294901760, %v11081_v18 }
 0x36a   : > { %8535 = vmatmul.mubr.f32.vlgmr.msra.gmra.mrb[0].mxu1 %v13184_v61 }
 0x36b   : > { %9185 = vmatpush3.bf16.msra.mxu1 %v9182_v55  ;;  %8537 = vmatprep.mubr.f32.mxu1 %v13185_v14 }
 0x36c   : > { %9187 = vmatprep.subr.bf16.mxu1 %v9186_v4 }
 0x36e   : > { %8538 = vmatmul.mubr.f32.gmra.mrb[2].mxu1 %v13188_v25 }
 0x36f   : > { %8540 = vmatprep.mubr.f32.mxu1 %v13189_v26  ;;  %9189 = vmatpush3.bf16.msra.mxu1 %v9186_v4 }
 0x370   : > { %9191 = vmatprep.subr.bf16.mxu1 %v9190_v63 }
 0x372   : > { %8541 = vmatmul.mubr.f32.gmra.mrb[4].mxu1 %v13192_v60 }
 0x373   : > { %8543 = vmatprep.mubr.f32.mxu1 %v13193_v58  ;;  %9193 = vmatpush3.bf16.msra.mxu1 %v9190_v63 }
 0x374   : > { %9195 = vmatprep.subr.bf16.mxu1 %v9194_v20 }
 0x376   : > { %8544 = vmatmul.mubr.f32.gmra.mrb[6].mxu1 %v13194_v59 }
 0x377   : > { %8546 = vmatprep.mubr.f32.mxu1 %v13195_v11  ;;  %9197 = vmatpush3.bf16.msra.mxu1 %v9194_v20 }
 0x378   : > { %9199 = vmatprep.subr.bf16.mxu1 %v10738_v47 }
 0x37a   : > { %8547 = vmatmul.mubr.f32.gmra.mrb[8].mxu1 %v13196_v37 }
 0x37b   : > { %8549 = vmatprep.mubr.f32.mxu1 %v13197_v41 }
 0x37e   : > { %8550 = vmatmul.mubr.f32.gmra.mrb[10].mxu1 %v13198_v36 }
 0x37f   : > { %8552 = vmatprep.mubr.f32.mxu1 %v13199_v53 }
 0x382   : > { %8553 = vmatmul.mubr.f32.gmra.mrb[12].mxu1 %v13200_v10 }
 0x383   : > { %8555 = vmatprep.mubr.f32.mxu1 %v2046_v45 }
 0x386   : > { %8556 = vmatmul.mubr.f32.gmra.mrb[14].mxu1 %v2056_v48 }
 0x387   : > { %8574 = vmatprep.mubr.f32.mxu1 %v10949_v28 }
 0x38a   : > { %8575 = vmatmul.mubr.f32.vlgmr.msra.gmra.mrb[0].mxu1 %v10961_v49 }
 0x38b   : > { %9201 = vmatpush3.bf16.msra.mxu1 %v10738_v47  ;;  %8577 = vmatprep.mubr.f32.mxu1 %v10964_v5  ;;  %v7669_v47 = vld [vmem:[%s13073_s3 + $0x3] ss:$0 sm:$0xff] }
 0x38c   : > { %9203 = vmatprep.subr.bf16.mxu1 %v10760_v29 }
 0x38e   : > { %8578 = vmatmul.mubr.f32.gmra.mrb[2].mxu1 %v10979_v15 }
 0x38f   : > { %8580 = vmatprep.mubr.f32.mxu1 %v10994_v24  ;;  %9205 = vmatpush3.bf16.msra.mxu1 %v10760_v29 }
 0x390   : > { %9207 = vmatprep.subr.bf16.mxu1 %v10762_v30 }
 0x392   : > { %8581 = vmatmul.mubr.f32.gmra.mrb[4].mxu1 %v10999_v40 }
 0x393   : > { %8583 = vmatprep.mubr.f32.mxu1 %v11012_v16  ;;  %9209 = vmatpush3.bf16.msra.mxu1 %v10762_v30 }
 0x394   : > { %9211 = vmatprep.subr.bf16.mxu1 %v10767_v3 }
 0x396   : > { %8584 = vmatmul.mubr.f32.gmra.mrb[6].mxu1 %v11022_v51 }
 0x397   : > { %8586 = vmatprep.mubr.f32.mxu1 %v11043_v13  ;;  %9213 = vmatpush3.bf16.msra.mxu1 %v10767_v3 }
 0x39a   : > { %8587 = vmatmul.mubr.f32.gmra.mrb[8].mxu1 %v11046_v7 }
 0x39b   : > { %8589 = vmatprep.mubr.f32.mxu1 %v11062_v43 }
 0x39e   : > { %8590 = vmatmul.mubr.f32.gmra.mrb[10].mxu1 %v11073_v52 }
 0x39f   : > { %8592 = vmatprep.mubr.f32.mxu1 %v11091_v6 }
 0x3a2   : > { %8593 = vmatmul.mubr.f32.gmra.mrb[12].mxu1 %v11097_v2 }
 0x3a3   : > { %8595 = vmatprep.mubr.f32.mxu1 %v11108_v54 }
 0x3a6   : > { %8596 = vmatmul.mubr.f32.gmra.mrb[14].mxu1 %v11126_v21 }
 0x3a7   : > { %8614 = vmatprep.mubr.f32.mxu1 %v10949_v28 }
 0x3aa   : > { %8615 = vmatmul.mubr.f32.vlgmr.msra.gmra.mrb[0].mxu1 %v10961_v49 }
 0x3ab   : > { %8617 = vmatprep.mubr.f32.mxu1 %v10964_v5 }
 0x3ae   : > { %8618 = vmatmul.mubr.f32.gmra.mrb[2].mxu1 %v10979_v15 }
 0x3af   : > { %8620 = vmatprep.mubr.f32.mxu1 %v10994_v24 }
 0x3b2   : > { %8621 = vmatmul.mubr.f32.gmra.mrb[4].mxu1 %v10999_v40 }
 0x3b3   : > { %8623 = vmatprep.mubr.f32.mxu1 %v11012_v16 }
 0x3b6   : > { %8624 = vmatmul.mubr.f32.gmra.mrb[6].mxu1 %v11022_v51 }
 0x3b7   : > { %8626 = vmatprep.mubr.f32.mxu1 %v11043_v13 }
 0x3ba   : > { %8627 = vmatmul.mubr.f32.gmra.mrb[8].mxu1 %v11046_v7 }
 0x3bb   : > { %8629 = vmatprep.mubr.f32.mxu1 %v11062_v43 }
 0x3be   : > { %8630 = vmatmul.mubr.f32.gmra.mrb[10].mxu1 %v11073_v52 }
 0x3bf   : > { %8632 = vmatprep.mubr.f32.mxu1 %v11091_v6 }
 0x3c2   : > { %8633 = vmatmul.mubr.f32.gmra.mrb[12].mxu1 %v11097_v2 }
 0x3c3   : > { %8635 = vmatprep.mubr.f32.mxu1 %v11108_v54 }
 0x3c6   : > { %8636 = vmatmul.mubr.f32.gmra.mrb[14].mxu1 %v11126_v21 }
 0x47d   : > { %v8616_v29 = vpop.f32.mrb[0].mxu1 }
 0x47e   : > { %v11273_v30 = vadd.f32 %v8616_v29, %v7669_v47  ;;  %v2919_v3 = vpop.f32.mrb[1].mxu1 }
 0x47f   : > { %v11275_v28 = vadd.f32 %v7669_v47, %v2919_v3 }
 0x480   : > { %v3041_v49 = vsel %vm221_vm0, %v11273_v30, 0.0 }
 0x481   : > { %3042 = vadd.xlane.f32.xlu1 %v3041_v49  ;;  %v8619_v5 = vpop.f32.mrb[2].mxu1  ;;  %v3038_v15 = vsel %vm221_vm0, %v11275_v28, 0.0 }
 0x482   : > { %v11281_v12 = vadd.f32 %v8619_v5, %v7669_v47  ;;  %3039 = vadd.xlane.f32.xlu0 %v3038_v15  ;;  %v2931_v24 = vpop.f32.mrb[3].mxu1 }
 0x483   : > { %v11283_v40 = vadd.f32 %v7669_v47, %v2931_v24 }
 0x484   : > { %v3047_v23 = vsel %vm221_vm0, %v11281_v12, 0.0 }
 0x485   : > { %3048 = vadd.xlane.f32.xlu1 %v3047_v23  ;;  %v8622_v16 = vpop.f32.mrb[4].mxu1  ;;  %v3044_v21 = vsel %vm221_vm0, %v11283_v40, 0.0 }
 0x486   : > { %v11289_v13 = vadd.f32 %v8622_v16, %v7669_v47  ;;  %3045 = vadd.xlane.f32.xlu0 %v3044_v21  ;;  %v2943_v34 = vpop.f32.mrb[5].mxu1 }
 0x487   : > { %v11291_v51 = vadd.f32 %v7669_v47, %v2943_v34 }
 0x488   : > { %v3053_v42 = vsel %vm221_vm0, %v11289_v13, 0.0 }
 0x489   : > { %3054 = vadd.xlane.f32.xlu1 %v3053_v42  ;;  %v8625_v18 = vpop.f32.mrb[6].mxu1  ;;  %v3050_v7 = vsel %vm221_vm0, %v11291_v51, 0.0 }
 0x48a   : > { %v11297_v44 = vadd.f32 %v8625_v18, %v7669_v47  ;;  %3051 = vadd.xlane.f32.xlu0 %v3050_v7  ;;  %v2955_v9 = vpop.f32.mrb[7].mxu1 }
 0x48b   : > { %v11299_v43 = vadd.f32 %v7669_v47, %v2955_v9 }
 0x48c   : > { %v3059_v50 = vsel %vm221_vm0, %v11297_v44, 0.0 }
 0x48d   : > { %3060 = vadd.xlane.f32.xlu1 %v3059_v50  ;;  %v8628_v52 = vpop.f32.mrb[8].mxu1  ;;  %v3056_v39 = vsel %vm221_vm0, %v11299_v43, 0.0 }
 0x48e   : > { %v11305_v35 = vadd.f32 %v8628_v52, %v7669_v47  ;;  %3057 = vadd.xlane.f32.xlu0 %v3056_v39  ;;  %v2967_v6 = vpop.f32.mrb[9].mxu1 }
 0x48f   : > { %v11307_v2 = vadd.f32 %v7669_v47, %v2967_v6 }
 0x490   : > { %v3065_v57 = vsel %vm221_vm0, %v11305_v35, 0.0 }
 0x491   : > { %3066 = vadd.xlane.f32.xlu1 %v3065_v57  ;;  %v8631_v1 = vpop.f32.mrb[10].mxu1  ;;  %v3062_v32 = vsel %vm221_vm0, %v11307_v2, 0.0 }
 0x492   : > { %v11313_v54 = vadd.f32 %v8631_v1, %v7669_v47  ;;  %3063 = vadd.xlane.f32.xlu0 %v3062_v32  ;;  %v2979_v19 = vpop.f32.mrb[11].mxu1 }
 0x493   : > { %v11315_v38 = vadd.f32 %v7669_v47, %v2979_v19 }
 0x494   : > { %v3071_v27 = vsel %vm221_vm0, %v11313_v54, 0.0 }
 0x495   : > { %3072 = vadd.xlane.f32.xlu1 %v3071_v27  ;;  %v8634_v45 = vpop.f32.mrb[12].mxu1  ;;  %v3068_v33 = vsel %vm221_vm0, %v11315_v38, 0.0 }
 0x496   : > { %v11321_v17 = vadd.f32 %v8634_v45, %v7669_v47  ;;  %3069 = vadd.xlane.f32.xlu0 %v3068_v33  ;;  %v2991_v0 = vpop.f32.mrb[13].mxu1 }
 0x497   : > { %v11323_v48 = vadd.f32 %v7669_v47, %v2991_v0 }
 0x498   : > { %v3077_v46 = vsel %vm221_vm0, %v11321_v17, 0.0 }
 0x499   : > { %3078 = vadd.xlane.f32.xlu1 %v3077_v46  ;;  %v8637_v8 = vpop.f32.mrb[14].mxu1  ;;  %v3074_v55 = vsel %vm221_vm0, %v11323_v48, 0.0 }
 0x49a   : > { %v11329_v4 = vadd.f32 %v8637_v8, %v7669_v47  ;;  %3075 = vadd.xlane.f32.xlu0 %v3074_v55  ;;  %v3003_v61 = vpop.f32.mrb[15].mxu1 }
 0x49b   : > { %v11331_v14 = vadd.f32 %v7669_v47, %v3003_v61 }
 0x49c   : > { %v3083_v22 = vsel %vm221_vm0, %v11329_v4, 0.0 }
 0x49d   : > { %3084 = vadd.xlane.f32.xlu1 %v3083_v22  ;;  %v3080_v56 = vsel %vm221_vm0, %v11331_v14, 0.0 }
 0x49e   : > { %3081 = vadd.xlane.f32.xlu0 %v3080_v56 }
 0x50e   : > { %v3043_v63 = vpop.xlane.xlu1 %3042 }
 0x50f   : > { %v3088_v25 = vmul.f32 0.03125, %v3043_v63  ;;  %v3040_v26 = vpop.xlane.xlu0 %3039 }
 0x510   : > { %v3087_v31 = vmul.f32 0.03125, %v3040_v26 }
 0x511   : > { %v11338_v62 = vsub.f32 %v11273_v30, %v3088_v25 }
 0x512   : > { %v11341_v20 = vsub.f32 %v11275_v28, %v3087_v31  ;;  %v3049_v60 = vpop.xlane.xlu1 %3048 }
 0x513   : > { %v3090_v58 = vmul.f32 0.03125, %v3049_v60  ;;  %v3046_v59 = vpop.xlane.xlu0 %3045  ;;  %v3120_v11 = vmul.f32 %v11338_v62, %v11338_v62 }
 0x514   : > { %v3089_v37 = vmul.f32 0.03125, %v3046_v59  ;;  %v3119_v41 = vmul.f32 %v11341_v20, %v11341_v20 }
 0x515   : > { %v11348_v36 = vsub.f32 %v11281_v12, %v3090_v58  ;;  %v3138_v53 = vsel %vm221_vm0, %v3120_v11, 0.0 }
 0x516   : > { %v11352_v10 = vsub.f32 %v11283_v40, %v3089_v37  ;;  %v3055_v47 = vpop.xlane.xlu1 %3054  ;;  %3139 = vadd.xlane.f32.xlu1 %v3138_v53  ;;  %v3135_v29 = vsel %vm221_vm0, %v3119_v41, 0.0 }
 0x517   : > { %v3092_v30 = vmul.f32 0.03125, %v3055_v47  ;;  %v3052_v3 = vpop.xlane.xlu0 %3051  ;;  %3136 = vadd.xlane.f32.xlu0 %v3135_v29  ;;  %v3122_v28 = vmul.f32 %v11348_v36, %v11348_v36 }
 0x518   : > { %v3091_v49 = vmul.f32 0.03125, %v3052_v3  ;;  %v3121_v5 = vmul.f32 %v11352_v10, %v11352_v10 }
 0x519   : > { %v11360_v15 = vsub.f32 %v11289_v13, %v3092_v30  ;;  %v3144_v12 = vsel %vm221_vm0, %v3122_v28, 0.0 }
 0x51a   : > { %v11364_v24 = vsub.f32 %v11291_v51, %v3091_v49  ;;  %v3061_v40 = vpop.xlane.xlu1 %3060  ;;  %3145 = vadd.xlane.f32.xlu1 %v3144_v12  ;;  %v3141_v23 = vsel %vm221_vm0, %v3121_v5, 0.0  ;;  %v3311_v5 = vld [vmem:[%s13071_s1 + $0x30] sm:$0xff] }
 0x51b   : > { %v3094_v16 = vmul.f32 0.03125, %v3061_v40  ;;  %v3058_v21 = vpop.xlane.xlu0 %3057  ;;  %3142 = vadd.xlane.f32.xlu0 %v3141_v23  ;;  %v3124_v34 = vmul.f32 %v11360_v15, %v11360_v15  ;;  %v3371_v40 = vand.u32 4294901760, %v3311_v5  ;;  %v3307_v23 = vld [vmem:[%s13071_s1 + $0x8] sm:$0xff] }
 0x51c   : > { %v3093_v42 = vmul.f32 0.03125, %v3058_v21  ;;  %v3123_v13 = vmul.f32 %v11364_v24, %v11364_v24  ;;  %v3369_v21 = vand.u32 4294901760, %v3307_v23 }
 0x51d   : > { %v11372_v18 = vsub.f32 %v11297_v44, %v3094_v16  ;;  %v3150_v51 = vsel %vm221_vm0, %v3124_v34, 0.0  ;;  %v3310_v16 = vld [vmem:[%s13071_s1 + $0x28] sm:$0xff] }
 0x51e   : > { %v11376_v7 = vsub.f32 %v11299_v43, %v3093_v42  ;;  %v3067_v9 = vpop.xlane.xlu1 %3066  ;;  %3151 = vadd.xlane.f32.xlu1 %v3150_v51  ;;  %v3147_v50 = vsel %vm221_vm0, %v3123_v13, 0.0  ;;  %v3373_v34 = vand.u32 4294901760, %v3310_v16  ;;  %v11449_v51 = vsub.f32 %v3307_v23, %v3369_v21 }
 0x51f   : > { %v3096_v52 = vmul.f32 0.03125, %v3067_v9  ;;  %v3064_v39 = vpop.xlane.xlu0 %3063  ;;  %3148 = vadd.xlane.f32.xlu0 %v3147_v50  ;;  %v3126_v6 = vmul.f32 %v11372_v18, %v11372_v18  ;;  %v3314_v50 = vld [vmem:[%s13071_s1 + $0x50] sm:$0xff] }
 0x520   : > { %v3095_v57 = vmul.f32 0.03125, %v3064_v39  ;;  %v3125_v44 = vmul.f32 %v11376_v7, %v11376_v7  ;;  %v11447_v13 = vpack.c.bf16 %v3373_v34, %v3369_v21  ;;  %v11451_v9 = vsub.f32 %v3310_v16, %v3373_v34 }
 0x521   : > { %v11384_v1 = vsub.f32 %v11305_v35, %v3096_v52  ;;  %v3156_v43 = vsel %vm221_vm0, %v3126_v6, 0.0  ;;  %v3317_v52 = vld [vmem:[%s13071_s1 + $0x70] sm:$0xff]  ;;  %v3375_v39 = vand.u32 4294901760, %v3314_v50 }
 0x522   : > { %v11388_v32 = vsub.f32 %v11307_v2, %v3095_v57  ;;  %v3073_v19 = vpop.xlane.xlu1 %3072  ;;  %3157 = vadd.xlane.f32.xlu1 %v3156_v43  ;;  %v3153_v27 = vsel %vm221_vm0, %v3125_v44, 0.0  ;;  %13201 = vst [vmem:[#allocation2_spill] sm:$0xff] %v11447_v13  ;;  %v3379_v6 = vand.u32 4294901760, %v3317_v52  ;;  %v3313_v57 = vld [vmem:[%s13071_s1 + $0x48] sm:$0xff] }
 0x523   : > { %v3098_v45 = vmul.f32 0.03125, %v3073_v19  ;;  %v3070_v33 = vpop.xlane.xlu0 %3069  ;;  %3154 = vadd.xlane.f32.xlu0 %v3153_v27  ;;  %v3128_v0 = vmul.f32 %v11384_v1, %v11384_v1  ;;  %v3316_v44 = vld [vmem:[%s13071_s1 + $0x68] sm:$0xff]  ;;  %v3377_v43 = vand.u32 4294901760, %v3313_v57 }
 0x524   : > { %v3097_v46 = vmul.f32 0.03125, %v3070_v33  ;;  %v3127_v35 = vmul.f32 %v11388_v32, %v11388_v32  ;;  %v3381_v19 = vand.u32 4294901760, %v3316_v44  ;;  %v11467_v27 = vpack.c.bf16 %v3379_v6, %v3375_v39  ;;  %v3312_v33 = vld [vmem:[%s13071_s1 + $0x38] sm:$0xff] }
 0x525   : > { %v11396_v8 = vsub.f32 %v11313_v54, %v3098_v45  ;;  %v3162_v2 = vsel %vm221_vm0, %v3128_v0, 0.0  ;;  %v3309_v45 = vld [vmem:[%s13071_s1 + $0x18] sm:$0xff] }
 0x526   : > { %v11400_v55 = vsub.f32 %v11315_v38, %v3097_v46  ;;  %v3079_v61 = vpop.xlane.xlu1 %3078  ;;  %3163 = vadd.xlane.f32.xlu1 %v3162_v2  ;;  %v3159_v22 = vsel %vm221_vm0, %v3127_v35, 0.0  ;;  %13202 = vst [vmem:[#allocation3_spill] sm:$0xff] %v11467_v27  ;;  %v11475_v0 = vpack.c.bf16 %v3381_v19, %v3377_v43  ;;  %v4646_v46 = vand.u32 4294901760, %v3309_v45 }
 0x527   : > { %v3100_v56 = vmul.f32 0.03125, %v3079_v61  ;;  %v3076_v63 = vpop.xlane.xlu0 %3075  ;;  %3160 = vadd.xlane.f32.xlu0 %v3159_v22  ;;  %v3130_v25 = vmul.f32 %v11396_v8, %v11396_v8  ;;  %v4649_v35 = vand.u32 4294901760, %v3312_v33  ;;  %v3315_v61 = vld [vmem:[%s13071_s1 + $0x58] sm:$0xff] }
 0x528   : > { %v3099_v26 = vmul.f32 0.03125, %v3076_v63  ;;  %v3129_v54 = vmul.f32 %v11400_v55, %v11400_v55  ;;  %13203 = vst [vmem:[#allocation4_spill] sm:$0xff] %v11475_v0  ;;  %v3318_v22 = vld [vmem:[%s13071_s1 + $0x78] sm:$0xff]  ;;  %v11524_v16 = vsub.f32 %v3309_v45, %v4646_v46 }
 0x529   : > { %v11408_v31 = vsub.f32 %v11321_v17, %v3100_v56  ;;  %v3168_v38 = vsel %vm221_vm0, %v3130_v25, 0.0  ;;  %v11479_v2 = vpack.c.bf16 %v4649_v35, %v4646_v46  ;;  %v4652_v56 = vand.u32 4294901760, %v3315_v61 }
 0x52a   : > { %v11412_v60 = vsub.f32 %v11323_v48, %v3099_v26  ;;  %3169 = vadd.xlane.f32.xlu1 %v3168_v38  ;;  %v3085_v58 = vpop.xlane.xlu1 %3084  ;;  %v3165_v59 = vsel %vm221_vm0, %v3129_v54, 0.0  ;;  %v4655_v63 = vand.u32 4294901760, %v3318_v22  ;;  %v11489_v25 = vsub.f32 %v3314_v50, %v3375_v39 }
 0x52b   : > { %v3102_v11 = vmul.f32 0.03125, %v3085_v58  ;;  %3166 = vadd.xlane.f32.xlu0 %v3165_v59  ;;  %v3082_v37 = vpop.xlane.xlu0 %3081  ;;  %v3132_v41 = vmul.f32 %v11408_v31, %v11408_v31  ;;  %9406 = vmatprep.subr.bf16.mxu1 %v11479_v2  ;;  %v11491_v26 = vsub.f32 %v3317_v52, %v3379_v6  ;;  %v11493_v54 = vsub.f32 %v3313_v57, %v3377_v43 }
 0x52c   : > { %v3101_v53 = vmul.f32 0.03125, %v3082_v37  ;;  %v3131_v17 = vmul.f32 %v11412_v60, %v11412_v60  ;;  %9408 = vmatpush3.bf16.msra.mxu1 %v11479_v2  ;;  %v11495_v38 = vsub.f32 %v3316_v44, %v3381_v19  ;;  %v13105_v58 = vmov 0.0  }
 0x52d   : > { %v11420_v47 = vsub.f32 %v11329_v4, %v3102_v11  ;;  %v3174_v48 = vsel %vm221_vm0, %v3132_v41, 0.0  ;;  %3439 = vmatprep.mubr.f32.mxu0 %v13105_v58  ;;  %v11498_v59 = vpack.c.bf16 %v4655_v63, %v4652_v56  ;;  %v11504_v37 = vsub.f32 %v3311_v5, %v3371_v40 }
 0x52e   : > { %v11424_v29 = vsub.f32 %v11331_v14, %v3101_v53  ;;  %3175 = vadd.xlane.f32.xlu1 %v3174_v48  ;;  %v3171_v30 = vsel %vm221_vm0, %v3131_v17, 0.0  ;;  %v3308_v14 = vld [vmem:[%s13071_s1 + $0x10] sm:$0xff]  ;;  %v13098_v17 = vand.u32 4294901760, %v11449_v51  ;;  %v13097_v48 = vand.u32 4294901760, %v11451_v9 }
 0x52f   : > { %3172 = vadd.xlane.f32.xlu0 %v3171_v30  ;;  %v3134_v3 = vmul.f32 %v11420_v47, %v11420_v47  ;;  %v3367_v12 = vand.u32 4294901760, %v3308_v14  ;;  %9407 = vmatprep.subr.bf16.mxu1 %v11498_v59  ;;  %13205 = vst [vmem:[#allocation6_spill] sm:$0xff] %v11504_v37  ;;  %v13099_v53 = vand.u32 4294901760, %v11504_v37  ;;  %v11526_v21 = vsub.f32 %v3312_v33, %v4649_v35 }
 0x530   : > { %v3133_v28 = vmul.f32 %v11424_v29, %v11424_v29  ;;  %9409 = vmatpush3.bf16.msra.mxu1 %v11498_v59  ;;  %v13104_v34 = vand.u32 4294901760, %v11524_v16  ;;  %v11536_v6 = vsub.f32 %v3315_v61, %v4652_v56  ;;  %v11538_v57 = vsub.f32 %v3318_v22, %v4655_v63 }
 0x531   : > { %v3180_v49 = vsel %vm221_vm0, %v3134_v3, 0.0  ;;  %v11445_v42 = vpack.c.bf16 %v3371_v40, %v3367_v12  ;;  %v11502_v11 = vsub.f32 %v3308_v14, %v3367_v12  ;;  %v3631_v3 = vsub.f32 %v11504_v37, %v13099_v53 }
 0x532   : > { %3181 = vadd.xlane.f32.xlu1 %v3180_v49  ;;  %v3177_v4 = vsel %vm221_vm0, %v3133_v28, 0.0  ;;  %v3625_v28 = vsub.f32 %v11449_v51, %v13098_v17  ;;  %v3637_v49 = vsub.f32 %v11451_v9, %v13097_v48  ;;  %v13103_v50 = vand.u32 4294901760, %v11526_v21 }
 0x533   : > { %3178 = vadd.xlane.f32.xlu0 %v3177_v4  ;;  %9215 = vmatprep.subr.bf16.mxu0 %v11445_v42  ;;  %13204 = vst [vmem:[#allocation5_spill] sm:$0xff] %v11502_v11  ;;  %v13100_v41 = vand.u32 4294901760, %v11502_v11  ;;  %v3632_v14 = vand.u32 4294901760, %v3631_v3  ;;  %v4878_v52 = vsub.f32 %v11524_v16, %v13104_v34  ;;  %v13102_v19 = vand.u32 4294901760, %v11536_v6 }
 0x534   : > { %9217 = vmatpush1.bf16.msra.mxu0 %v11447_v13  ;;  %v3626_v5 = vand.u32 4294901760, %v3625_v28  ;;  %v3638_v12 = vand.u32 4294901760, %v3637_v49  ;;  %v4885_v39 = vsub.f32 %v11526_v21, %v13103_v50  ;;  %v13101_v45 = vand.u32 4294901760, %v11538_v57 }
 0x535   : > { %9219 = vmatprep.subr.bf16.mxu0 %v11467_v27  ;;  %v3619_v30 = vsub.f32 %v11502_v11, %v13100_v41  ;;  %v4879_v44 = vand.u32 4294901760, %v4878_v52  ;;  %v4892_v46 = vsub.f32 %v11536_v6, %v13102_v19  ;;  %v13096_v63 = vand.u32 4294901760, %v11489_v25 }
 0x536   : > { %v11522_v23 = vpack.c.bf16 %v3638_v12, %v3626_v5  ;;  %v4886_v43 = vand.u32 4294901760, %v4885_v39  ;;  %v4899_v35 = vsub.f32 %v11538_v57, %v13101_v45  ;;  %v13094_v3 = vand.u32 4294901760, %v11493_v54 }
 0x537   : > { %v3620_v4 = vand.u32 4294901760, %v3619_v30  ;;  %v4893_v61 = vand.u32 4294901760, %v4892_v46  ;;  %v13095_v30 = vand.u32 4294901760, %v11491_v26  ;;  %v13093_v28 = vand.u32 4294901760, %v11495_v38 }
 0x538   : > { %9221 = vmatpush1.bf16.msra.mxu0 %v11475_v0  ;;  %v11542_v33 = vpack.c.bf16 %v4886_v43, %v4879_v44  ;;  %v4900_v22 = vand.u32 4294901760, %v4899_v35  ;;  %v3643_v49 = vsub.f32 %v11489_v25, %v13096_v63  ;;  %v11575_v46 = vpack.c.bf16 %v11526_v21, %v11524_v16 }
 0x539   : > { %v9222_v40 = vpack.c.bf16 %v3632_v14, %v3620_v4  ;;  %v3655_v4 = vsub.f32 %v11491_v26, %v13095_v30  ;;  %v3649_v14 = vsub.f32 %v11493_v54, %v13094_v3  ;;  %v3661_v5 = vsub.f32 %v11495_v38, %v13093_v28 }
 0x53a   : > { %9271 = vmatprep.subr.bf16.mxu1 %v11542_v33  ;;  %v11551_v56 = vpack.c.bf16 %v4900_v22, %v4893_v61  ;;  %v3644_v12 = vand.u32 4294901760, %v3643_v49  ;;  %v11579_v35 = vpack.c.bf16 %v11538_v57, %v11536_v6 }
 0x53b   : > { %9223 = vmatprep.subr.bf16.mxu0 %v9222_v40  ;;  %v3656_v40 = vand.u32 4294901760, %v3655_v4  ;;  %v3650_v52 = vand.u32 4294901760, %v3649_v14  ;;  %v3662_v39 = vand.u32 4294901760, %v3661_v5 }
 0x53d   : > { %v11569_v44 = vpack.c.bf16 %v3656_v40, %v3644_v12  ;;  %v11571_v43 = vpack.c.bf16 %v3662_v39, %v3650_v52 }
 0x5a3   : > { %v3140_v49 = vpop.xlane.xlu1 %3139 }
 0x5a4   : > { %v3184_v4 = vmul.f32 0.03125, %v3140_v49  ;;  %v3137_v14 = vpop.xlane.xlu0 %3136 }
 0x5a5   : > { %v3183_v5 = vmul.f32 0.03125, %v3137_v14 }
 0x5a6   : > { %v3200_v12 = vadd.f32 1e-05, %v3184_v4 }
 0x5a7   : > { %v3199_v40 = vadd.f32 1e-05, %v3183_v5  ;;  %v3146_v52 = vpop.xlane.xlu1 %3145 }
 0x5a8   : > { %9995 = vrsqrt.f32 %v3200_v12  ;;  %v3186_v39 = vmul.f32 0.03125, %v3146_v52  ;;  %v3143_v28 = vpop.xlane.xlu0 %3142 }
 0x5a9   : > { %9997 = vrsqrt.f32 %v3199_v40  ;;  %v3185_v3 = vmul.f32 0.03125, %v3143_v28 }
 0x5aa   : > { %v3202_v30 = vadd.f32 1e-05, %v3186_v39 }
 0x5ab   : > { %v3201_v63 = vadd.f32 1e-05, %v3185_v3  ;;  %v3152_v48 = vpop.xlane.xlu1 %3151 }
 0x5ac   : > { %9999 = vrsqrt.f32 %v3202_v30  ;;  %v3188_v17 = vmul.f32 0.03125, %v3152_v48  ;;  %v3149_v53 = vpop.xlane.xlu0 %3148  ;;  %v11592_v48 = vld [vmem:[%s13073_s3 + $0x4] ss:$0 sm:$0xff] }
 0x5ad   : > { %10001 = vrsqrt.f32 %v3201_v63  ;;  %v3187_v41 = vmul.f32 0.03125, %v3149_v53 }
 0x5ae   : > { %v3204_v45 = vadd.f32 1e-05, %v3188_v17 }
 0x5af   : > { %v3203_v14 = vadd.f32 1e-05, %v3187_v41  ;;  %v3158_v5 = vpop.xlane.xlu1 %3157  ;;  %v11598_v41 = vld [vmem:[%s13073_s3 + $0x5] ss:$0 sm:$0xff] }
 0x5b0   : > { %10003 = vrsqrt.f32 %v3204_v45  ;;  %v3190_v12 = vmul.f32 0.03125, %v3158_v5  ;;  %v3155_v28 = vpop.xlane.xlu0 %3154 }
 0x5b1   : > { %10005 = vrsqrt.f32 %v3203_v14  ;;  %v3189_v3 = vmul.f32 0.03125, %v3155_v28 }
 0x5b2   : > { %v9996_v40 = vpop.eup %9995  ;;  %v3206_v53 = vadd.f32 1e-05, %v3190_v12 }
 0x5b3   : > { %v9998_v17 = vpop.eup %9997  ;;  %v3232_v63 = vmul.f32 %v9996_v40, %v11338_v62  ;;  %v3205_v30 = vadd.f32 1e-05, %v3189_v3  ;;  %v3164_v52 = vpop.xlane.xlu1 %3163 }
 0x5b4   : > { %v3231_v45 = vmul.f32 %v9998_v17, %v11341_v20  ;;  %10007 = vrsqrt.f32 %v3206_v53  ;;  %v3192_v39 = vmul.f32 0.03125, %v3164_v52  ;;  %v3161_v14 = vpop.xlane.xlu0 %3160 }
 0x5b5   : > { %v3254_v5 = vmul.f32 %v11592_v48, %v3232_v63  ;;  %10009 = vrsqrt.f32 %v3205_v30  ;;  %v3191_v28 = vmul.f32 0.03125, %v3161_v14 }
 0x5b6   : > { %v10000_v12 = vpop.eup %9999  ;;  %v3253_v62 = vmul.f32 %v11592_v48, %v3231_v45  ;;  %v3208_v3 = vadd.f32 1e-05, %v3192_v39  ;;  %v10155_v39 = vld [vmem:[%s10250_s29 + $0x8] sm:$0xff] }
 0x5b7   : > { %v10002_v40 = vpop.eup %10001  ;;  %v3276_v19 = vadd.f32 %v11598_v41, %v3254_v5  ;;  %v3234_v50 = vmul.f32 %v10000_v12, %v11348_v36  ;;  %v3207_v34 = vadd.f32 1e-05, %v3191_v28  ;;  %v3170_v20 = vpop.xlane.xlu1 %3169  ;;  %v10156_v5 = vld [vmem:[%s10250_s29] sm:$0xff] }
 0x5b8   : > { %v3275_v53 = vadd.f32 %v11598_v41, %v3253_v62  ;;  %v3233_v17 = vmul.f32 %v10002_v40, %v11352_v10  ;;  %10011 = vrsqrt.f32 %v3208_v3  ;;  %v3194_v63 = vmul.f32 0.03125, %v3170_v20  ;;  %v3167_v30 = vpop.xlane.xlu0 %3166 }
 0x5b9   : > { %v3256_v52 = vmul.f32 %v11592_v48, %v3234_v50  ;;  %10013 = vrsqrt.f32 %v3207_v34  ;;  %v3193_v45 = vmul.f32 0.03125, %v3167_v30  ;;  %v11609_v14 = vadd.f32 %v10155_v39, %v3276_v19  ;;  %v10157_v30 = vld [vmem:[%s10250_s29 + $0x18] sm:$0xff] }
 0x5ba   : > { %v10004_v4 = vpop.eup %10003  ;;  %v11612_v36 = vadd.f32 %v10156_v5, %v3275_v53  ;;  %v3255_v28 = vmul.f32 %v11592_v48, %v3233_v17  ;;  %v3210_v12 = vadd.f32 1e-05, %v3194_v63 }
 0x5bb   : > { %13206 = vst [vmem:[#allocation7_spill] sm:$0xff] %v11609_v14  ;;  %v10006_v62 = vpop.eup %10005  ;;  %v3278_v10 = vadd.f32 %v11598_v41, %v3256_v52  ;;  %v3236_v3 = vmul.f32 %v10004_v4, %v11360_v15  ;;  %v3209_v40 = vadd.f32 1e-05, %v3193_v45  ;;  %v3176_v50 = vpop.xlane.xlu1 %3175  ;;  %v3323_v34 = vsel %vm221_vm0, %v11609_v14, 0 }
 0x5bc   : > { %13207 = vst [vmem:[#allocation8_spill] sm:$0xff] %v11612_v36  ;;  %v3320_v19 = vsel %vm221_vm0, %v11612_v36, 0  ;;  %v3277_v20 = vadd.f32 %v11598_v41, %v3255_v28  ;;  %v3235_v53 = vmul.f32 %v10006_v62, %v11364_v24  ;;  %10015 = vrsqrt.f32 %v3210_v12  ;;  %v3173_v17 = vpop.xlane.xlu0 %3172 }
 0x5bd   : > { %v11623_v63 = vand.u32 4294901760, %v3320_v19  ;;  %v11626_v52 = vadd.f32 %v10157_v30, %v3278_v10  ;;  %v3258_v15 = vmul.f32 %v11592_v48, %v3236_v3  ;;  %10017 = vrsqrt.f32 %v3209_v40 }
 0x5be   : > { %v10008_v4 = vpop.eup %10007  ;;  %v3257_v45 = vmul.f32 %v11592_v48, %v3235_v53  ;;  %v3196_v39 = vmul.f32 0.03125, %v3176_v50  ;;  %v3195_v5 = vmul.f32 0.03125, %v3173_v17  ;;  %v11630_v49 = vand.u32 4294901760, %v3323_v34 }
 0x5bf   : > { %13208 = vst [vmem:[#allocation9_spill] sm:$0xff] %v11626_v52  ;;  %v10010_v28 = vpop.eup %10009  ;;  %v3329_v24 = vsel %vm221_vm0, %v11626_v52, 0  ;;  %v3280_v12 = vadd.f32 %v11598_v41, %v3258_v15  ;;  %v3238_v62 = vmul.f32 %v10008_v4, %v11372_v18  ;;  %v3182_v10 = vpop.xlane.xlu1 %3181  ;;  %v11637_v30 = vsub.f32 %v3320_v19, %v11623_v63 }
 0x5c0   : > { %v11639_v3 = vand.u32 4294901760, %v3329_v24  ;;  %v3279_v40 = vadd.f32 %v11598_v41, %v3257_v45  ;;  %v3237_v50 = vmul.f32 %v10010_v28, %v11376_v7  ;;  %v3212_v53 = vadd.f32 1e-05, %v3196_v39  ;;  %v3179_v17 = vpop.xlane.xlu0 %3178 }
 0x5c1   : > { %v3260_v22 = vmul.f32 %v11592_v48, %v3238_v62  ;;  %v3211_v61 = vadd.f32 1e-05, %v3195_v5  ;;  %v3198_v58 = vmul.f32 0.03125, %v3182_v10  ;;  %v3197_v52 = vmul.f32 0.03125, %v3179_v17  ;;  %v10158_v17 = vld [vmem:[%s10250_s29 + $0x10] sm:$0xff] }
 0x5c2   : > { %v10012_v15 = vpop.eup %10011  ;;  %v3259_v18 = vmul.f32 %v11592_v48, %v3237_v50  ;;  %10019 = vrsqrt.f32 %v3212_v53  ;;  %v11646_v19 = vand.u32 4294901760, %v11637_v30  ;;  %v11649_v4 = vsub.f32 %v3323_v34, %v11630_v49 }
 0x5c3   : > { %v10014_v45 = vpop.eup %10013  ;;  %v3282_v7 = vadd.f32 %v11598_v41, %v3260_v22  ;;  %v3240_v39 = vmul.f32 %v10012_v15, %v11384_v1  ;;  %10021 = vrsqrt.f32 %v3211_v61  ;;  %v3214_v5 = vadd.f32 1e-05, %v3198_v58 }
 0x5c4   : > { %v3281_v28 = vadd.f32 %v11598_v41, %v3259_v18  ;;  %v3239_v62 = vmul.f32 %v10014_v45, %v11388_v32  ;;  %v3213_v10 = vadd.f32 1e-05, %v3197_v52  ;;  %v3443_v50 = vsub.f32 %v11637_v30, %v11646_v19 }
 0x5c5   : > { %v3262_v53 = vmul.f32 %v11592_v48, %v3240_v39  ;;  %10023 = vrsqrt.f32 %v3214_v5  ;;  %v11659_v34 = vand.u32 4294901760, %v11649_v4  ;;  %v11662_v22 = vadd.f32 %v10158_v17, %v3277_v20 }
 0x5c6   : > { %v10016_v1 = vpop.eup %10015  ;;  %v3261_v58 = vmul.f32 %v11592_v48, %v3239_v62  ;;  %10025 = vrsqrt.f32 %v3213_v10  ;;  %v11665_v61 = vand.u32 4294901760, %v3443_v50  ;;  %v11668_v32 = vsub.f32 %v3329_v24, %v11639_v3 }
 0x5c7   : > { %13209 = vst [vmem:[#allocation10_spill] sm:$0xff] %v11659_v34  ;;  %13210 = vst [vmem:[#allocation11_spill] sm:$0xff] %v11662_v22  ;;  %v10018_v52 = vpop.eup %10017  ;;  %v11671_v15 = vadd.f32 %v11598_v41, %v3262_v53  ;;  %v3242_v18 = vmul.f32 %v10016_v1, %v11396_v8  ;;  %v3454_v20 = vsub.f32 %v11649_v4, %v11659_v34  ;;  %v3326_v45 = vsel %vm221_vm0, %v11662_v22, 0  ;;  %v10159_v53 = vld [vmem:[%s10250_s29 + $0x20] sm:$0xff] }
 0x5c8   : > { %13211 = vst [vmem:[#allocation12_spill] sm:$0xff] %v11665_v61  ;;  %v3283_v39 = vadd.f32 %v11598_v41, %v3261_v58  ;;  %v3241_v5 = vmul.f32 %v10018_v52, %v11400_v55  ;;  %3445 = vmatmul.mubr.f32.vlgmr.msra.gmra.mrb[16].mxu0 %v11665_v61  ;;  %v11681_v24 = vand.u32 4294901760, %v3326_v45  ;;  %v11684_v62 = vand.u32 4294901760, %v11668_v32  ;;  %v10160_v55 = vld [vmem:[%s10250_s29 + $0x28] sm:$0xff] }
 0x5c9   : > { %v3264_v8 = vmul.f32 %v11592_v48, %v3242_v18  ;;  %9225 = vmatpush1.bf16.msra.mxu0 %v11522_v23  ;;  %v13213_v10 = vmov 0.0   ;;  %v11689_v50 = vand.u32 4294901760, %v3454_v20  ;;  %v11692_v17 = vadd.f32 %v10159_v53, %v3279_v40  ;;  %v10161_v23 = vld [vmem:[%s10250_s29 + $0x30] sm:$0xff] }
 0x5ca   : > { %13212 = vst [vmem:[#allocation13_spill] sm:$0xff] %v11684_v62  ;;  %3450 = vmatprep.mubr.f32.mxu0 %v13213_v10  ;;  %v11695_v1 = vadd.f32 %v10160_v55, %v3280_v12  ;;  %v3263_v58 = vmul.f32 %v11592_v48, %v3241_v5  ;;  %v11699_v52 = vsub.f32 %v3326_v45, %v11681_v24  ;;  %v10162_v5 = vld [vmem:[%s10250_s29 + $0x38] sm:$0xff] }
 0x5cb   : > { %13214 = vst [vmem:[#allocation14_spill] sm:$0xff] %v11689_v50  ;;  %13215 = vst [vmem:[#allocation15_spill] sm:$0xff] %v11692_v17  ;;  %v3476_v18 = vsub.f32 %v11668_v32, %v11684_v62  ;;  %v11704_v22 = vadd.f32 %v10161_v23, %v3281_v28  ;;  %9227 = vmatprep.subr.bf16.mxu0 %v11569_v44  ;;  %v11708_v20 = vadd.f32 %v11598_v41, %v3264_v8 }
 0x5cc   : > { %13216 = vst [vmem:[#allocation16_spill] sm:$0xff] %v11695_v1  ;;  %v3332_v12 = vsel %vm221_vm0, %v11692_v17, 0  ;;  %v3335_v40 = vsel %vm221_vm0, %v11695_v1, 0  ;;  %v11715_v45 = vadd.f32 %v10162_v5, %v3282_v7  ;;  %v10020_v53 = vpop.eup %10019  ;;  %v3285_v55 = vadd.f32 %v11598_v41, %v3263_v58  ;;  %3456 = vmatmul.mubr.f32.gmra.mrb[18].mxu0 %v11689_v50 }
 0x5cd   : > { %13217 = vst [vmem:[#allocation17_spill] sm:$0xff] %v11704_v22  ;;  %v11720_v28 = vand.u32 4294901760, %v11699_v52  ;;  %v3477_v44 = vand.u32 4294901760, %v3476_v18  ;;  %v11722_v8 = vand.u32 4294901760, %v3332_v12  ;;  %v10022_v23 = vpop.eup %10021  ;;  %v3244_v17 = vmul.f32 %v10020_v53, %v11408_v31  ;;  %3461 = vmatprep.mubr.f32.mxu0 %v13213_v10  ;;  %9229 = vmatpush1.bf16.msra.mxu0 %v11571_v43 }
 0x5ce   : > { %13218 = vst [vmem:[#allocation18_spill] sm:$0xff] %v11715_v45  ;;  %v11726_v1 = vand.u32 4294901760, %v3335_v40  ;;  %v3338_v7 = vsel %vm221_vm0, %v11704_v22, 0  ;;  %v3341_v58 = vsel %vm221_vm0, %v11715_v45, 0  ;;  %v3243_v18 = vmul.f32 %v10022_v23, %v11412_v60  ;;  %v10163_v60 = vld [vmem:[%s10250_s29 + $0x40] sm:$0xff] }
 0x5cf   : > { %13219 = vst [vmem:[#allocation19_spill] sm:$0xff] %v11720_v28  ;;  %v3465_v5 = vsub.f32 %v11699_v52, %v11720_v28  ;;  %v11737_v36 = vsub.f32 %v3332_v12, %v11722_v8  ;;  %v11739_v31 = vand.u32 4294901760, %v3338_v7  ;;  %v13220_v53 = vpack.c.bf16 %v11504_v37, %v11502_v11  ;;  %v10024_v22 = vpop.eup %10023 }
 0x5d0   : > { %v3266_v14 = vmul.f32 %v11592_v48, %v3244_v17  ;;  %v11746_v45 = vsub.f32 %v3335_v40, %v11726_v1  ;;  %v11748_v43 = vand.u32 4294901760, %v3341_v58  ;;  %v11751_v23 = vadd.f32 %v10163_v60, %v3283_v39  ;;  %v10026_v50 = vpop.eup %10025 }
 0x5d1   : > { %9231 = vmatprep.subr.bf16.mxu0 %v13220_v53  ;;  %v3265_v12 = vmul.f32 %v11592_v48, %v3243_v18  ;;  %v3246_v61 = vmul.f32 %v10024_v22, %v11420_v47  ;;  %v3466_v0 = vand.u32 4294901760, %v3465_v5  ;;  %v11756_v37 = vand.u32 4294901760, %v11737_v36 }
 0x5d2   : > { %13221 = vst [vmem:[#allocation20_spill] sm:$0xff] %v11751_v23  ;;  %v3288_v53 = vadd.f32 %v11598_v41, %v3266_v14  ;;  %v3245_v17 = vmul.f32 %v10026_v50, %v11424_v29  ;;  %v11761_v40 = vand.u32 4294901760, %v11746_v45  ;;  %v11764_v11 = vsub.f32 %v3338_v7, %v11739_v31 }
 0x5d3   : > { %13222 = vst [vmem:[#allocation21_spill] sm:$0xff] %v11756_v37  ;;  %v3287_v39 = vadd.f32 %v11598_v41, %v3265_v12  ;;  %v3268_v18 = vmul.f32 %v11592_v48, %v3246_v61  ;;  %8649 = vmatprep.mubr.f32.mxu1 %v3466_v0  ;;  %3467 = vmatmul.mubr.f32.gmra.mrb[20].mxu0 %v3466_v0  ;;  %v3344_v14 = vsel %vm221_vm0, %v11751_v23, 0 }
 0x5d4   : > { %13223 = vst [vmem:[#allocation22_spill] sm:$0xff] %v11761_v40  ;;  %v3487_v47 = vsub.f32 %v11737_v36, %v11756_v37  ;;  %v3267_v29 = vmul.f32 %v11592_v48, %v3245_v17  ;;  %8650 = vmatmul.mubr.f32.vlgmr.msra.gmra.mrb[16].mxu1 %v3477_v44  ;;  %v3498_v22 = vsub.f32 %v11746_v45, %v11761_v40  ;;  %v11777_v50 = vand.u32 4294901760, %v11764_v11  ;;  %v10164_v48 = vld [vmem:[%s10250_s29 + $0x48] sm:$0xff] }
 0x5d5   : > { %3472 = vmatprep.mubr.f32.mxu0 %v13213_v10  ;;  %v11780_v61 = vsub.f32 %v3341_v58, %v11748_v43  ;;  %v3290_v0 = vadd.f32 %v11598_v41, %v3268_v18  ;;  %v11783_v5 = vand.u32 4294901760, %v3344_v14  ;;  %v11787_v60 = vadd.f32 %v10164_v48, %v11671_v15  ;;  %9273 = vmatpush3.bf16.msra.mxu1 %v11542_v33 }
 0x5d6   : > { %13224 = vst [vmem:[#allocation23_spill] sm:$0xff] %v11777_v50  ;;  %v3488_v7 = vand.u32 4294901760, %v3487_v47  ;;  %v3289_v12 = vadd.f32 %v11598_v41, %v3267_v29  ;;  %v3499_v17 = vand.u32 4294901760, %v3498_v22  ;;  %v3509_v58 = vsub.f32 %v11764_v11, %v11777_v50  ;;  %9275 = vmatprep.subr.bf16.mxu1 %v11551_v56  ;;  %v10165_v41 = vld [vmem:[%s10250_s29 + $0x50] sm:$0xff]  ;;  %v10166_v47 = vld [vmem:[%s10250_s29 + $0x58] sm:$0xff] }
 0x5d7   : > { %13225 = vst [vmem:[#allocation24_spill] sm:$0xff] %v11787_v60  ;;  %v11794_v23 = vand.u32 4294901760, %v11780_v61  ;;  %3478 = vmatmul.mubr.f32.gmra.mrb[22].mxu0 %v3477_v44  ;;  %v11798_v18 = vsub.f32 %v3344_v14, %v11783_v5  ;;  %v3347_v33 = vsel %vm221_vm0, %v11787_v60, 0  ;;  %v11803_v15 = vadd.f32 %v10165_v41, %v3285_v55  ;;  %v10167_v14 = vld [vmem:[%s10250_s29 + $0x60] sm:$0xff] }
 0x5d8   : > { %8652 = vmatprep.mubr.f32.mxu1 %v3488_v7  ;;  %v11807_v29 = vadd.f32 %v10166_v47, %v11708_v20  ;;  %v3510_v22 = vand.u32 4294901760, %v3509_v58  ;;  %3483 = vmatprep.mubr.f32.mxu0 %v13213_v10  ;;  %v11812_v44 = vand.u32 4294901760, %v3347_v33  ;;  %v11815_v27 = vadd.f32 %v10167_v14, %v3287_v39  ;;  %v10168_v58 = vld [vmem:[%s10250_s29 + $0x68] sm:$0xff] }
 0x5d9   : > { %13226 = vst [vmem:[#allocation25_spill] sm:$0xff] %v11794_v23  ;;  %13227 = vst [vmem:[#allocation26_spill] sm:$0xff] %v11803_v15  ;;  %8653 = vmatmul.mubr.f32.gmra.mrb[18].mxu1 %v3499_v17  ;;  %v3520_v48 = vsub.f32 %v11780_v61, %v11794_v23  ;;  %v11818_v60 = vand.u32 4294901760, %v11798_v18  ;;  %v3350_v20 = vsel %vm221_vm0, %v11803_v15, 0  ;;  %v11825_v41 = vadd.f32 %v10168_v58, %v3288_v53 }
 0x5da   : > { %13228 = vst [vmem:[#allocation27_spill] sm:$0xff] %v11807_v29  ;;  %13229 = vst [vmem:[#allocation28_spill] sm:$0xff] %v11815_v27  ;;  %v3353_v55 = vsel %vm221_vm0, %v11807_v29, 0  ;;  %9277 = vmatpush3.bf16.msra.mxu1 %v11551_v56  ;;  %8655 = vmatprep.mubr.f32.mxu1 %v3510_v22  ;;  %v11829_v39 = vsub.f32 %v3347_v33, %v11812_v44  ;;  %v11831_v14 = vand.u32 4294901760, %v3350_v20  ;;  %v3356_v53 = vsel %vm221_vm0, %v11815_v27, 0 }
 0x5db   : > { %13230 = vst [vmem:[#allocation29_spill] sm:$0xff] %v11818_v60  ;;  %13231 = vst [vmem:[#allocation30_spill] sm:$0xff] %v11825_v41  ;;  %v3521_v47 = vand.u32 4294901760, %v3520_v48  ;;  %v11833_v13 = vand.u32 4294901760, %v3353_v55  ;;  %9279 = vmatprep.subr.bf16.mxu1 %v11575_v46  ;;  %3489 = vmatmul.mubr.f32.gmra.mrb[24].mxu0 %v3488_v7  ;;  %v3531_v15 = vsub.f32 %v11798_v18, %v11818_v60  ;;  %v3359_v56 = vsel %vm221_vm0, %v11825_v41, 0  ;;  %v10169_v48 = vld [vmem:[%s10250_s29 + $0x70] sm:$0xff] }
 0x5dc   : > { %v11843_v33 = vadd.f32 %v10169_v48, %v3289_v12  ;;  %v11846_v58 = vand.u32 4294901760, %v11829_v39  ;;  %3494 = vmatprep.mubr.f32.mxu0 %v13213_v10  ;;  %v11850_v7 = vsub.f32 %v3350_v20, %v11831_v14  ;;  %v11855_v60 = vand.u32 4294901760, %v3356_v53  ;;  %v10170_v48 = vld [vmem:[%s10250_s29 + $0x78] sm:$0xff] }
 0x5dd   : > { %8656 = vmatmul.mubr.f32.gmra.mrb[20].mxu1 %v3521_v47  ;;  %v11853_v29 = vsub.f32 %v3353_v55, %v11833_v13  ;;  %v3532_v27 = vand.u32 4294901760, %v3531_v15  ;;  %v11857_v23 = vand.u32 4294901760, %v3359_v56  ;;  %v11862_v41 = vadd.f32 %v10170_v48, %v3290_v0 }
 0x5de   : > { %13232 = vst [vmem:[#allocation31_spill] sm:$0xff] %v11843_v33  ;;  %13233 = vst [vmem:[#allocation32_spill] sm:$0xff] %v11846_v58  ;;  %v3362_v12 = vsel %vm221_vm0, %v11843_v33, 0  ;;  %v3542_v50 = vsub.f32 %v11829_v39, %v11846_v58  ;;  %v11867_v20 = vand.u32 4294901760, %v11850_v7  ;;  %v11873_v40 = vsub.f32 %v3356_v53, %v11855_v60 }
 0x5df   : > { %13234 = vst [vmem:[#allocation33_spill] sm:$0xff] %v11862_v41  ;;  %v11870_v55 = vand.u32 4294901760, %v11853_v29  ;;  %8658 = vmatprep.mubr.f32.mxu1 %v3532_v27  ;;  %3500 = vmatmul.mubr.f32.gmra.mrb[26].mxu0 %v3499_v17  ;;  %v11876_v15 = vsub.f32 %v3359_v56, %v11857_v23  ;;  %v11878_v33 = vand.u32 4294901760, %v3362_v12  ;;  %v3365_v0 = vsel %vm221_vm0, %v11862_v41, 0 }
 0x5e0   : > { %13235 = vst [vmem:[#allocation34_spill] sm:$0xff] %v11867_v20  ;;  %v3543_v48 = vand.u32 4294901760, %v3542_v50  ;;  %v3553_v58 = vsub.f32 %v11850_v7, %v11867_v20  ;;  %3505 = vmatprep.mubr.f32.mxu0 %v13213_v10  ;;  %v11888_v53 = vand.u32 4294901760, %v11873_v40  ;;  %v11896_v62 = vand.u32 4294901760, %v3365_v0 }
 0x5e1   : > { %13236 = vst [vmem:[#allocation35_spill] sm:$0xff] %v11870_v55  ;;  %v3564_v37 = vsub.f32 %v11853_v29, %v11870_v55  ;;  %v11891_v17 = vand.u32 4294901760, %v11876_v15  ;;  %v11894_v56 = vsub.f32 %v3362_v12, %v11878_v33 }
 0x5e2   : > { %13237 = vst [vmem:[#allocation36_spill] sm:$0xff] %v11888_v53  ;;  %8659 = vmatmul.mubr.f32.gmra.mrb[22].mxu1 %v3543_v48  ;;  %v3554_v50 = vand.u32 4294901760, %v3553_v58  ;;  %v3575_v41 = vsub.f32 %v11873_v40, %v11888_v53  ;;  %v11904_v20 = vsub.f32 %v3365_v0, %v11896_v62 }
 0x5e3   : > { %3511 = vmatmul.mubr.f32.gmra.mrb[28].mxu0 %v3510_v22  ;;  %v11901_v55 = vand.u32 4294901760, %v11894_v56  ;;  %v3565_v28 = vand.u32 4294901760, %v3564_v37  ;;  %v3586_v12 = vsub.f32 %v11876_v15, %v11891_v17 }
 0x5e4   : > { %8661 = vmatprep.mubr.f32.mxu1 %v3554_v50  ;;  %v3576_v34 = vand.u32 4294901760, %v3575_v41  ;;  %3516 = vmatprep.mubr.f32.mxu0 %v13213_v10  ;;  %v11912_v53 = vand.u32 4294901760, %v11904_v20 }
 0x5e5   : > { %v3597_v58 = vsub.f32 %v11894_v56, %v11901_v55  ;;  %v3587_v0 = vand.u32 4294901760, %v3586_v12  ;;  %v13246_v12 = vld [vmem:[#allocation19_spill] sm:$0xff] }
 0x5e6   : > { %8662 = vmatmul.mubr.f32.gmra.mrb[24].mxu1 %v3565_v28  ;;  %v3608_v37 = vsub.f32 %v11904_v20, %v11912_v53 }
 0x5e7   : > { %8664 = vmatprep.mubr.f32.mxu1 %v3576_v34  ;;  %3522 = vmatmul.mubr.f32.gmra.mrb[30].mxu0 %v3521_v47  ;;  %v3598_v22 = vand.u32 4294901760, %v3597_v58  ;;  %v13247_v58 = vld [vmem:[#allocation13_spill] sm:$0xff] }
 0x5e8   : > { %3527 = vmatprep.mubr.f32.mxu0 %v13213_v10  ;;  %v3609_v41 = vand.u32 4294901760, %v3608_v37  ;;  %v13252_v37 = vld [vmem:[#allocation29_spill] sm:$0xff] }
 0x5ea   : > { %8665 = vmatmul.mubr.f32.gmra.mrb[26].mxu1 %v3587_v0 }
 0x5eb   : > { %8667 = vmatprep.mubr.f32.mxu1 %v3598_v22  ;;  %3533 = vmatmul.mubr.f32.gmra.mrb[32].mxu0 %v3532_v27  ;;  %v13238_v27 = vpack.c.bf16 %v11451_v9, %v11449_v51 }
 0x5ec   : > { %3538 = vmatprep.mubr.f32.mxu0 %v13213_v10 }
 0x5ee   : > { %8668 = vmatmul.mubr.f32.gmra.mrb[28].mxu1 %v3609_v41 }
 0x5ef   : > { %8678 = vmatprep.mubr.f32.mxu1 %v11623_v63  ;;  %3544 = vmatmul.mubr.f32.gmra.mrb[34].mxu0 %v3543_v48 }
 0x5f0   : > { %3549 = vmatprep.mubr.f32.mxu0 %v13213_v10 }
 0x5f2   : > { %8679 = vmatmul.mubr.f32.vlgmr.msra.gmra.mrb[30].mxu1 %v11630_v49 }
 0x5f3   : > { %8681 = vmatprep.mubr.f32.mxu1 %v11681_v24  ;;  %3555 = vmatmul.mubr.f32.gmra.mrb[36].mxu0 %v3554_v50  ;;  %v13245_v50 = vld [vmem:[#allocation10_spill] sm:$0xff] }
 0x5f4   : > { %3560 = vmatprep.mubr.f32.mxu0 %v13213_v10  ;;  %9281 = vmatpush3.bf16.msra.mxu1 %v11575_v46  ;;  %v13239_v46 = vpack.c.bf16 %v11491_v26, %v11489_v25 }
 0x5f5   : > { %9283 = vmatprep.subr.bf16.mxu1 %v11579_v35 }
 0x5f6   : > { %8682 = vmatmul.mubr.f32.gmra.mrb[16].mxu1 %v11639_v3 }
 0x5f7   : > { %8684 = vmatprep.mubr.f32.mxu1 %v11722_v8  ;;  %3566 = vmatmul.mubr.f32.gmra.mrb[38].mxu0 %v3565_v28  ;;  %v13242_v28 = vand.u32 4294901760, %v11526_v21  ;;  %v13244_v21 = vand.u32 4294901760, %v11538_v57  ;;  %v13250_v57 = vld [vmem:[#allocation23_spill] sm:$0xff] }
 0x5f8   : > { %3571 = vmatprep.mubr.f32.mxu0 %v13213_v10  ;;  %9285 = vmatpush3.bf16.msra.mxu1 %v11579_v35  ;;  %v13240_v35 = vpack.c.bf16 %v11495_v38, %v11493_v54 }
 0x5f9   : > { %9287 = vmatprep.subr.bf16.mxu1 %v11479_v2 }
 0x5fa   : > { %8685 = vmatmul.mubr.f32.gmra.mrb[18].mxu1 %v11726_v1 }
 0x5fb   : > { %8687 = vmatprep.mubr.f32.mxu1 %v11739_v31  ;;  %3577 = vmatmul.mubr.f32.gmra.mrb[40].mxu0 %v3576_v34  ;;  %v13241_v34 = vand.u32 4294901760, %v11524_v16  ;;  %v13243_v16 = vand.u32 4294901760, %v11536_v6  ;;  %v13249_v6 = vld [vmem:[#allocation22_spill] sm:$0xff] }
 0x5fc   : > { %3582 = vmatprep.mubr.f32.mxu0 %v13213_v10 }
 0x5fd   : > { %v9294_v47 = vpack.c.bf16 %v13242_v28, %v13241_v34  ;;  %v9298_v48 = vpack.c.bf16 %v13244_v21, %v13243_v16  ;;  %v13257_v34 = vld [vmem:[#allocation2_spill] sm:$0xff]  ;;  %v13258_v28 = vld [vmem:[#allocation3_spill] sm:$0xff] }
 0x5fe   : > { %8688 = vmatmul.mubr.f32.gmra.mrb[20].mxu1 %v11748_v43  ;;  %v13261_v21 = vld [vmem:[#allocation6_spill] sm:$0xff] }
 0x5ff   : > { %8690 = vmatprep.mubr.f32.mxu1 %v11783_v5  ;;  %3588 = vmatmul.mubr.f32.gmra.mrb[42].mxu0 %v3587_v0  ;;  %v13251_v0 = vld [vmem:[#allocation25_spill] sm:$0xff] }
 0x600   : > { %3593 = vmatprep.mubr.f32.mxu0 %v13213_v10 }
 0x602   : > { %8691 = vmatmul.mubr.f32.gmra.mrb[22].mxu1 %v11812_v44 }
 0x603   : > { %8693 = vmatprep.mubr.f32.mxu1 %v11831_v14  ;;  %3599 = vmatmul.mubr.f32.gmra.mrb[44].mxu0 %v3598_v22  ;;  %v13248_v22 = vld [vmem:[#allocation21_spill] sm:$0xff] }
 0x604   : > { %3604 = vmatprep.mubr.f32.mxu0 %v13213_v10 }
 0x606   : > { %8694 = vmatmul.mubr.f32.gmra.mrb[24].mxu1 %v11833_v13 }
 0x607   : > { %8696 = vmatprep.mubr.f32.mxu1 %v11855_v60  ;;  %3610 = vmatmul.mubr.f32.gmra.mrb[46].mxu0 %v3609_v41  ;;  %v13253_v41 = vld [vmem:[#allocation32_spill] sm:$0xff] }
 0x608   : > { %3720 = vmatprep.mubr.f32.mxu0 %v13213_v10 }
 0x60a   : > { %8697 = vmatmul.mubr.f32.gmra.mrb[26].mxu1 %v11857_v23 }
 0x60b   : > { %8699 = vmatprep.mubr.f32.mxu1 %v11878_v33  ;;  %3722 = vmatmul.mubr.f32.vlgmr.msra.gmra.mrb[16].mxu0 %v11623_v63 }
 0x60c   : > { %9233 = vmatpush1.bf16.msra.mxu0 %v13238_v27  ;;  %3727 = vmatprep.mubr.f32.mxu0 %v13213_v10  ;;  %v13254_v27 = vld [vmem:[#allocation34_spill] sm:$0xff] }
 0x60d   : > { %9235 = vmatprep.subr.bf16.mxu0 %v13239_v46  ;;  %v13255_v46 = vld [vmem:[#allocation35_spill] sm:$0xff] }
 0x60e   : > { %8700 = vmatmul.mubr.f32.gmra.mrb[28].mxu1 %v11896_v62 }
 0x60f   : > { %8710 = vmatprep.mubr.f32.mxu1 %v11637_v30  ;;  %3729 = vmatmul.mubr.f32.gmra.mrb[18].mxu0 %v11630_v49 }
 0x610   : > { %3734 = vmatprep.mubr.f32.mxu0 %v13213_v10  ;;  %9237 = vmatpush1.bf16.msra.mxu0 %v13240_v35  ;;  %v13256_v35 = vld [vmem:[#allocation36_spill] sm:$0xff] }
 0x611   : > { %9239 = vmatprep.subr.bf16.mxu0 %v11445_v42 }
 0x612   : > { %8711 = vmatmul.mubr.f32.vlgmr.msra.gmra.mrb[30].mxu1 %v11649_v4 }
 0x613   : > { %8713 = vmatprep.mubr.f32.mxu1 %v11699_v52  ;;  %3736 = vmatmul.mubr.f32.gmra.mrb[20].mxu0 %v11681_v24 }
 0x614   : > { %3741 = vmatprep.mubr.f32.mxu0 %v13213_v10  ;;  %9289 = vmatpush3.bf16.msra.mxu1 %v11479_v2 }
 0x615   : > { %9291 = vmatprep.subr.bf16.mxu1 %v11498_v59 }
 0x616   : > { %8714 = vmatmul.mubr.f32.gmra.mrb[16].mxu1 %v11668_v32 }
 0x617   : > { %8716 = vmatprep.mubr.f32.mxu1 %v11737_v36  ;;  %3743 = vmatmul.mubr.f32.gmra.mrb[22].mxu0 %v11639_v3 }
 0x618   : > { %3748 = vmatprep.mubr.f32.mxu0 %v13213_v10  ;;  %9293 = vmatpush3.bf16.msra.mxu1 %v11498_v59 }
 0x619   : > { %9295 = vmatprep.subr.bf16.mxu1 %v9294_v47 }
 0x61a   : > { %8717 = vmatmul.mubr.f32.gmra.mrb[18].mxu1 %v11746_v45 }
 0x61b   : > { %8719 = vmatprep.mubr.f32.mxu1 %v11764_v11  ;;  %3750 = vmatmul.mubr.f32.gmra.mrb[24].mxu0 %v11722_v8 }
 0x61c   : > { %3755 = vmatprep.mubr.f32.mxu0 %v13213_v10 }
 0x61e   : > { %8720 = vmatmul.mubr.f32.gmra.mrb[20].mxu1 %v11780_v61 }
 0x61f   : > { %8722 = vmatprep.mubr.f32.mxu1 %v11798_v18  ;;  %3757 = vmatmul.mubr.f32.gmra.mrb[26].mxu0 %v11726_v1 }
 0x620   : > { %3762 = vmatprep.mubr.f32.mxu0 %v13213_v10 }
 0x622   : > { %8723 = vmatmul.mubr.f32.gmra.mrb[22].mxu1 %v11829_v39 }
 0x623   : > { %8725 = vmatprep.mubr.f32.mxu1 %v11850_v7  ;;  %3764 = vmatmul.mubr.f32.gmra.mrb[28].mxu0 %v11739_v31 }
 0x624   : > { %3769 = vmatprep.mubr.f32.mxu0 %v13213_v10 }
 0x626   : > { %8726 = vmatmul.mubr.f32.gmra.mrb[24].mxu1 %v11853_v29 }
 0x627   : > { %8728 = vmatprep.mubr.f32.mxu1 %v11873_v40  ;;  %3771 = vmatmul.mubr.f32.gmra.mrb[30].mxu0 %v11748_v43 }
 0x628   : > { %3776 = vmatprep.mubr.f32.mxu0 %v13213_v10 }
 0x62a   : > { %8729 = vmatmul.mubr.f32.gmra.mrb[26].mxu1 %v11876_v15 }
 0x62b   : > { %8731 = vmatprep.mubr.f32.mxu1 %v11894_v56  ;;  %3778 = vmatmul.mubr.f32.gmra.mrb[32].mxu0 %v11783_v5 }
 0x62c   : > { %3783 = vmatprep.mubr.f32.mxu0 %v13213_v10 }
 0x62e   : > { %8732 = vmatmul.mubr.f32.gmra.mrb[28].mxu1 %v11904_v20 }
 0x62f   : > { %8742 = vmatprep.mubr.f32.mxu1 %v11646_v19  ;;  %3785 = vmatmul.mubr.f32.gmra.mrb[34].mxu0 %v11812_v44 }
 0x630   : > { %3790 = vmatprep.mubr.f32.mxu0 %v13213_v10 }
 0x632   : > { %8743 = vmatmul.mubr.f32.vlgmr.msra.gmra.mrb[30].mxu1 %v13245_v50 }
 0x633   : > { %8745 = vmatprep.mubr.f32.mxu1 %v13246_v12  ;;  %3792 = vmatmul.mubr.f32.gmra.mrb[36].mxu0 %v11831_v14 }
 0x634   : > { %3797 = vmatprep.mubr.f32.mxu0 %v13213_v10  ;;  %9297 = vmatpush3.bf16.msra.mxu1 %v9294_v47  ;;  %v13259_v47 = vld [vmem:[#allocation5_spill] sm:$0xff] }
 0x635   : > { %9299 = vmatprep.subr.bf16.mxu1 %v9298_v48  ;;  %v13260_v16 = vand.u32 4294901760, %v13259_v47 }
 0x636   : > { %8746 = vmatmul.mubr.f32.gmra.mrb[16].mxu1 %v13247_v58 }
 0x637   : > { %8748 = vmatprep.mubr.f32.mxu1 %v13248_v22  ;;  %3799 = vmatmul.mubr.f32.gmra.mrb[38].mxu0 %v11833_v13 }
 0x638   : > { %3804 = vmatprep.mubr.f32.mxu0 %v13213_v10  ;;  %9301 = vmatpush3.bf16.msra.mxu1 %v9298_v48  ;;  %v13262_v48 = vand.u32 4294901760, %v13261_v21 }
 0x639   : > { %9303 = vmatprep.subr.bf16.mxu1 %v11479_v2 }
 0x63a   : > { %8749 = vmatmul.mubr.f32.gmra.mrb[18].mxu1 %v13249_v6 }
 0x63b   : > { %8751 = vmatprep.mubr.f32.mxu1 %v13250_v57  ;;  %3806 = vmatmul.mubr.f32.gmra.mrb[40].mxu0 %v11855_v60 }
 0x63c   : > { %3811 = vmatprep.mubr.f32.mxu0 %v13213_v10 }
 0x63e   : > { %8752 = vmatmul.mubr.f32.gmra.mrb[20].mxu1 %v13251_v0 }
 0x63f   : > { %8754 = vmatprep.mubr.f32.mxu1 %v13252_v37  ;;  %3813 = vmatmul.mubr.f32.gmra.mrb[42].mxu0 %v11857_v23 }
 0x640   : > { %3818 = vmatprep.mubr.f32.mxu0 %v13213_v10 }
 0x642   : > { %8755 = vmatmul.mubr.f32.gmra.mrb[22].mxu1 %v13253_v41 }
 0x643   : > { %8757 = vmatprep.mubr.f32.mxu1 %v13254_v27  ;;  %3820 = vmatmul.mubr.f32.gmra.mrb[44].mxu0 %v11878_v33 }
 0x644   : > { %3825 = vmatprep.mubr.f32.mxu0 %v13213_v10 }
 0x646   : > { %8758 = vmatmul.mubr.f32.gmra.mrb[24].mxu1 %v13255_v46 }
 0x647   : > { %8760 = vmatprep.mubr.f32.mxu1 %v13256_v35  ;;  %3827 = vmatmul.mubr.f32.gmra.mrb[46].mxu0 %v11896_v62  ;;  %v9246_v35 = vpack.c.bf16 %v13262_v48, %v13260_v16 }
 0x648   : > { %3913 = vmatprep.mubr.f32.mxu0 %v13213_v10 }
 0x64a   : > { %8761 = vmatmul.mubr.f32.gmra.mrb[26].mxu1 %v11891_v17 }
 0x64b   : > { %8763 = vmatprep.mubr.f32.mxu1 %v11901_v55  ;;  %3916 = vmatmul.mubr.f32.vlgmr.msra.gmra.mrb[16].mxu0 %v11637_v30  ;;  %v13263_v30 = vld [vmem:[#allocation4_spill] sm:$0xff] }
 0x64c   : > { %9241 = vmatpush1.bf16.msra.mxu0 %v13257_v34  ;;  %3921 = vmatprep.mubr.f32.mxu0 %v13213_v10 }
 0x64d   : > { %9243 = vmatprep.subr.bf16.mxu0 %v13258_v28 }
 0x64e   : > { %8764 = vmatmul.mubr.f32.gmra.mrb[28].mxu1 %v11912_v53 }
 0x64f   : > { %8774 = vmatprep.mubr.f32.mxu1 %v11623_v63  ;;  %3924 = vmatmul.mubr.f32.gmra.mrb[18].mxu0 %v11649_v4 }
 0x650   : > { %3929 = vmatprep.mubr.f32.mxu0 %v13213_v10  ;;  %9245 = vmatpush1.bf16.msra.mxu0 %v13263_v30 }
 0x651   : > { %9247 = vmatprep.subr.bf16.mxu0 %v9246_v35 }
 0x652   : > { %8775 = vmatmul.mubr.f32.vlgmr.msra.gmra.mrb[30].mxu1 %v11630_v49 }
 0x653   : > { %8777 = vmatprep.mubr.f32.mxu1 %v11681_v24  ;;  %3932 = vmatmul.mubr.f32.gmra.mrb[20].mxu0 %v11699_v52  ;;  %v13267_v52 = vand.u32 4294901760, %v11491_v26 }
 0x654   : > { %3937 = vmatprep.mubr.f32.mxu0 %v13213_v10  ;;  %9305 = vmatpush3.bf16.msra.mxu1 %v11479_v2 }
 0x655   : > { %9307 = vmatprep.subr.bf16.mxu1 %v11498_v59 }
 0x656   : > { %8778 = vmatmul.mubr.f32.gmra.mrb[16].mxu1 %v11639_v3 }
 0x657   : > { %8780 = vmatprep.mubr.f32.mxu1 %v11722_v8  ;;  %3940 = vmatmul.mubr.f32.gmra.mrb[22].mxu0 %v11668_v32  ;;  %v13266_v32 = vand.u32 4294901760, %v11489_v25 }
 0x658   : > { %3945 = vmatprep.mubr.f32.mxu0 %v13213_v10  ;;  %9309 = vmatpush3.bf16.msra.mxu1 %v11498_v59 }
 0x65a   : > { %8781 = vmatmul.mubr.f32.gmra.mrb[18].mxu1 %v11726_v1 }
 0x65b   : > { %8783 = vmatprep.mubr.f32.mxu1 %v11739_v31  ;;  %3948 = vmatmul.mubr.f32.gmra.mrb[24].mxu0 %v11737_v36  ;;  %v13265_v36 = vand.u32 4294901760, %v11451_v9 }
 0x65c   : > { %3953 = vmatprep.mubr.f32.mxu0 %v13213_v10 }
 0x65e   : > { %8784 = vmatmul.mubr.f32.gmra.mrb[20].mxu1 %v11748_v43 }
 0x65f   : > { %8786 = vmatprep.mubr.f32.mxu1 %v11783_v5  ;;  %3956 = vmatmul.mubr.f32.gmra.mrb[26].mxu0 %v11746_v45  ;;  %v9250_v45 = vpack.c.bf16 %v13267_v52, %v13266_v32 }
 0x660   : > { %3961 = vmatprep.mubr.f32.mxu0 %v13213_v10 }
 0x662   : > { %8787 = vmatmul.mubr.f32.gmra.mrb[22].mxu1 %v11812_v44 }
 0x663   : > { %8789 = vmatprep.mubr.f32.mxu1 %v11831_v14  ;;  %3964 = vmatmul.mubr.f32.gmra.mrb[28].mxu0 %v11764_v11  ;;  %v13264_v11 = vand.u32 4294901760, %v11449_v51  ;;  %v13269_v51 = vand.u32 4294901760, %v11495_v38  ;;  %v13272_v38 = vld [vmem:[#allocation14_spill] sm:$0xff] }
 0x664   : > { %3969 = vmatprep.mubr.f32.mxu0 %v13213_v10 }
 0x665   : > { %v9248_v4 = vpack.c.bf16 %v13265_v36, %v13264_v11 }
 0x666   : > { %8790 = vmatmul.mubr.f32.gmra.mrb[24].mxu1 %v11833_v13 }
 0x667   : > { %8792 = vmatprep.mubr.f32.mxu1 %v11855_v60  ;;  %3972 = vmatmul.mubr.f32.gmra.mrb[30].mxu0 %v11780_v61  ;;  %v12262_v61 = vld [vmem:[%s13073_s3 + $0x7] ss:$0 sm:$0xff] }
 0x668   : > { %3977 = vmatprep.mubr.f32.mxu0 %v13213_v10 }
 0x66a   : > { %8793 = vmatmul.mubr.f32.gmra.mrb[26].mxu1 %v11857_v23 }
 0x66b   : > { %8795 = vmatprep.mubr.f32.mxu1 %v11878_v33  ;;  %3980 = vmatmul.mubr.f32.gmra.mrb[32].mxu0 %v11798_v18 }
 0x66c   : > { %3985 = vmatprep.mubr.f32.mxu0 %v13213_v10 }
 0x66e   : > { %8796 = vmatmul.mubr.f32.gmra.mrb[28].mxu1 %v11896_v62 }
 0x66f   : > { %8806 = vmatprep.mubr.f32.mxu1 %v11623_v63  ;;  %3988 = vmatmul.mubr.f32.gmra.mrb[34].mxu0 %v11829_v39 }
 0x670   : > { %3993 = vmatprep.mubr.f32.mxu0 %v13213_v10 }
 0x672   : > { %8807 = vmatmul.mubr.f32.vlgmr.msra.gmra.mrb[30].mxu1 %v11630_v49 }
 0x673   : > { %8809 = vmatprep.mubr.f32.mxu1 %v11681_v24  ;;  %3996 = vmatmul.mubr.f32.gmra.mrb[36].mxu0 %v11850_v7 }
 0x674   : > { %4001 = vmatprep.mubr.f32.mxu0 %v13213_v10 }
 0x676   : > { %8810 = vmatmul.mubr.f32.gmra.mrb[16].mxu1 %v11639_v3 }
 0x677   : > { %8812 = vmatprep.mubr.f32.mxu1 %v11722_v8  ;;  %4004 = vmatmul.mubr.f32.gmra.mrb[38].mxu0 %v11853_v29 }
 0x678   : > { %4009 = vmatprep.mubr.f32.mxu0 %v13213_v10 }
 0x67a   : > { %8813 = vmatmul.mubr.f32.gmra.mrb[18].mxu1 %v11726_v1 }
 0x67b   : > { %8815 = vmatprep.mubr.f32.mxu1 %v11739_v31  ;;  %4012 = vmatmul.mubr.f32.gmra.mrb[40].mxu0 %v11873_v40  ;;  %v13268_v40 = vand.u32 4294901760, %v11493_v54 }
 0x67c   : > { %4017 = vmatprep.mubr.f32.mxu0 %v13213_v10 }
 0x67d   : > { %v9252_v9 = vpack.c.bf16 %v13269_v51, %v13268_v40 }
 0x67e   : > { %8816 = vmatmul.mubr.f32.gmra.mrb[20].mxu1 %v11748_v43 }
 0x67f   : > { %8818 = vmatprep.mubr.f32.mxu1 %v11783_v5  ;;  %4020 = vmatmul.mubr.f32.gmra.mrb[42].mxu0 %v11876_v15 }
 0x680   : > { %4025 = vmatprep.mubr.f32.mxu0 %v13213_v10 }
 0x682   : > { %8819 = vmatmul.mubr.f32.gmra.mrb[22].mxu1 %v11812_v44 }
 0x683   : > { %8821 = vmatprep.mubr.f32.mxu1 %v11831_v14  ;;  %4028 = vmatmul.mubr.f32.gmra.mrb[44].mxu0 %v11894_v56 }
 0x684   : > { %4033 = vmatprep.mubr.f32.mxu0 %v13213_v10 }
 0x686   : > { %8822 = vmatmul.mubr.f32.gmra.mrb[24].mxu1 %v11833_v13 }
 0x687   : > { %8824 = vmatprep.mubr.f32.mxu1 %v11855_v60  ;;  %4036 = vmatmul.mubr.f32.gmra.mrb[46].mxu0 %v11904_v20 }
 0x688   : > { %4114 = vmatprep.mubr.f32.mxu0 %v13213_v10 }
 0x68a   : > { %8825 = vmatmul.mubr.f32.gmra.mrb[26].mxu1 %v11857_v23 }
 0x68b   : > { %8827 = vmatprep.mubr.f32.mxu1 %v11878_v33  ;;  %4118 = vmatmul.mubr.f32.vlgmr.msra.gmra.mrb[16].mxu0 %v11646_v19 }
 0x68c   : > { %9249 = vmatpush1.bf16.msra.mxu0 %v9248_v4  ;;  %4123 = vmatprep.mubr.f32.mxu0 %v13213_v10 }
 0x68d   : > { %9251 = vmatprep.subr.bf16.mxu0 %v9250_v45 }
 0x68e   : > { %8828 = vmatmul.mubr.f32.gmra.mrb[28].mxu1 %v11896_v62 }
 0x68f   : > { %4127 = vmatmul.mubr.f32.gmra.mrb[18].mxu0 %v13245_v50 }
 0x690   : > { %4132 = vmatprep.mubr.f32.mxu0 %v13213_v10  ;;  %9253 = vmatpush1.bf16.msra.mxu0 %v9252_v9 }
 0x691   : > { %9255 = vmatprep.subr.bf16.mxu0 %v11445_v42  ;;  %v13270_v42 = vld [vmem:[#allocation36_spill] sm:$0xff] }
 0x693   : > { %4136 = vmatmul.mubr.f32.gmra.mrb[20].mxu0 %v13246_v12 }
 0x694   : > { %4141 = vmatprep.mubr.f32.mxu0 %v13213_v10 }
 0x697   : > { %4145 = vmatmul.mubr.f32.gmra.mrb[22].mxu0 %v13247_v58 }
 0x698   : > { %4150 = vmatprep.mubr.f32.mxu0 %v13213_v10 }
 0x69b   : > { %4154 = vmatmul.mubr.f32.gmra.mrb[24].mxu0 %v13248_v22 }
 0x69c   : > { %4159 = vmatprep.mubr.f32.mxu0 %v13213_v10 }
 0x69f   : > { %4163 = vmatmul.mubr.f32.gmra.mrb[26].mxu0 %v13249_v6 }
 0x6a0   : > { %4168 = vmatprep.mubr.f32.mxu0 %v13213_v10 }
 0x6a3   : > { %4172 = vmatmul.mubr.f32.gmra.mrb[28].mxu0 %v13250_v57 }
 0x6a4   : > { %4177 = vmatprep.mubr.f32.mxu0 %v13213_v10 }
 0x6a7   : > { %4181 = vmatmul.mubr.f32.gmra.mrb[30].mxu0 %v13251_v0 }
 0x6a8   : > { %4186 = vmatprep.mubr.f32.mxu0 %v13213_v10 }
 0x6ab   : > { %4190 = vmatmul.mubr.f32.gmra.mrb[32].mxu0 %v13252_v37 }
 0x6ac   : > { %4195 = vmatprep.mubr.f32.mxu0 %v13213_v10 }
 0x6af   : > { %4199 = vmatmul.mubr.f32.gmra.mrb[34].mxu0 %v13253_v41 }
 0x6b0   : > { %4204 = vmatprep.mubr.f32.mxu0 %v13213_v10 }
 0x6b3   : > { %4208 = vmatmul.mubr.f32.gmra.mrb[36].mxu0 %v13254_v27 }
 0x6b4   : > { %4213 = vmatprep.mubr.f32.mxu0 %v13213_v10 }
 0x6b7   : > { %4217 = vmatmul.mubr.f32.gmra.mrb[38].mxu0 %v13255_v46 }
 0x6b8   : > { %4222 = vmatprep.mubr.f32.mxu0 %v13213_v10 }
 0x6bb   : > { %4226 = vmatmul.mubr.f32.gmra.mrb[40].mxu0 %v13270_v42 }
 0x6bc   : > { %4231 = vmatprep.mubr.f32.mxu0 %v13213_v10 }
 0x6bf   : > { %4235 = vmatmul.mubr.f32.gmra.mrb[42].mxu0 %v11891_v17 }
 0x6c0   : > { %4240 = vmatprep.mubr.f32.mxu0 %v13213_v10 }
 0x6c3   : > { %4244 = vmatmul.mubr.f32.gmra.mrb[44].mxu0 %v11901_v55 }
 0x6c4   : > { %4249 = vmatprep.mubr.f32.mxu0 %v13213_v10 }
 0x6c7   : > { %4253 = vmatmul.mubr.f32.gmra.mrb[46].mxu0 %v11912_v53 }
 0x6c8   : > { %4347 = vmatprep.mubr.f32.mxu0 %v13213_v10 }
 0x6cb   : > { %4349 = vmatmul.mubr.f32.vlgmr.msra.gmra.mrb[16].mxu0 %v11623_v63 }
 0x6cc   : > { %9257 = vmatpush1.bf16.msra.mxu0 %v13257_v34  ;;  %4354 = vmatprep.mubr.f32.mxu0 %v13213_v10 }
 0x6cd   : > { %9259 = vmatprep.subr.bf16.mxu0 %v13258_v28 }
 0x6cf   : > { %4356 = vmatmul.mubr.f32.gmra.mrb[18].mxu0 %v11630_v49 }
 0x6d0   : > { %4361 = vmatprep.mubr.f32.mxu0 %v13213_v10  ;;  %9261 = vmatpush1.bf16.msra.mxu0 %v13263_v30 }
 0x6d1   : > { %9263 = vmatprep.subr.bf16.mxu0 %v11479_v2 }
 0x6d3   : > { %4363 = vmatmul.mubr.f32.gmra.mrb[20].mxu0 %v11681_v24 }
 0x6d4   : > { %4368 = vmatprep.mubr.f32.mxu0 %v13213_v10 }
 0x6d7   : > { %4370 = vmatmul.mubr.f32.gmra.mrb[22].mxu0 %v11639_v3 }
 0x6d8   : > { %4375 = vmatprep.mubr.f32.mxu0 %v13213_v10 }
 0x6db   : > { %4377 = vmatmul.mubr.f32.gmra.mrb[24].mxu0 %v11722_v8 }
 0x6dc   : > { %4382 = vmatprep.mubr.f32.mxu0 %v13213_v10 }
 0x6df   : > { %4384 = vmatmul.mubr.f32.gmra.mrb[26].mxu0 %v11726_v1 }
 0x6e0   : > { %4389 = vmatprep.mubr.f32.mxu0 %v13213_v10 }
 0x6e3   : > { %4391 = vmatmul.mubr.f32.gmra.mrb[28].mxu0 %v11739_v31 }
 0x6e4   : > { %4396 = vmatprep.mubr.f32.mxu0 %v13213_v10 }
 0x6e7   : > { %4398 = vmatmul.mubr.f32.gmra.mrb[30].mxu0 %v11748_v43 }
 0x6e8   : > { %4403 = vmatprep.mubr.f32.mxu0 %v13213_v10 }
 0x6eb   : > { %4405 = vmatmul.mubr.f32.gmra.mrb[32].mxu0 %v11783_v5 }
 0x6ec   : > { %4410 = vmatprep.mubr.f32.mxu0 %v13213_v10 }
 0x6ef   : > { %4412 = vmatmul.mubr.f32.gmra.mrb[34].mxu0 %v11812_v44 }
 0x6f0   : > { %4417 = vmatprep.mubr.f32.mxu0 %v13213_v10 }
 0x6f3   : > { %4419 = vmatmul.mubr.f32.gmra.mrb[36].mxu0 %v11831_v14 }
 0x6f4   : > { %4424 = vmatprep.mubr.f32.mxu0 %v13213_v10 }
 0x6f7   : > { %4426 = vmatmul.mubr.f32.gmra.mrb[38].mxu0 %v11833_v13 }
 0x6f8   : > { %4431 = vmatprep.mubr.f32.mxu0 %v13213_v10 }
 0x6fb   : > { %4433 = vmatmul.mubr.f32.gmra.mrb[40].mxu0 %v11855_v60 }
 0x6fc   : > { %4438 = vmatprep.mubr.f32.mxu0 %v13213_v10 }
 0x6ff   : > { %4440 = vmatmul.mubr.f32.gmra.mrb[42].mxu0 %v11857_v23 }
 0x700   : > { %4445 = vmatprep.mubr.f32.mxu0 %v13213_v10 }
 0x703   : > { %4447 = vmatmul.mubr.f32.gmra.mrb[44].mxu0 %v11878_v33 }
 0x704   : > { %4452 = vmatprep.mubr.f32.mxu0 %v13213_v10 }
 0x707   : > { %4454 = vmatmul.mubr.f32.gmra.mrb[46].mxu0 %v11896_v62 }
 0x708   : > { %4532 = vmatprep.mubr.f32.mxu0 %v13213_v10 }
 0x70b   : > { %4534 = vmatmul.mubr.f32.vlgmr.msra.gmra.mrb[16].mxu0 %v11623_v63 }
 0x70c   : > { %4539 = vmatprep.mubr.f32.mxu0 %v13213_v10  ;;  %9265 = vmatpush3.bf16.msra.mxu0 %v11479_v2 }
 0x70d   : > { %9267 = vmatprep.subr.bf16.mxu0 %v11498_v59 }
 0x70f   : > { %4541 = vmatmul.mubr.f32.gmra.mrb[18].mxu0 %v11630_v49 }
 0x710   : > { %4546 = vmatprep.mubr.f32.mxu0 %v13213_v10  ;;  %9269 = vmatpush3.bf16.msra.mxu0 %v11498_v59 }
 0x713   : > { %4548 = vmatmul.mubr.f32.gmra.mrb[20].mxu0 %v11681_v24 }
 0x714   : > { %4553 = vmatprep.mubr.f32.mxu0 %v13213_v10 }
 0x717   : > { %4555 = vmatmul.mubr.f32.gmra.mrb[22].mxu0 %v11639_v3 }
 0x718   : > { %4560 = vmatprep.mubr.f32.mxu0 %v13213_v10 }
 0x71b   : > { %4562 = vmatmul.mubr.f32.gmra.mrb[24].mxu0 %v11722_v8 }
 0x71c   : > { %4567 = vmatprep.mubr.f32.mxu0 %v13213_v10 }
 0x71f   : > { %4569 = vmatmul.mubr.f32.gmra.mrb[26].mxu0 %v11726_v1 }
 0x720   : > { %4574 = vmatprep.mubr.f32.mxu0 %v13213_v10 }
 0x723   : > { %4576 = vmatmul.mubr.f32.gmra.mrb[28].mxu0 %v11739_v31 }
 0x724   : > { %4581 = vmatprep.mubr.f32.mxu0 %v13213_v10 }
 0x727   : > { %4583 = vmatmul.mubr.f32.gmra.mrb[30].mxu0 %v11748_v43 }
 0x728   : > { %4588 = vmatprep.mubr.f32.mxu0 %v13213_v10 }
 0x72b   : > { %4590 = vmatmul.mubr.f32.gmra.mrb[32].mxu0 %v11783_v5 }
 0x72c   : > { %4595 = vmatprep.mubr.f32.mxu0 %v13213_v10 }
 0x72f   : > { %4597 = vmatmul.mubr.f32.gmra.mrb[34].mxu0 %v11812_v44 }
 0x730   : > { %4602 = vmatprep.mubr.f32.mxu0 %v13213_v10 }
 0x733   : > { %4604 = vmatmul.mubr.f32.gmra.mrb[36].mxu0 %v11831_v14 }
 0x734   : > { %4609 = vmatprep.mubr.f32.mxu0 %v13213_v10 }
 0x737   : > { %4611 = vmatmul.mubr.f32.gmra.mrb[38].mxu0 %v11833_v13  ;;  %v13271_v13 = vld [vmem:[#allocation12_spill] sm:$0xff] }
 0x738   : > { %4616 = vmatprep.mubr.f32.mxu0 %v13213_v10 }
 0x73b   : > { %4618 = vmatmul.mubr.f32.gmra.mrb[40].mxu0 %v11855_v60 }
 0x73c   : > { %4623 = vmatprep.mubr.f32.mxu0 %v13213_v10 }
 0x73f   : > { %4625 = vmatmul.mubr.f32.gmra.mrb[42].mxu0 %v11857_v23  ;;  %v12257_v23 = vld [vmem:[%s13073_s3 + $0x6] ss:$0 sm:$0xff] }
 0x740   : > { %4630 = vmatprep.mubr.f32.mxu0 %v13213_v10 }
 0x743   : > { %4632 = vmatmul.mubr.f32.gmra.mrb[44].mxu0 %v11878_v33 }
 0x744   : > { %4637 = vmatprep.mubr.f32.mxu0 %v13213_v10 }
 0x745   : > { %v12219_v2 = vpop.f32.mrb[30].mxu1 }
 0x746   : > { %v12221_v25 = vpop.f32.mrb[31].mxu1 }
 0x747   : > { %4639 = vmatmul.mubr.f32.gmra.mrb[46].mxu0 %v11896_v62 }
 0x748   : > { %8646 = vmatprep.mubr.f32.mxu0 %v13271_v13 }
 0x749   : > { %v12225_v26 = vpop.f32.mrb[16].mxu1 }
 0x74a   : > { %v12227_v54 = vpop.f32.mrb[17].mxu1 }
 0x74b   : > { %8647 = vmatmul.mubr.f32.vlgmr.msra.gmra.mrb[48].mxu0 %v13272_v38 }
 0x74d   : > { %v12230_v59 = vpop.f32.mrb[18].mxu1 }
 0x74e   : > { %v12232_v49 = vpop.f32.mrb[19].mxu1 }
 0x751   : > { %v12234_v63 = vpop.f32.mrb[20].mxu1 }
 0x752   : > { %v12236_v3 = vpop.f32.mrb[21].mxu1 }
 0x755   : > { %v12238_v19 = vpop.f32.mrb[22].mxu1 }
 0x756   : > { %v12240_v24 = vpop.f32.mrb[23].mxu1 }
 0x759   : > { %v12242_v62 = vpop.f32.mrb[24].mxu1 }
 0x75a   : > { %v12244_v10 = vpop.f32.mrb[25].mxu1 }
 0x75d   : > { %v12246_v1 = vpop.f32.mrb[26].mxu1 }
 0x75e   : > { %v12248_v8 = vpop.f32.mrb[27].mxu1 }
 0x761   : > { %v12250_v31 = vpop.f32.mrb[28].mxu1 }
 0x762   : > { %v12252_v43 = vpop.f32.mrb[29].mxu1 }
 0x7de   : > { %v4535_v5 = vpop.f32.mrb[16].mxu0 }
 0x7df   : > { %v5782_v60 = vadd.f32 %v12257_v23, %v4535_v5  ;;  %v4537_v18 = vpop.f32.mrb[17].mxu0 }
 0x7e0   : > { %v5805_v29 = vadd.f32 %v12262_v61, %v4537_v18 }
 0x7e2   : > { %v4542_v44 = vpop.f32.mrb[18].mxu0  ;;  %v5844_v39 = vmul.f32 %v5805_v29, %v5782_v60 }
 0x7e3   : > { %v5783_v14 = vadd.f32 %v12257_v23, %v4542_v44  ;;  %v4544_v33 = vpop.f32.mrb[19].mxu0 }
 0x7e4   : > { %v5806_v7 = vadd.f32 %v12262_v61, %v4544_v33  ;;  %v5860_v20 = vsel %vm1425_vm1, %v5844_v39, 0.0 }
 0x7e5   : > { %5861 = vadd.xlane.f32.xlu0 %v5860_v20 }
 0x7e6   : > { %v4549_v55 = vpop.f32.mrb[20].mxu0  ;;  %v5845_v15 = vmul.f32 %v5806_v7, %v5783_v14 }
 0x7e7   : > { %v5784_v53 = vadd.f32 %v12257_v23, %v4549_v55  ;;  %v4551_v17 = vpop.f32.mrb[21].mxu0 }
 0x7e8   : > { %v5807_v56 = vadd.f32 %v12262_v61, %v4551_v17  ;;  %v5863_v50 = vsel %vm1425_vm1, %v5845_v15, 0.0 }
 0x7e9   : > { %5864 = vadd.xlane.f32.xlu1 %v5863_v50 }
 0x7ea   : > { %v4556_v12 = vpop.f32.mrb[22].mxu0  ;;  %v5846_v58 = vmul.f32 %v5807_v56, %v5784_v53 }
 0x7eb   : > { %v5785_v22 = vadd.f32 %v12257_v23, %v4556_v12  ;;  %v4558_v6 = vpop.f32.mrb[23].mxu0 }
 0x7ec   : > { %v5808_v57 = vadd.f32 %v12262_v61, %v4558_v6  ;;  %v5866_v0 = vsel %vm1425_vm1, %v5846_v58, 0.0 }
 0x7ed   : > { %5867 = vadd.xlane.f32.xlu0 %v5866_v0 }
 0x7ee   : > { %v4563_v37 = vpop.f32.mrb[24].mxu0  ;;  %v5847_v41 = vmul.f32 %v5808_v57, %v5785_v22 }
 0x7ef   : > { %v5786_v27 = vadd.f32 %v12257_v23, %v4563_v37  ;;  %v4565_v46 = vpop.f32.mrb[25].mxu0 }
 0x7f0   : > { %v5809_v35 = vadd.f32 %v12262_v61, %v4565_v46  ;;  %v5869_v34 = vsel %vm1425_vm1, %v5847_v41, 0.0 }
 0x7f1   : > { %5870 = vadd.xlane.f32.xlu1 %v5869_v34 }
 0x7f2   : > { %v4570_v28 = vpop.f32.mrb[26].mxu0  ;;  %v5848_v47 = vmul.f32 %v5809_v35, %v5786_v27 }
 0x7f3   : > { %v5787_v16 = vadd.f32 %v12257_v23, %v4570_v28  ;;  %v4572_v21 = vpop.f32.mrb[27].mxu0 }
 0x7f4   : > { %v5810_v48 = vadd.f32 %v12262_v61, %v4572_v21  ;;  %v5872_v30 = vsel %vm1425_vm1, %v5848_v47, 0.0 }
 0x7f5   : > { %5873 = vadd.xlane.f32.xlu0 %v5872_v30 }
 0x7f6   : > { %v4577_v11 = vpop.f32.mrb[28].mxu0  ;;  %v5849_v36 = vmul.f32 %v5810_v48, %v5787_v16 }
 0x7f7   : > { %v5788_v4 = vadd.f32 %v12257_v23, %v4577_v11  ;;  %v4579_v32 = vpop.f32.mrb[29].mxu0 }
 0x7f8   : > { %v5811_v52 = vadd.f32 %v12262_v61, %v4579_v32  ;;  %v5875_v45 = vsel %vm1425_vm1, %v5849_v36, 0.0 }
 0x7f9   : > { %5876 = vadd.xlane.f32.xlu1 %v5875_v45 }
 0x7fa   : > { %v4584_v40 = vpop.f32.mrb[30].mxu0  ;;  %v5850_v51 = vmul.f32 %v5811_v52, %v5788_v4 }
 0x7fb   : > { %v5789_v9 = vadd.f32 %v12257_v23, %v4584_v40  ;;  %v4586_v42 = vpop.f32.mrb[31].mxu0 }
 0x7fc   : > { %v5812_v13 = vadd.f32 %v12262_v61, %v4586_v42  ;;  %v5878_v38 = vsel %vm1425_vm1, %v5850_v51, 0.0 }
 0x7fd   : > { %5879 = vadd.xlane.f32.xlu0 %v5878_v38 }
 0x7fe   : > { %v4591_v5 = vpop.f32.mrb[32].mxu0  ;;  %v5851_v60 = vmul.f32 %v5812_v13, %v5789_v9 }
 0x7ff   : > { %v5790_v18 = vadd.f32 %v12257_v23, %v4591_v5  ;;  %v4593_v29 = vpop.f32.mrb[33].mxu0 }
 0x800   : > { %v5813_v44 = vadd.f32 %v12262_v61, %v4593_v29  ;;  %v5881_v39 = vsel %vm1425_vm1, %v5851_v60, 0.0 }
 0x801   : > { %5882 = vadd.xlane.f32.xlu1 %v5881_v39 }
 0x802   : > { %v4598_v14 = vpop.f32.mrb[34].mxu0  ;;  %v5852_v33 = vmul.f32 %v5813_v44, %v5790_v18 }
 0x803   : > { %v5791_v7 = vadd.f32 %v12257_v23, %v4598_v14  ;;  %v4600_v20 = vpop.f32.mrb[35].mxu0 }
 0x804   : > { %v5814_v55 = vadd.f32 %v12262_v61, %v4600_v20  ;;  %v5884_v15 = vsel %vm1425_vm1, %v5852_v33, 0.0 }
 0x805   : > { %5885 = vadd.xlane.f32.xlu0 %v5884_v15 }
 0x806   : > { %v4605_v53 = vpop.f32.mrb[36].mxu0  ;;  %v5853_v17 = vmul.f32 %v5814_v55, %v5791_v7 }
 0x807   : > { %v5792_v56 = vadd.f32 %v12257_v23, %v4605_v53  ;;  %v4607_v50 = vpop.f32.mrb[37].mxu0 }
 0x808   : > { %v5815_v12 = vadd.f32 %v12262_v61, %v4607_v50  ;;  %v5887_v58 = vsel %vm1425_vm1, %v5853_v17, 0.0  ;;  %v6217_v50 = vld [vmem:[%s13072_s2 + $0x58] sm:$0xff] }
 0x809   : > { %5888 = vadd.xlane.f32.xlu1 %v5887_v58  ;;  %v6284_v58 = vand.u32 4294901760, %v6217_v50 }
 0x80a   : > { %v4612_v22 = vpop.f32.mrb[38].mxu0  ;;  %v5854_v6 = vmul.f32 %v5815_v12, %v5792_v56  ;;  %v6216_v56 = vld [vmem:[%s13072_s2 + $0x48] sm:$0xff] }
 0x80b   : > { %v5793_v57 = vadd.f32 %v12257_v23, %v4612_v22  ;;  %v4614_v0 = vpop.f32.mrb[39].mxu0  ;;  %v6281_v12 = vand.u32 4294901760, %v6216_v56 }
 0x80c   : > { %v5816_v37 = vadd.f32 %v12262_v61, %v4614_v0  ;;  %v5890_v41 = vsel %vm1425_vm1, %v5854_v6, 0.0  ;;  %v6218_v6 = vld [vmem:[%s13072_s2 + $0x68] sm:$0xff] }
 0x80d   : > { %5891 = vadd.xlane.f32.xlu0 %v5890_v41  ;;  %v12344_v22 = vpack.c.bf16 %v6284_v58, %v6281_v12  ;;  %v6287_v0 = vand.u32 4294901760, %v6218_v6 }
 0x80e   : > { %v4619_v27 = vpop.f32.mrb[40].mxu0  ;;  %v5855_v46 = vmul.f32 %v5816_v37, %v5793_v57  ;;  %v6219_v57 = vld [vmem:[%s13072_s2 + $0x78] sm:$0xff] }
 0x80f   : > { %v5794_v35 = vadd.f32 %v12257_v23, %v4619_v27  ;;  %v4621_v34 = vpop.f32.mrb[41].mxu0  ;;  %13274 = vst [vmem:[#allocation19_spill] sm:$0xff] %v12344_v22  ;;  %v6290_v37 = vand.u32 4294901760, %v6219_v57 }
 0x810   : > { %v5817_v28 = vadd.f32 %v12262_v61, %v4621_v34  ;;  %v5893_v47 = vsel %vm1425_vm1, %v5855_v46, 0.0 }
 0x811   : > { %5894 = vadd.xlane.f32.xlu1 %v5893_v47  ;;  %v12354_v41 = vpack.c.bf16 %v6290_v37, %v6287_v0 }
 0x812   : > { %v4626_v16 = vpop.f32.mrb[42].mxu0  ;;  %v5856_v21 = vmul.f32 %v5817_v28, %v5794_v35 }
 0x813   : > { %v5795_v48 = vadd.f32 %v12257_v23, %v4626_v16  ;;  %v4628_v30 = vpop.f32.mrb[43].mxu0  ;;  %13275 = vst [vmem:[#allocation13_spill] sm:$0xff] %v12354_v41 }
 0x814   : > { %v5818_v11 = vadd.f32 %v12262_v61, %v4628_v30  ;;  %v5896_v36 = vsel %vm1425_vm1, %v5856_v21, 0.0 }
 0x815   : > { %5897 = vadd.xlane.f32.xlu0 %v5896_v36 }
 0x816   : > { %v4633_v4 = vpop.f32.mrb[44].mxu0  ;;  %v5857_v32 = vmul.f32 %v5818_v11, %v5795_v48 }
 0x817   : > { %v5796_v52 = vadd.f32 %v12257_v23, %v4633_v4  ;;  %v4635_v45 = vpop.f32.mrb[45].mxu0 }
 0x818   : > { %v5819_v40 = vadd.f32 %v12262_v61, %v4635_v45  ;;  %v5899_v51 = vsel %vm1425_vm1, %v5857_v32, 0.0  ;;  %v12384_v45 = vsub.f32 %v6216_v56, %v6281_v12 }
 0x819   : > { %5900 = vadd.xlane.f32.xlu1 %v5899_v51 }
 0x81a   : > { %v4640_v9 = vpop.f32.mrb[46].mxu0  ;;  %v5858_v42 = vmul.f32 %v5819_v40, %v5796_v52  ;;  %13280 = vst [vmem:[#allocation29_spill] sm:$0xff] %v12384_v45  ;;  %v12386_v40 = vsub.f32 %v6217_v50, %v6284_v58 }
 0x81b   : > { %v5797_v13 = vadd.f32 %v12257_v23, %v4640_v9  ;;  %v4642_v38 = vpop.f32.mrb[47].mxu0  ;;  %v6212_v23 = vld [vmem:[%s13072_s2 + $0x8] sm:$0xff] }
 0x81c   : > { %v5820_v5 = vadd.f32 %v12262_v61, %v4642_v38  ;;  %v5902_v60 = vsel %vm1425_vm1, %v5858_v42, 0.0  ;;  %v6213_v61 = vld [vmem:[%s13072_s2 + $0x18] sm:$0xff]  ;;  %v6269_v7 = vand.u32 4294901760, %v6212_v23  ;;  %13281 = vst [vmem:[#allocation32_spill] sm:$0xff] %v12386_v40  ;;  %v13160_v42 = vand.u32 4294901760, %v12384_v45 }
 0x81d   : > { %5903 = vadd.xlane.f32.xlu0 %v5902_v60  ;;  %v6272_v20 = vand.u32 4294901760, %v6213_v61  ;;  %v12396_v60 = vsub.f32 %v6218_v6, %v6287_v0 }
 0x81e   : > { %v8648_v18 = vpop.f32.mrb[48].mxu0  ;;  %v5859_v29 = vmul.f32 %v5820_v5, %v5797_v13  ;;  %v12358_v27 = vsub.f32 %v6212_v23, %v6269_v7  ;;  %v13159_v13 = vand.u32 4294901760, %v12386_v40  ;;  %v6533_v5 = vsub.f32 %v12384_v45, %v13160_v42 }
 0x81f   : > { %v12312_v44 = vadd.f32 %v12219_v2, %v8648_v18  ;;  %v4720_v39 = vpop.f32.mrb[49].mxu0  ;;  %v12324_v55 = vpack.c.bf16 %v6272_v20, %v6269_v7  ;;  %v6214_v2 = vld [vmem:[%s13072_s2 + $0x28] sm:$0xff]  ;;  %v12360_v46 = vsub.f32 %v6213_v61, %v6272_v20  ;;  %13282 = vst [vmem:[#allocation34_spill] sm:$0xff] %v12396_v60  ;;  %v12398_v18 = vsub.f32 %v6219_v57, %v6290_v37 }
 0x820   : > { %v12315_v14 = vadd.f32 %v12221_v25, %v4720_v39  ;;  %v5905_v33 = vsel %vm1425_vm1, %v5859_v29, 0.0  ;;  %v6215_v25 = vld [vmem:[%s13072_s2 + $0x38] sm:$0xff]  ;;  %v6275_v15 = vand.u32 4294901760, %v6214_v2  ;;  %13276 = vst [vmem:[#allocation21_spill] sm:$0xff] %v12358_v27  ;;  %v13164_v35 = vand.u32 4294901760, %v12358_v27 }
 0x821   : > { %5906 = vadd.xlane.f32.xlu1 %v5905_v33  ;;  %9311 = vmatprep.subr.bf16.mxu1 %v12324_v55  ;;  %v6278_v53 = vand.u32 4294901760, %v6215_v25  ;;  %13277 = vst [vmem:[#allocation22_spill] sm:$0xff] %v12360_v46  ;;  %v13163_v34 = vand.u32 4294901760, %v12360_v46  ;;  %13283 = vst [vmem:[#allocation35_spill] sm:$0xff] %v12398_v18  ;;  %v6540_v29 = vsub.f32 %v12386_v40, %v13159_v13  ;;  %v6534_v39 = vand.u32 4294901760, %v6533_v5 }
 0x822   : > { %9313 = vmatpush3.bf16.msra.mxu1 %v12324_v55  ;;  %v6505_v28 = vsub.f32 %v12358_v27, %v13164_v35  ;;  %v12370_v16 = vsub.f32 %v6214_v2, %v6275_v15  ;;  %v13158_v33 = vand.u32 4294901760, %v12396_v60  ;;  %v13157_v23 = vand.u32 4294901760, %v12398_v18 }
 0x823   : > { %v12334_v17 = vpack.c.bf16 %v6278_v53, %v6275_v15  ;;  %v6512_v47 = vsub.f32 %v12360_v46, %v13163_v34  ;;  %v12372_v21 = vsub.f32 %v6215_v25, %v6278_v53  ;;  %v6541_v61 = vand.u32 4294901760, %v6540_v29 }
 0x824   : > { %13278 = vst [vmem:[#allocation23_spill] sm:$0xff] %v12370_v16  ;;  %v6506_v48 = vand.u32 4294901760, %v6505_v28  ;;  %v13162_v11 = vand.u32 4294901760, %v12370_v16  ;;  %v6547_v20 = vsub.f32 %v12396_v60, %v13158_v33  ;;  %v6554_v2 = vsub.f32 %v12398_v18, %v13157_v23 }
 0x825   : > { %13273 = vst [vmem:[#allocation10_spill] sm:$0xff] %v12334_v17  ;;  %9315 = vmatprep.subr.bf16.mxu1 %v12334_v17  ;;  %13279 = vst [vmem:[#allocation25_spill] sm:$0xff] %v12372_v21  ;;  %v6513_v30 = vand.u32 4294901760, %v6512_v47  ;;  %v13161_v36 = vand.u32 4294901760, %v12372_v21  ;;  %v12411_v15 = vpack.c.bf16 %v6541_v61, %v6534_v39  ;;  %v12421_v23 = vpack.c.bf16 %v12372_v21, %v12370_v16 }
 0x826   : > { %9317 = vmatpush3.bf16.msra.mxu1 %v12334_v17  ;;  %v6519_v32 = vsub.f32 %v12370_v16, %v13162_v11  ;;  %v6548_v53 = vand.u32 4294901760, %v6547_v20  ;;  %v6555_v56 = vand.u32 4294901760, %v6554_v2 }
 0x827   : > { %9319 = vmatprep.subr.bf16.mxu1 %v12344_v22  ;;  %v12376_v4 = vpack.c.bf16 %v6513_v30, %v6506_v48  ;;  %v6526_v52 = vsub.f32 %v12372_v21, %v13161_v36 }
 0x828   : > { %v6520_v51 = vand.u32 4294901760, %v6519_v32  ;;  %v12413_v58 = vpack.c.bf16 %v6555_v56, %v6548_v53  ;;  %v12417_v32 = vpack.c.bf16 %v12360_v46, %v12358_v27 }
 0x829   : > { %v6527_v9 = vand.u32 4294901760, %v6526_v52 }
 0x82a   : > { %9321 = vmatpush3.bf16.msra.mxu1 %v12344_v22 }
 0x82b   : > { %9323 = vmatprep.subr.bf16.mxu1 %v12354_v41  ;;  %v12391_v38 = vpack.c.bf16 %v6527_v9, %v6520_v51 }
 0x82e   : > { %9325 = vmatpush3.bf16.msra.mxu1 %v12354_v41 }
 0x82f   : > { %9327 = vmatprep.subr.bf16.mxu1 %v12376_v4 }
 0x872   : > { %v5862_v7 = vpop.xlane.xlu0 %5861 }
 0x873   : > { %v5908_v25 = vmul.f32 0.125, %v5862_v7 }
 0x875   : > { %v5924_v50 = vrot.slane %v5908_v25, 4 }
 0x876   : > { %v5865_v12 = vpop.xlane.xlu1 %5864 }
 0x877   : > { %v5925_v6 = vmax.f32 %v5908_v25, %v5924_v50  ;;  %v5909_v57 = vmul.f32 0.125, %v5865_v12 }
 0x879   : > { %v5926_v0 = vrot.slane %v5925_v6, 2  ;;  %v5930_v37 = vrot.slane %v5909_v57, 4 }
 0x87a   : > { %v5868_v28 = vpop.xlane.xlu0 %5867 }
 0x87b   : > { %v5927_v47 = vmax.f32 %v5925_v6, %v5926_v0  ;;  %v5931_v48 = vmax.f32 %v5909_v57, %v5930_v37  ;;  %v5910_v30 = vmul.f32 0.125, %v5868_v28 }
 0x87d   : > { %v5928_v52 = vrot.slane %v5927_v47, 1  ;;  %v5932_v51 = vrot.slane %v5931_v48, 2  ;;  %v5936_v9 = vrot.slane %v5910_v30, 4 }
 0x87e   : > { %v5871_v5 = vpop.xlane.xlu1 %5870 }
 0x87f   : > { %v5929_v29 = vmax.f32 %v5927_v47, %v5928_v52  ;;  %v5933_v39 = vmax.f32 %v5931_v48, %v5932_v51  ;;  %v5937_v61 = vmax.f32 %v5910_v30, %v5936_v9  ;;  %v5911_v7 = vmul.f32 0.125, %v5871_v5 }
 0x881   : > { %v6020_v20 = vsub.f32 %v5908_v25, %v5929_v29  ;;  %v5934_v2 = vrot.slane %v5933_v39, 1  ;;  %v5938_v53 = vrot.slane %v5937_v61, 2  ;;  %v5942_v56 = vrot.slane %v5911_v7, 4 }
 0x882   : > { %v5874_v50 = vpop.xlane.xlu0 %5873 }
 0x883   : > { %v6036_v12 = vmul.f32 1.442695, %v6020_v20  ;;  %v5935_v6 = vmax.f32 %v5933_v39, %v5934_v2  ;;  %v5939_v0 = vmax.f32 %v5937_v61, %v5938_v53  ;;  %v5943_v37 = vmax.f32 %v5911_v7, %v5942_v56  ;;  %v12426_v56 = vld [vmem:[%s13073_s3 + $0x8] ss:$0 sm:$0xff] }
 0x884   : > { %v5912_v28 = vmul.f32 0.125, %v5874_v50 }
 0x885   : > { %10027 = vpow2.f32 %v6036_v12  ;;  %v6021_v33 = vsub.f32 %v5909_v57, %v5935_v6  ;;  %v5940_v47 = vrot.slane %v5939_v0, 1  ;;  %v5944_v48 = vrot.slane %v5943_v37, 2 }
 0x886   : > { %v5948_v52 = vrot.slane %v5912_v28, 4  ;;  %v5877_v51 = vpop.xlane.xlu1 %5876 }
 0x887   : > { %v6038_v25 = vmul.f32 1.442695, %v6021_v33  ;;  %v5941_v9 = vmax.f32 %v5939_v0, %v5940_v47  ;;  %v5945_v5 = vmax.f32 %v5943_v37, %v5944_v48  ;;  %v5913_v29 = vmul.f32 0.125, %v5877_v51 }
 0x888   : > { %v5949_v13 = vmax.f32 %v5912_v28, %v5948_v52  ;;  %v12432_v0 = vpack.c.bf16 %v12386_v40, %v12384_v45  ;;  %v12437_v48 = vadd.f32 %v12225_v26, %v12426_v56 }
 0x889   : > { %10029 = vpow2.f32 %v6038_v25  ;;  %v6022_v39 = vsub.f32 %v5910_v30, %v5941_v9  ;;  %v5946_v61 = vrot.slane %v5945_v5, 1  ;;  %v5954_v20 = vrot.slane %v5913_v29, 4 }
 0x88a   : > { %v5950_v2 = vrot.slane %v5949_v13, 2  ;;  %v5880_v53 = vpop.xlane.xlu0 %5879 }
 0x88b   : > { %v6040_v57 = vmul.f32 1.442695, %v6022_v39  ;;  %v5947_v50 = vmax.f32 %v5945_v5, %v5946_v61  ;;  %v5955_v12 = vmax.f32 %v5913_v29, %v5954_v20  ;;  %v12428_v6 = vmul.f32 0.125, %v5880_v53 }
 0x88c   : > { %v5951_v33 = vmax.f32 %v5949_v13, %v5950_v2  ;;  %v12450_v61 = vadd.f32 %v12230_v59, %v12426_v56 }
 0x88d   : > { %10031 = vpow2.f32 %v6040_v57  ;;  %v6023_v30 = vsub.f32 %v5911_v7, %v5947_v50  ;;  %v5956_v37 = vrot.slane %v5955_v12, 2  ;;  %v5960_v47 = vrot.slane %v12428_v6, 4 }
 0x88e   : > { %v5952_v52 = vrot.slane %v5951_v33, 1  ;;  %v5883_v51 = vpop.xlane.xlu1 %5882  ;;  %v12446_v7 = vadd.f32 %v12426_v56, %v12227_v54  ;;  %v12456_v50 = vadd.f32 %v12426_v56, %v12232_v49  ;;  %v12460_v54 = vadd.f32 %v12312_v44, %v12426_v56 }
 0x88f   : > { %v12439_v25 = vpop.eup %10027  ;;  %v6042_v9 = vmul.f32 1.442695, %v6023_v30  ;;  %v5957_v5 = vmax.f32 %v5955_v12, %v5956_v37  ;;  %v5961_v13 = vmax.f32 %v12428_v6, %v5960_v47  ;;  %v12442_v39 = vmul.f32 0.125, %v5883_v51 }
 0x890   : > { %v6068_v26 = vrot.slane %v12439_v25, 4  ;;  %v5953_v20 = vmax.f32 %v5951_v33, %v5952_v52  ;;  %v12471_v44 = vpack.c.bf16 %v12398_v18, %v12396_v60 }
 0x891   : > { %10033 = vpow2.f32 %v6042_v9  ;;  %v5958_v2 = vrot.slane %v5957_v5, 1  ;;  %v5962_v53 = vrot.slane %v5961_v13, 2  ;;  %v5966_v57 = vrot.slane %v12442_v39, 4 }
 0x892   : > { %v6024_v12 = vsub.f32 %v5912_v28, %v5953_v20  ;;  %v5886_v30 = vpop.xlane.xlu0 %5885  ;;  %v6069_v59 = vadd.f32 %v12439_v25, %v6068_v26 }
 0x893   : > { %v12463_v37 = vpop.eup %10029  ;;  %v5959_v33 = vmax.f32 %v5957_v5, %v5958_v2  ;;  %v5963_v47 = vmax.f32 %v5961_v13, %v5962_v53  ;;  %v5967_v52 = vmax.f32 %v12442_v39, %v5966_v57  ;;  %v12466_v51 = vmul.f32 0.125, %v5886_v30 }
 0x894   : > { %v6074_v9 = vrot.slane %v12463_v37, 4  ;;  %v6044_v49 = vmul.f32 1.442695, %v6024_v12  ;;  %v6070_v42 = vrot.slane %v6069_v59, 2  ;;  %v12476_v5 = vadd.f32 %v12315_v14, %v12426_v56 }
 0x895   : > { %v6025_v28 = vsub.f32 %v5913_v29, %v5959_v33  ;;  %v5964_v20 = vrot.slane %v5963_v47, 1  ;;  %v5968_v36 = vrot.slane %v5967_v52, 2  ;;  %v5972_v26 = vrot.slane %v12466_v51, 4 }
 0x896   : > { %v6075_v13 = vadd.f32 %v12463_v37, %v6074_v9  ;;  %10035 = vpow2.f32 %v6044_v49  ;;  %v5889_v2 = vpop.xlane.xlu1 %5888  ;;  %v6071_v53 = vadd.f32 %v6070_v42, %v6069_v59 }
 0x897   : > { %v12479_v57 = vpop.eup %10031  ;;  %v6046_v12 = vmul.f32 1.442695, %v6025_v28  ;;  %v5965_v30 = vmax.f32 %v5963_v47, %v5964_v20  ;;  %v5969_v11 = vmax.f32 %v5967_v52, %v5968_v36  ;;  %v5973_v29 = vmax.f32 %v12466_v51, %v5972_v26 }
 0x898   : > { %v6076_v33 = vrot.slane %v6075_v13, 2  ;;  %v6080_v34 = vrot.slane %v12479_v57, 4  ;;  %v12483_v35 = vmul.f32 0.125, %v5889_v2  ;;  %v6072_v18 = vrot.slane %v6071_v53, 1 }
 0x899   : > { %10037 = vpow2.f32 %v6046_v12  ;;  %v6026_v14 = vsub.f32 %v12428_v6, %v5965_v30  ;;  %v5970_v9 = vrot.slane %v5969_v11, 1  ;;  %v5974_v49 = vrot.slane %v5973_v29, 2 }
 0x89a   : > { %v6077_v60 = vadd.f32 %v6076_v33, %v6075_v13  ;;  %v5978_v42 = vrot.slane %v12483_v35, 4  ;;  %v5892_v59 = vpop.xlane.xlu0 %5891  ;;  %v6073_v28 = vadd.f32 %v6072_v18, %v6071_v53  ;;  %v6081_v36 = vadd.f32 %v12479_v57, %v6080_v34 }
 0x89b   : > { %v12488_v47 = vpop.eup %10033  ;;  %v6048_v52 = vmul.f32 1.442695, %v6026_v14  ;;  %v5971_v20 = vmax.f32 %v5969_v11, %v5970_v9  ;;  %v5975_v26 = vmax.f32 %v5973_v29, %v5974_v49  ;;  %v12490_v2 = vmul.f32 0.125, %v5892_v59 }
 0x89c   : > { %v6078_v40 = vrot.slane %v6077_v60, 1  ;;  %v6086_v12 = vrot.slane %v12488_v47, 4  ;;  %v5979_v6 = vmax.f32 %v12483_v35, %v5978_v42  ;;  %10039 = vrcp.f32 %v6073_v28 }
 0x89d   : > { %10041 = vpow2.f32 %v6048_v52  ;;  %v6027_v13 = vsub.f32 %v12442_v39, %v5971_v20  ;;  %v5976_v30 = vrot.slane %v5975_v26, 1  ;;  %v5984_v18 = vrot.slane %v12490_v2, 4 }
 0x89e   : > { %v5980_v34 = vrot.slane %v5979_v6, 2  ;;  %v5895_v53 = vpop.xlane.xlu1 %5894  ;;  %v6079_v33 = vadd.f32 %v6078_v40, %v6077_v60  ;;  %v6082_v14 = vrot.slane %v6081_v36, 2  ;;  %v6087_v11 = vadd.f32 %v12488_v47, %v6086_v12 }
 0x89f   : > { %v6050_v29 = vmul.f32 1.442695, %v6027_v13  ;;  %v5977_v9 = vmax.f32 %v5975_v26, %v5976_v30  ;;  %v5985_v49 = vmax.f32 %v12490_v2, %v5984_v18  ;;  %v12498_v59 = vmul.f32 0.125, %v5895_v53 }
 0x8a0   : > { %v12500_v42 = vpop.eup %10035  ;;  %v5981_v28 = vmax.f32 %v5979_v6, %v5980_v34  ;;  %10043 = vrcp.f32 %v6079_v33  ;;  %v6083_v39 = vadd.f32 %v6082_v14, %v6081_v36  ;;  %v6088_v52 = vrot.slane %v6087_v11, 2 }
 0x8a1   : > { %v6092_v20 = vrot.slane %v12500_v42, 4  ;;  %10045 = vpow2.f32 %v6050_v29  ;;  %v6028_v40 = vsub.f32 %v12466_v51, %v5977_v9  ;;  %v5986_v60 = vrot.slane %v5985_v49, 2 }
 0x8a2   : > { %v5982_v45 = vrot.slane %v5981_v28, 1  ;;  %v5990_v12 = vrot.slane %v12498_v59, 4  ;;  %v5898_v26 = vpop.xlane.xlu0 %5897  ;;  %v6084_v13 = vrot.slane %v6083_v39, 1  ;;  %v6089_v30 = vadd.f32 %v6088_v52, %v6087_v11 }
 0x8a3   : > { %v12505_v18 = vpop.eup %10037  ;;  %v6052_v53 = vmul.f32 1.442695, %v6028_v40  ;;  %v5987_v21 = vmax.f32 %v5985_v49, %v5986_v60  ;;  %v12507_v6 = vmul.f32 0.125, %v5898_v26  ;;  %v6093_v36 = vadd.f32 %v12500_v42, %v6092_v20 }
 0x8a4   : > { %v6098_v34 = vrot.slane %v12505_v18, 4  ;;  %v5983_v33 = vmax.f32 %v5981_v28, %v5982_v45  ;;  %v5991_v51 = vmax.f32 %v12498_v59, %v5990_v12  ;;  %v6085_v14 = vadd.f32 %v6084_v13, %v6083_v39 }
 0x8a5   : > { %10047 = vpow2.f32 %v6052_v53  ;;  %v5988_v29 = vrot.slane %v5987_v21, 1  ;;  %v5996_v9 = vrot.slane %v12507_v6, 4  ;;  %v6090_v16 = vrot.slane %v6089_v30, 1 }
 0x8a6   : > { %v10040_v11 = vpop.eup %10039  ;;  %v6029_v52 = vsub.f32 %v12483_v35, %v5983_v33  ;;  %v5992_v40 = vrot.slane %v5991_v51, 2  ;;  %v5901_v49 = vpop.xlane.xlu1 %5900  ;;  %10049 = vrcp.f32 %v6085_v14  ;;  %v6094_v60 = vrot.slane %v6093_v36, 2 }
 0x8a7   : > { %v12514_v26 = vpop.eup %10041  ;;  %v5989_v20 = vmax.f32 %v5987_v21, %v5988_v29  ;;  %v5997_v45 = vmax.f32 %v12507_v6, %v5996_v9  ;;  %v12517_v28 = vmul.f32 0.125, %v5901_v49  ;;  %v6165_v39 = vmul.f32 %v10040_v11, %v12439_v25 }
 0x8a8   : > { %v6104_v12 = vrot.slane %v12514_v26, 4  ;;  %v6054_v13 = vmul.f32 1.442695, %v6029_v52  ;;  %v5993_v53 = vmax.f32 %v5991_v51, %v5992_v40  ;;  %v6091_v46 = vadd.f32 %v6090_v16, %v6089_v30 }
 0x8a9   : > { %v6030_v35 = vsub.f32 %v12490_v2, %v5989_v20  ;;  %v5998_v33 = vrot.slane %v5997_v45, 2  ;;  %v6002_v14 = vrot.slane %v12517_v28, 4  ;;  %v6196_v27 = vmul.f32 %v6165_v39, %v12476_v5 }
 0x8aa   : > { %v10044_v41 = vpop.eup %10043  ;;  %10051 = vpow2.f32 %v6054_v13  ;;  %v5994_v21 = vrot.slane %v5993_v53, 1  ;;  %v5904_v29 = vpop.xlane.xlu0 %5903  ;;  %v6095_v9 = vadd.f32 %v6094_v60, %v6093_v36  ;;  %v12525_v49 = vadd.f32 %v12505_v18, %v6098_v34 }
 0x8ab   : > { %v12527_v25 = vpop.eup %10045  ;;  %v6056_v11 = vmul.f32 1.442695, %v6030_v35  ;;  %v5999_v51 = vmax.f32 %v5997_v45, %v5998_v33  ;;  %v6003_v16 = vmax.f32 %v12517_v28, %v6002_v14  ;;  %v12530_v2 = vmul.f32 0.125, %v5904_v29 }
 0x8ac   : > { %v5995_v52 = vmax.f32 %v5993_v53, %v5994_v21  ;;  %v6221_v5 = vsel %vm1425_vm1, %v6196_v27, 0  ;;  %v6167_v40 = vmul.f32 %v10044_v41, %v12463_v37 }
 0x8ad   : > { %10053 = vpow2.f32 %v6056_v11  ;;  %v6000_v36 = vrot.slane %v5999_v51, 1  ;;  %v6004_v60 = vrot.slane %v6003_v16, 2  ;;  %v6008_v34 = vrot.slane %v12530_v2, 4 }
 0x8ae   : > { %v6031_v20 = vsub.f32 %v12498_v59, %v5995_v52  ;;  %v5907_v39 = vpop.xlane.xlu1 %5906  ;;  %v12537_v45 = vand.u32 4294901760, %v6221_v5  ;;  %v6197_v13 = vmul.f32 %v6167_v40, %v12460_v54  ;;  %10055 = vrcp.f32 %v6091_v46 }
 0x8af   : > { %v12540_v35 = vpop.eup %10047  ;;  %v6001_v53 = vmax.f32 %v5999_v51, %v6000_v36  ;;  %v6005_v33 = vmax.f32 %v6003_v16, %v6004_v60  ;;  %v6009_v27 = vmax.f32 %v12530_v2, %v6008_v34  ;;  %v12543_v41 = vmul.f32 0.125, %v5907_v39 }
 0x8b0   : > { %v10050_v37 = vpop.eup %10049  ;;  %v6116_v14 = vrot.slane %v12540_v35, 4  ;;  %v6058_v21 = vmul.f32 1.442695, %v6031_v20  ;;  %v12547_v59 = vsub.f32 %v6221_v5, %v12537_v45  ;;  %v6224_v29 = vsel %vm1425_vm1, %v6197_v13, 0 }
 0x8b1   : > { %v6032_v54 = vsub.f32 %v12507_v6, %v6001_v53  ;;  %v6006_v46 = vrot.slane %v6005_v33, 1  ;;  %v6010_v11 = vrot.slane %v6009_v27, 2  ;;  %v6014_v51 = vrot.slane %v12543_v41, 4 }
 0x8b2   : > { %10057 = vpow2.f32 %v6058_v21  ;;  %v13175_v16 = vand.u32 4294901760, %v12547_v59  ;;  %v12553_v52 = vand.u32 4294901760, %v6224_v29  ;;  %v6169_v40 = vmul.f32 %v10050_v37, %v12479_v57 }
 0x8b3   : > { %v6060_v36 = vmul.f32 1.442695, %v6032_v54  ;;  %v6007_v60 = vmax.f32 %v6005_v33, %v6006_v46  ;;  %v6011_v34 = vmax.f32 %v6009_v27, %v6010_v11  ;;  %v6015_v5 = vmax.f32 %v12543_v41, %v6014_v51 }
 0x8b4   : > { %v12557_v20 = vpop.eup %10051  ;;  %v6344_v6 = vsub.f32 %v12547_v59, %v13175_v16  ;;  %v12563_v39 = vsub.f32 %v6224_v29, %v12553_v52  ;;  %v6198_v13 = vmul.f32 %v6169_v40, %v12446_v7  ;;  %v6096_v53 = vrot.slane %v6095_v9, 1 }
 0x8b5   : > { %v6122_v21 = vrot.slane %v12557_v20, 4  ;;  %10059 = vpow2.f32 %v6060_v36  ;;  %v6033_v57 = vsub.f32 %v12517_v28, %v6007_v60  ;;  %v6012_v33 = vrot.slane %v6011_v34, 1 }
 0x8b6   : > { %v6016_v27 = vrot.slane %v6015_v5, 2  ;;  %v6345_v37 = vand.u32 4294901760, %v6344_v6  ;;  %v13177_v54 = vand.u32 4294901760, %v12563_v39  ;;  %v6227_v46 = vsel %vm1425_vm1, %v6198_v13, 0 }
 0x8b7   : > { %v12570_v11 = vpop.eup %10053  ;;  %v6062_v51 = vmul.f32 1.442695, %v6033_v57  ;;  %v6013_v29 = vmax.f32 %v6011_v34, %v6012_v33  ;;  %v12572_v16 = vand.u32 4294901760, %v6227_v46  ;;  %v6097_v7 = vadd.f32 %v6096_v53, %v6095_v9 }
 0x8b8   : > { %v10056_v40 = vpop.eup %10055  ;;  %v6128_v30 = vrot.slane %v12570_v11, 4  ;;  %v6017_v36 = vmax.f32 %v6015_v5, %v6016_v27  ;;  %8846 = vmatprep.mubr.f32.mxu1 %v6345_v37  ;;  %v6354_v28 = vsub.f32 %v12563_v39, %v13177_v54  ;;  %v6100_v60 = vrot.slane %v12525_v49, 2 }
 0x8b9   : > { %10061 = vpow2.f32 %v6062_v51  ;;  %v6034_v6 = vsub.f32 %v12530_v2, %v6013_v29  ;;  %v12581_v13 = vsub.f32 %v6227_v46, %v12572_v16  ;;  %v6171_v34 = vmul.f32 %v10056_v40, %v12488_v47 }
 0x8ba   : > { %v6018_v9 = vrot.slane %v6017_v36, 1  ;;  %v6355_v53 = vand.u32 4294901760, %v6354_v28  ;;  %10063 = vrcp.f32 %v6097_v7  ;;  %v6101_v5 = vadd.f32 %v6100_v60, %v12525_v49 }
 0x8bb   : > { %v6064_v57 = vmul.f32 1.442695, %v6034_v6  ;;  %v13176_v33 = vand.u32 4294901760, %v12581_v13  ;;  %v6199_v27 = vmul.f32 %v6171_v34, %v12437_v48  ;;  %v6105_v37 = vadd.f32 %v12514_v26, %v6104_v12 }
 0x8bc   : > { %v12590_v2 = vpop.eup %10057  ;;  %v6019_v46 = vmax.f32 %v6017_v36, %v6018_v9  ;;  %8847 = vmatmul.mubr.f32.vlgmr.msra.gmra.mrb[32].mxu1 %v6355_v53  ;;  %v6102_v51 = vrot.slane %v6101_v5, 1  ;;  %v13284_v47 = vrot.slane %v12527_v25, 4  ;;  %v6117_v49 = vadd.f32 %v12540_v35, %v6116_v14 }
 0x8bd   : > { %v6134_v7 = vrot.slane %v12590_v2, 4  ;;  %10065 = vpow2.f32 %v6064_v57  ;;  %v6364_v48 = vsub.f32 %v12581_v13, %v13176_v33  ;;  %v6230_v12 = vsel %vm1425_vm1, %v6199_v27, 0  ;;  %9329 = vmatpush3.bf16.msra.mxu1 %v12376_v4 }
 0x8be   : > { %v6111_v29 = vadd.f32 %v12527_v25, %v13284_v47  ;;  %v6035_v40 = vsub.f32 %v12543_v41, %v6019_v46  ;;  %v12603_v36 = vand.u32 4294901760, %v6230_v12  ;;  %v6103_v28 = vadd.f32 %v6102_v51, %v6101_v5  ;;  %9331 = vmatprep.subr.bf16.mxu1 %v12391_v38 }
 0x8bf   : > { %v6106_v60 = vrot.slane %v6105_v37, 2  ;;  %v12606_v14 = vpop.eup %10059  ;;  %v6365_v6 = vand.u32 4294901760, %v6364_v48  ;;  %v6118_v9 = vrot.slane %v6117_v49, 2  ;;  %v6123_v53 = vadd.f32 %v12557_v20, %v6122_v21 }
 0x8c0   : > { %v6112_v34 = vrot.slane %v6111_v29, 2  ;;  %v6140_v57 = vrot.slane %v12606_v14, 4  ;;  %v6066_v27 = vmul.f32 1.442695, %v6035_v40  ;;  %v12611_v4 = vsub.f32 %v6230_v12, %v12603_v36 }
 0x8c1   : > { %10067 = vrcp.f32 %v6103_v28  ;;  %8849 = vmatprep.mubr.f32.mxu1 %v6365_v6  ;;  %v6107_v41 = vadd.f32 %v6106_v60, %v6105_v37  ;;  %v6119_v46 = vadd.f32 %v6118_v9, %v6117_v49  ;;  %v6124_v51 = vrot.slane %v6123_v53, 2  ;;  %9333 = vmatpush3.bf16.msra.mxu1 %v12391_v38 }
 0x8c2   : > { %v6113_v5 = vadd.f32 %v6112_v34, %v6111_v29  ;;  %10069 = vpow2.f32 %v6066_v27  ;;  %v13182_v47 = vand.u32 4294901760, %v12611_v4  ;;  %v6129_v48 = vadd.f32 %v12570_v11, %v6128_v30  ;;  %9335 = vmatprep.subr.bf16.mxu1 %v12411_v15 }
 0x8c3   : > { %v6135_v21 = vadd.f32 %v12590_v2, %v6134_v7  ;;  %v12618_v40 = vpop.eup %10061  ;;  %v6108_v12 = vrot.slane %v6107_v41, 1  ;;  %v6120_v6 = vrot.slane %v6119_v46, 1  ;;  %v6125_v37 = vadd.f32 %v6124_v51, %v6123_v53 }
 0x8c4   : > { %v6114_v28 = vrot.slane %v6113_v5, 1  ;;  %v10064_v29 = vpop.eup %10063  ;;  %v6146_v49 = vrot.slane %v12618_v40, 4  ;;  %v6374_v38 = vsub.f32 %v12611_v4, %v13182_v47  ;;  %v6130_v60 = vrot.slane %v6129_v48, 2 }
 0x8c5   : > { %v6136_v34 = vrot.slane %v6135_v21, 2  ;;  %v6173_v30 = vmul.f32 %v10064_v29, %v12500_v42  ;;  %v6109_v7 = vadd.f32 %v6108_v12, %v6107_v41  ;;  %v6121_v27 = vadd.f32 %v6120_v6, %v6119_v46  ;;  %9337 = vmatpush3.bf16.msra.mxu1 %v12411_v15 }
 0x8c6   : > { %v6115_v9 = vadd.f32 %v6114_v28, %v6113_v5  ;;  %v6375_v33 = vand.u32 4294901760, %v6374_v38  ;;  %v6126_v54 = vrot.slane %v6125_v37, 1  ;;  %v6131_v22 = vadd.f32 %v6130_v60, %v6129_v48  ;;  %9339 = vmatprep.subr.bf16.mxu1 %v12413_v58 }
 0x8c7   : > { %v6137_v53 = vadd.f32 %v6136_v34, %v6135_v21  ;;  %v12627_v51 = vpop.eup %10065  ;;  %v6200_v17 = vmul.f32 %v6173_v30, %v12456_v50  ;;  %10071 = vrcp.f32 %v6109_v7  ;;  %v6141_v47 = vadd.f32 %v12606_v14, %v6140_v57 }
 0x8c8   : > { %v6147_v42 = vadd.f32 %v12618_v40, %v6146_v49  ;;  %v6152_v41 = vrot.slane %v12627_v51, 4  ;;  %8850 = vmatmul.mubr.f32.gmra.mrb[34].mxu1 %v6375_v33  ;;  %10073 = vrcp.f32 %v6115_v9  ;;  %v6127_v15 = vadd.f32 %v6126_v54, %v6125_v37 }
 0x8c9   : > { %v6132_v5 = vrot.slane %v6131_v22, 1  ;;  %v6233_v46 = vsel %vm1425_vm1, %v6200_v17, 0  ;;  %10075 = vrcp.f32 %v6121_v27  ;;  %v6138_v48 = vrot.slane %v6137_v53, 1  ;;  %9341 = vmatpush3.bf16.msra.mxu1 %v12413_v58 }
 0x8ca   : > { %v6142_v21 = vrot.slane %v6141_v47, 2  ;;  %v12635_v50 = vand.u32 4294901760, %v6233_v46  ;;  %10077 = vrcp.f32 %v6127_v15  ;;  %v6148_v28 = vrot.slane %v6147_v42, 2  ;;  %9343 = vmatprep.subr.bf16.mxu1 %v12417_v32 }
 0x8cb   : > { %v10068_v12 = vpop.eup %10067  ;;  %v6133_v57 = vadd.f32 %v6132_v5, %v6131_v22  ;;  %v6139_v6 = vadd.f32 %v6138_v48, %v6137_v53  ;;  %v6153_v37 = vadd.f32 %v12627_v51, %v6152_v41  ;;  %v5835_v29 = vadd.f32 %v12234_v63, %v12426_v56 }
 0x8cc   : > { %v6175_v33 = vmul.f32 %v10068_v12, %v12505_v18  ;;  %v6143_v54 = vadd.f32 %v6142_v21, %v6141_v47  ;;  %v12640_v17 = vpop.eup %10069  ;;  %v12645_v58 = vsub.f32 %v6233_v46, %v12635_v50  ;;  %v6149_v49 = vadd.f32 %v6148_v28, %v6147_v42 }
 0x8cd   : > { %10079 = vrcp.f32 %v6133_v57  ;;  %v6158_v22 = vrot.slane %v12640_v17, 4  ;;  %v5834_v47 = vadd.f32 %v12426_v56, %v12236_v3  ;;  %v6154_v30 = vrot.slane %v6153_v37, 2 }
 0x8ce   : > { %v6201_v38 = vmul.f32 %v6175_v33, %v12450_v61  ;;  %10081 = vrcp.f32 %v6139_v6  ;;  %v6144_v18 = vrot.slane %v6143_v54, 1  ;;  %v6383_v60 = vand.u32 4294901760, %v12645_v58 }
 0x8cf   : > { %v6150_v34 = vrot.slane %v6149_v49, 1  ;;  %v5837_v63 = vadd.f32 %v12238_v19, %v12426_v56  ;;  %v6159_v27 = vadd.f32 %v12640_v17, %v6158_v22  ;;  %v6155_v3 = vadd.f32 %v6154_v30, %v6153_v37 }
 0x8d0   : > { %v6236_v7 = vsel %vm1425_vm1, %v6201_v38, 0  ;;  %v6145_v9 = vadd.f32 %v6144_v18, %v6143_v54  ;;  %v6384_v61 = vsub.f32 %v12645_v58, %v6383_v60  ;;  %v5836_v15 = vadd.f32 %v12426_v56, %v12240_v24 }
 0x8d1   : > { %v12659_v53 = vand.u32 4294901760, %v6236_v7  ;;  %v6151_v42 = vadd.f32 %v6150_v34, %v6149_v49  ;;  %v10072_v41 = vpop.eup %10071  ;;  %v5839_v19 = vadd.f32 %v12242_v62, %v12426_v56  ;;  %v6160_v5 = vrot.slane %v6159_v27, 2 }
 0x8d2   : > { %10083 = vrcp.f32 %v6145_v9  ;;  %v10074_v46 = vpop.eup %10073  ;;  %v6385_v48 = vand.u32 4294901760, %v6384_v61  ;;  %v6177_v12 = vmul.f32 %v10072_v41, %v12514_v26  ;;  %v5838_v28 = vadd.f32 %v12426_v56, %v12244_v10 }
 0x8d3   : > { %v12666_v21 = vsub.f32 %v6236_v7, %v12659_v53  ;;  %10085 = vrcp.f32 %v6151_v42  ;;  %v10076_v57 = vpop.eup %10075  ;;  %v6179_v33 = vmul.f32 %v10074_v46, %v12527_v25  ;;  %v6156_v24 = vrot.slane %v6155_v3, 1 }
 0x8d4   : > { %v6161_v6 = vadd.f32 %v6160_v5, %v6159_v27  ;;  %v10078_v54 = vpop.eup %10077  ;;  %v5841_v62 = vadd.f32 %v12246_v1, %v12426_v56  ;;  %8852 = vmatprep.mubr.f32.mxu1 %v6385_v48  ;;  %v6202_v49 = vmul.f32 %v6177_v12, %v5834_v47  ;;  %v6181_v22 = vmul.f32 %v10076_v57, %v12540_v35 }
 0x8d5   : > { %v6393_v37 = vand.u32 4294901760, %v12666_v21  ;;  %v5840_v26 = vadd.f32 %v12426_v56, %v12248_v8  ;;  %v6203_v38 = vmul.f32 %v6179_v33, %v5835_v29  ;;  %v6183_v10 = vmul.f32 %v10078_v54, %v12557_v20 }
 0x8d6   : > { %v6157_v18 = vadd.f32 %v6156_v24, %v6155_v3  ;;  %v6239_v1 = vsel %vm1425_vm1, %v6202_v49, 0  ;;  %v6204_v30 = vmul.f32 %v6181_v22, %v5836_v15  ;;  %v6162_v7 = vrot.slane %v6161_v6, 1 }
 0x8d7   : > { %v10080_v25 = vpop.eup %10079  ;;  %v6394_v34 = vsub.f32 %v12666_v21, %v6393_v37  ;;  %v12683_v47 = vand.u32 4294901760, %v6239_v1  ;;  %v6242_v35 = vsel %vm1425_vm1, %v6203_v38, 0  ;;  %v6205_v27 = vmul.f32 %v6183_v10, %v5837_v63 }
 0x8d8   : > { %v10082_v9 = vpop.eup %10081  ;;  %v6185_v8 = vmul.f32 %v10080_v25, %v12570_v11  ;;  %v12687_v20 = vand.u32 4294901760, %v6242_v35  ;;  %v6245_v61 = vsel %vm1425_vm1, %v6204_v30, 0  ;;  %10087 = vrcp.f32 %v6157_v18 }
 0x8d9   : > { %v6395_v29 = vand.u32 4294901760, %v6394_v34  ;;  %v6187_v42 = vmul.f32 %v10082_v9, %v12590_v2  ;;  %v12692_v3 = vsub.f32 %v6239_v1, %v12683_v47  ;;  %v12694_v41 = vand.u32 4294901760, %v6245_v61 }
 0x8da   : > { %v6248_v15 = vsel %vm1425_vm1, %v6205_v27, 0  ;;  %v6206_v5 = vmul.f32 %v6185_v8, %v5838_v28  ;;  %v12698_v63 = vsub.f32 %v6242_v35, %v12687_v20  ;;  %v6163_v33 = vadd.f32 %v6162_v7, %v6161_v6 }
 0x8db   : > { %8853 = vmatmul.mubr.f32.gmra.mrb[36].mxu1 %v6395_v29  ;;  %v12700_v11 = vand.u32 4294901760, %v6248_v15  ;;  %v6207_v46 = vmul.f32 %v6187_v42, %v5839_v19  ;;  %v6403_v12 = vand.u32 4294901760, %v12692_v3  ;;  %v12704_v2 = vsub.f32 %v6245_v61, %v12694_v41 }
 0x8dc   : > { %v10084_v48 = vpop.eup %10083  ;;  %v6251_v57 = vsel %vm1425_vm1, %v6206_v5, 0  ;;  %v6413_v28 = vand.u32 4294901760, %v12698_v63  ;;  %10089 = vrcp.f32 %v6163_v33 }
 0x8dd   : > { %v10086_v24 = vpop.eup %10085  ;;  %v12709_v54 = vsub.f32 %v6248_v15, %v12700_v11  ;;  %v12711_v49 = vand.u32 4294901760, %v6251_v57  ;;  %v6254_v19 = vsel %vm1425_vm1, %v6207_v46, 0  ;;  %v6404_v22 = vsub.f32 %v12692_v3, %v6403_v12 }
 0x8de   : > { %v6423_v38 = vand.u32 4294901760, %v12704_v2  ;;  %v12718_v10 = vand.u32 4294901760, %v6254_v19  ;;  %v6189_v6 = vmul.f32 %v10084_v48, %v12606_v14  ;;  %v6414_v18 = vsub.f32 %v12698_v63, %v6413_v28 }
 0x8df   : > { %v6433_v25 = vand.u32 4294901760, %v12709_v54  ;;  %v12726_v34 = vsub.f32 %v6251_v57, %v12711_v49  ;;  %v6191_v1 = vmul.f32 %v10086_v24, %v12618_v40  ;;  %v6405_v30 = vand.u32 4294901760, %v6404_v22 }
 0x8e0   : > { %v6424_v7 = vsub.f32 %v12704_v2, %v6423_v38  ;;  %v12733_v9 = vsub.f32 %v6254_v19, %v12718_v10  ;;  %v6208_v14 = vmul.f32 %v6189_v6, %v5840_v26  ;;  %v6415_v35 = vand.u32 4294901760, %v6414_v18 }
 0x8e1   : > { %v6434_v27 = vsub.f32 %v12709_v54, %v6433_v25  ;;  %v6443_v8 = vand.u32 4294901760, %v12726_v34  ;;  %v6209_v29 = vmul.f32 %v6191_v1, %v5841_v62  ;;  %8855 = vmatprep.mubr.f32.mxu1 %v6405_v30  ;;  %v5842_v19 = vadd.f32 %v12426_v56, %v12252_v43 }
 0x8e2   : > { %v6425_v61 = vand.u32 4294901760, %v6424_v7  ;;  %v6453_v40 = vand.u32 4294901760, %v12733_v9  ;;  %v6257_v42 = vsel %vm1425_vm1, %v6208_v14, 0  ;;  %8856 = vmatmul.mubr.f32.gmra.mrb[38].mxu1 %v6415_v35  ;;  %v10088_v57 = vpop.eup %10087 }
 0x8e3   : > { %v6435_v15 = vand.u32 4294901760, %v6434_v27  ;;  %v6444_v26 = vsub.f32 %v12726_v34, %v6443_v8  ;;  %v12744_v5 = vand.u32 4294901760, %v6257_v42  ;;  %v6260_v46 = vsel %vm1425_vm1, %v6209_v29, 0 }
 0x8e4   : > { %8858 = vmatprep.mubr.f32.mxu1 %v6425_v61  ;;  %v6454_v62 = vsub.f32 %v12733_v9, %v6453_v40  ;;  %v12750_v48 = vand.u32 4294901760, %v6260_v46  ;;  %v6193_v6 = vmul.f32 %v10088_v57, %v12627_v51 }
 0x8e5   : > { %v6445_v24 = vand.u32 4294901760, %v6444_v26  ;;  %v12753_v33 = vsub.f32 %v6257_v42, %v12744_v5  ;;  %v5843_v42 = vadd.f32 %v12250_v31, %v12426_v56 }
 0x8e6   : > { %v12758_v22 = vsub.f32 %v6260_v46, %v12750_v48  ;;  %8859 = vmatmul.mubr.f32.gmra.mrb[40].mxu1 %v6435_v15  ;;  %v6455_v18 = vand.u32 4294901760, %v6454_v62  ;;  %v6210_v7 = vmul.f32 %v6193_v6, %v5842_v19  ;;  %v10090_v29 = vpop.eup %10089 }
 0x8e7   : > { %v6463_v1 = vand.u32 4294901760, %v12753_v33  ;;  %8861 = vmatprep.mubr.f32.mxu1 %v6445_v24  ;;  %v6195_v26 = vmul.f32 %v10090_v29, %v12640_v17  ;;  %v13293_v29 = vld [vmem:[#allocation23_spill] sm:$0xff] }
 0x8e8   : > { %v6473_v30 = vand.u32 4294901760, %v12758_v22  ;;  %v6263_v35 = vsel %vm1425_vm1, %v6210_v7, 0 }
 0x8e9   : > { %v6464_v14 = vsub.f32 %v12753_v33, %v6463_v1  ;;  %v12770_v27 = vand.u32 4294901760, %v6263_v35  ;;  %v6211_v62 = vmul.f32 %v6195_v26, %v5843_v42  ;;  %v13295_v42 = vld [vmem:[#allocation25_spill] sm:$0xff] }
 0x8ea   : > { %v6474_v43 = vsub.f32 %v12758_v22, %v6473_v30  ;;  %8862 = vmatmul.mubr.f32.gmra.mrb[42].mxu1 %v6455_v18  ;;  %v13296_v26 = vand.u32 4294901760, %v13295_v42 }
 0x8eb   : > { %v6465_v51 = vand.u32 4294901760, %v6464_v14  ;;  %v12775_v15 = vsub.f32 %v6263_v35, %v12770_v27  ;;  %v6266_v24 = vsel %vm1425_vm1, %v6211_v62, 0  ;;  %v13290_v14 = vld [vmem:[#allocation22_spill] sm:$0xff] }
 0x8ec   : > { %v6475_v61 = vand.u32 4294901760, %v6474_v43  ;;  %v12783_v19 = vand.u32 4294901760, %v6266_v24  ;;  %v13291_v43 = vand.u32 4294901760, %v13290_v14 }
 0x8ed   : > { %8864 = vmatprep.mubr.f32.mxu1 %v6465_v51  ;;  %v6483_v46 = vand.u32 4294901760, %v12775_v15  ;;  %v13292_v51 = vand.u32 4294901760, %v12547_v59 }
 0x8ee   : > { %8865 = vmatmul.mubr.f32.gmra.mrb[44].mxu1 %v6475_v61  ;;  %v12786_v31 = vsub.f32 %v6266_v24, %v12783_v19  ;;  %v13294_v61 = vand.u32 4294901760, %v13293_v29  ;;  %v13298_v24 = vand.u32 4294901760, %v12581_v13 }
 0x8ef   : > { %v6484_v57 = vsub.f32 %v12775_v15, %v6483_v46 }
 0x8f0   : > { %v6493_v56 = vand.u32 4294901760, %v12786_v31  ;;  %v9378_v62 = vpack.c.bf16 %v13296_v26, %v13294_v61 }
 0x8f1   : > { %v6485_v6 = vand.u32 4294901760, %v6484_v57  ;;  %v13297_v57 = vand.u32 4294901760, %v12563_v39 }
 0x8f2   : > { %v6494_v17 = vsub.f32 %v12786_v31, %v6493_v56 }
 0x8f3   : > { %8867 = vmatprep.mubr.f32.mxu1 %v6485_v6  ;;  %v13299_v6 = vld [vmem:[#allocation29_spill] sm:$0xff] }
 0x8f4   : > { %v6495_v18 = vand.u32 4294901760, %v6494_v17  ;;  %v13300_v17 = vand.u32 4294901760, %v13299_v6  ;;  %v13316_v6 = vld [vmem:[#allocation24_spill] sm:$0xff] }
 0x8f6   : > { %8868 = vmatmul.mubr.f32.gmra.mrb[46].mxu1 %v6495_v18  ;;  %v13301_v18 = vld [vmem:[#allocation32_spill] sm:$0xff] }
 0x8f7   : > { %8886 = vmatprep.mubr.f32.mxu1 %v12537_v45 }
 0x8fa   : > { %8887 = vmatmul.mubr.f32.vlgmr.msra.gmra.mrb[32].mxu1 %v12553_v52 }
 0x8fb   : > { %9345 = vmatpush3.bf16.msra.mxu1 %v12417_v32  ;;  %8889 = vmatprep.mubr.f32.mxu1 %v12572_v16  ;;  %v13286_v32 = vld [vmem:[#allocation19_spill] sm:$0xff] }
 0x8fc   : > { %9347 = vmatprep.subr.bf16.mxu1 %v12421_v23 }
 0x8fe   : > { %8890 = vmatmul.mubr.f32.gmra.mrb[34].mxu1 %v12603_v36 }
 0x8ff   : > { %8892 = vmatprep.mubr.f32.mxu1 %v12635_v50  ;;  %9349 = vmatpush3.bf16.msra.mxu1 %v12421_v23  ;;  %v13285_v23 = vld [vmem:[#allocation10_spill] sm:$0xff] }
 0x900   : > { %9351 = vmatprep.subr.bf16.mxu1 %v12432_v0 }
 0x902   : > { %8893 = vmatmul.mubr.f32.gmra.mrb[36].mxu1 %v12659_v53 }
 0x903   : > { %8895 = vmatprep.mubr.f32.mxu1 %v12683_v47  ;;  %9353 = vmatpush3.bf16.msra.mxu1 %v12432_v0  ;;  %v13287_v0 = vld [vmem:[#allocation13_spill] sm:$0xff] }
 0x904   : > { %9355 = vmatprep.subr.bf16.mxu1 %v12471_v44 }
 0x906   : > { %8896 = vmatmul.mubr.f32.gmra.mrb[38].mxu1 %v12687_v20 }
 0x907   : > { %8898 = vmatprep.mubr.f32.mxu1 %v12694_v41  ;;  %9357 = vmatpush3.bf16.msra.mxu1 %v12471_v44  ;;  %v13288_v44 = vld [vmem:[#allocation21_spill] sm:$0xff] }
 0x908   : > { %9359 = vmatprep.subr.bf16.mxu1 %v12324_v55  ;;  %v13289_v7 = vand.u32 4294901760, %v13288_v44  ;;  %v13302_v44 = vand.u32 4294901760, %v13301_v18 }
 0x90a   : > { %8899 = vmatmul.mubr.f32.gmra.mrb[40].mxu1 %v12700_v11  ;;  %v9374_v35 = vpack.c.bf16 %v13291_v43, %v13289_v7  ;;  %v9382_v7 = vpack.c.bf16 %v13302_v44, %v13300_v17  ;;  %v13306_v43 = vld [vmem:[#allocation35_spill] sm:$0xff] }
 0x90b   : > { %8901 = vmatprep.mubr.f32.mxu1 %v12711_v49 }
 0x90e   : > { %8902 = vmatmul.mubr.f32.gmra.mrb[42].mxu1 %v12718_v10 }
 0x90f   : > { %8904 = vmatprep.mubr.f32.mxu1 %v12744_v5 }
 0x912   : > { %8905 = vmatmul.mubr.f32.gmra.mrb[44].mxu1 %v12750_v48 }
 0x913   : > { %8907 = vmatprep.mubr.f32.mxu1 %v12770_v27 }
 0x916   : > { %8908 = vmatmul.mubr.f32.gmra.mrb[46].mxu1 %v12783_v19 }
 0x917   : > { %8926 = vmatprep.mubr.f32.mxu1 %v12547_v59  ;;  %v13303_v59 = vand.u32 4294901760, %v12611_v4 }
 0x91a   : > { %8927 = vmatmul.mubr.f32.vlgmr.msra.gmra.mrb[32].mxu1 %v12563_v39  ;;  %v13304_v39 = vld [vmem:[#allocation34_spill] sm:$0xff] }
 0x91b   : > { %9361 = vmatpush3.bf16.msra.mxu1 %v12324_v55  ;;  %8929 = vmatprep.mubr.f32.mxu1 %v12581_v13  ;;  %v13305_v14 = vand.u32 4294901760, %v13304_v39 }
 0x91c   : > { %9363 = vmatprep.subr.bf16.mxu1 %v13285_v23 }
 0x91e   : > { %8930 = vmatmul.mubr.f32.gmra.mrb[34].mxu1 %v12611_v4  ;;  %v13308_v4 = vld [vmem:[#allocation7_spill] sm:$0xff] }
 0x91f   : > { %8932 = vmatprep.mubr.f32.mxu1 %v12645_v58  ;;  %9365 = vmatpush3.bf16.msra.mxu1 %v13285_v23  ;;  %v13309_v58 = vld [vmem:[#allocation8_spill] sm:$0xff] }
 0x920   : > { %9367 = vmatprep.subr.bf16.mxu1 %v13286_v32 }
 0x922   : > { %8933 = vmatmul.mubr.f32.gmra.mrb[36].mxu1 %v12666_v21 }
 0x923   : > { %8935 = vmatprep.mubr.f32.mxu1 %v12692_v3  ;;  %9369 = vmatpush3.bf16.msra.mxu1 %v13286_v32 }
 0x924   : > { %9371 = vmatprep.subr.bf16.mxu1 %v13287_v0 }
 0x926   : > { %8936 = vmatmul.mubr.f32.gmra.mrb[38].mxu1 %v12698_v63  ;;  %v13310_v63 = vld [vmem:[#allocation9_spill] sm:$0xff] }
 0x927   : > { %8938 = vmatprep.mubr.f32.mxu1 %v12704_v2  ;;  %9373 = vmatpush3.bf16.msra.mxu1 %v13287_v0  ;;  %v13311_v2 = vld [vmem:[#allocation11_spill] sm:$0xff] }
 0x928   : > { %9375 = vmatprep.subr.bf16.mxu1 %v9374_v35 }
 0x92a   : > { %8939 = vmatmul.mubr.f32.gmra.mrb[40].mxu1 %v12709_v54 }
 0x92b   : > { %8941 = vmatprep.mubr.f32.mxu1 %v12726_v34 }
 0x92e   : > { %8942 = vmatmul.mubr.f32.gmra.mrb[42].mxu1 %v12733_v9 }
 0x92f   : > { %8944 = vmatprep.mubr.f32.mxu1 %v12753_v33 }
 0x932   : > { %8945 = vmatmul.mubr.f32.gmra.mrb[44].mxu1 %v12758_v22 }
 0x933   : > { %8947 = vmatprep.mubr.f32.mxu1 %v12775_v15 }
 0x936   : > { %8948 = vmatmul.mubr.f32.gmra.mrb[46].mxu1 %v12786_v31  ;;  %v13314_v31 = vld [vmem:[#allocation18_spill] sm:$0xff] }
 0x937   : > { %8966 = vmatprep.mubr.f32.mxu1 %v13292_v51 }
 0x93a   : > { %8967 = vmatmul.mubr.f32.vlgmr.msra.gmra.mrb[32].mxu1 %v13297_v57 }
 0x93b   : > { %9377 = vmatpush3.bf16.msra.mxu1 %v9374_v35  ;;  %8969 = vmatprep.mubr.f32.mxu1 %v13298_v24  ;;  %v13307_v35 = vand.u32 4294901760, %v13306_v43 }
 0x93c   : > { %9379 = vmatprep.subr.bf16.mxu1 %v9378_v62 }
 0x93d   : > { %v9386_v13 = vpack.c.bf16 %v13307_v35, %v13305_v14 }
 0x93e   : > { %8970 = vmatmul.mubr.f32.gmra.mrb[34].mxu1 %v13303_v59  ;;  %v13317_v59 = vld [vmem:[#allocation20_spill] sm:$0xff] }
 0x93f   : > { %8972 = vmatprep.mubr.f32.mxu1 %v6383_v60  ;;  %9381 = vmatpush3.bf16.msra.mxu1 %v9378_v62 }
 0x940   : > { %9383 = vmatprep.subr.bf16.mxu1 %v9382_v7 }
 0x942   : > { %8973 = vmatmul.mubr.f32.gmra.mrb[36].mxu1 %v6393_v37 }
 0x943   : > { %8975 = vmatprep.mubr.f32.mxu1 %v6403_v12  ;;  %9385 = vmatpush3.bf16.msra.mxu1 %v9382_v7 }
 0x944   : > { %9387 = vmatprep.subr.bf16.mxu1 %v9386_v13 }
 0x946   : > { %8976 = vmatmul.mubr.f32.gmra.mrb[38].mxu1 %v6413_v28 }
 0x947   : > { %8978 = vmatprep.mubr.f32.mxu1 %v6423_v38  ;;  %9389 = vmatpush3.bf16.msra.mxu1 %v9386_v13 }
 0x948   : > { %9391 = vmatprep.subr.bf16.mxu1 %v12324_v55 }
 0x94a   : > { %8979 = vmatmul.mubr.f32.gmra.mrb[40].mxu1 %v6433_v25 }
 0x94b   : > { %8981 = vmatprep.mubr.f32.mxu1 %v6443_v8  ;;  %v13312_v8 = vld [vmem:[#allocation16_spill] sm:$0xff] }
 0x94e   : > { %8982 = vmatmul.mubr.f32.gmra.mrb[42].mxu1 %v6453_v40 }
 0x94f   : > { %8984 = vmatprep.mubr.f32.mxu1 %v6463_v1 }
 0x952   : > { %8985 = vmatmul.mubr.f32.gmra.mrb[44].mxu1 %v6473_v30 }
 0x953   : > { %8987 = vmatprep.mubr.f32.mxu1 %v6483_v46 }
 0x956   : > { %8988 = vmatmul.mubr.f32.gmra.mrb[46].mxu1 %v6493_v56 }
 0x957   : > { %9006 = vmatprep.mubr.f32.mxu1 %v12537_v45 }
 0x95a   : > { %9007 = vmatmul.mubr.f32.vlgmr.msra.gmra.mrb[32].mxu1 %v12553_v52 }
 0x95b   : > { %9393 = vmatpush3.bf16.msra.mxu1 %v12324_v55  ;;  %9009 = vmatprep.mubr.f32.mxu1 %v12572_v16  ;;  %v12930_v55 = vld [vmem:[%s13073_s3 + $0x9] ss:$0 sm:$0xff] }
 0x95c   : > { %9395 = vmatprep.subr.bf16.mxu1 %v13285_v23 }
 0x95e   : > { %9010 = vmatmul.mubr.f32.gmra.mrb[34].mxu1 %v12603_v36 }
 0x95f   : > { %9012 = vmatprep.mubr.f32.mxu1 %v12635_v50  ;;  %9397 = vmatpush3.bf16.msra.mxu1 %v13285_v23 }
 0x960   : > { %9399 = vmatprep.subr.bf16.mxu1 %v13286_v32 }
 0x962   : > { %9013 = vmatmul.mubr.f32.gmra.mrb[36].mxu1 %v12659_v53 }
 0x963   : > { %9015 = vmatprep.mubr.f32.mxu1 %v12683_v47  ;;  %9401 = vmatpush3.bf16.msra.mxu1 %v13286_v32  ;;  %v13315_v32 = vld [vmem:[#allocation17_spill] sm:$0xff] }
 0x964   : > { %9403 = vmatprep.subr.bf16.mxu1 %v13287_v0 }
 0x966   : > { %9016 = vmatmul.mubr.f32.gmra.mrb[38].mxu1 %v12687_v20 }
 0x967   : > { %9018 = vmatprep.mubr.f32.mxu1 %v12694_v41  ;;  %9405 = vmatpush3.bf16.msra.mxu1 %v13287_v0 }
 0x96a   : > { %9019 = vmatmul.mubr.f32.gmra.mrb[40].mxu1 %v12700_v11 }
 0x96b   : > { %9021 = vmatprep.mubr.f32.mxu1 %v12711_v49 }
 0x96e   : > { %9022 = vmatmul.mubr.f32.gmra.mrb[42].mxu1 %v12718_v10 }
 0x96f   : > { %9024 = vmatprep.mubr.f32.mxu1 %v12744_v5 }
 0x972   : > { %9025 = vmatmul.mubr.f32.gmra.mrb[44].mxu1 %v12750_v48 }
 0x973   : > { %9027 = vmatprep.mubr.f32.mxu1 %v12770_v27 }
 0x976   : > { %9028 = vmatmul.mubr.f32.gmra.mrb[46].mxu1 %v12783_v19 }
 0x977   : > { %9046 = vmatprep.mubr.f32.mxu1 %v12537_v45 }
 0x97a   : > { %9047 = vmatmul.mubr.f32.vlgmr.msra.gmra.mrb[32].mxu1 %v12553_v52 }
 0x97b   : > { %9049 = vmatprep.mubr.f32.mxu1 %v12572_v16 }
 0x97e   : > { %9050 = vmatmul.mubr.f32.gmra.mrb[34].mxu1 %v12603_v36 }
 0x97f   : > { %9052 = vmatprep.mubr.f32.mxu1 %v12635_v50 }
 0x982   : > { %9053 = vmatmul.mubr.f32.gmra.mrb[36].mxu1 %v12659_v53 }
 0x983   : > { %9055 = vmatprep.mubr.f32.mxu1 %v12683_v47 }
 0x986   : > { %9056 = vmatmul.mubr.f32.gmra.mrb[38].mxu1 %v12687_v20 }
 0x987   : > { %9058 = vmatprep.mubr.f32.mxu1 %v12694_v41 }
 0x98a   : > { %9059 = vmatmul.mubr.f32.gmra.mrb[40].mxu1 %v12700_v11 }
 0x98b   : > { %9061 = vmatprep.mubr.f32.mxu1 %v12711_v49 }
 0x98e   : > { %9062 = vmatmul.mubr.f32.gmra.mrb[42].mxu1 %v12718_v10 }
 0x98f   : > { %9064 = vmatprep.mubr.f32.mxu1 %v12744_v5 }
 0x992   : > { %9065 = vmatmul.mubr.f32.gmra.mrb[44].mxu1 %v12750_v48  ;;  %v13313_v48 = vld [vmem:[#allocation15_spill] sm:$0xff] }
 0x993   : > { %9067 = vmatprep.mubr.f32.mxu1 %v12770_v27 }
 0x996   : > { %9068 = vmatmul.mubr.f32.gmra.mrb[46].mxu1 %v12783_v19 }
 0xa4d   : > { %v9048_v45 = vpop.f32.mrb[32].mxu1 }
 0xa4e   : > { %v7458_v16 = vadd.f32 %v9048_v45, %v12930_v55  ;;  %v7356_v52 = vpop.f32.mrb[33].mxu1 }
 0xa4f   : > { %v7457_v36 = vadd.f32 %v12930_v55, %v7356_v52 }
 0xa50   : > { %v12935_v50 = vadd.f32 %v7458_v16, %v13308_v4 }
 0xa51   : > { %v12938_v60 = vadd.f32 %v7457_v36, %v13309_v58  ;;  %v9051_v53 = vpop.f32.mrb[34].mxu1  ;;  %v13318_v58 = vld [vmem:[#allocation27_spill] sm:$0xff] }
 0xa52   : > { %v7490_v21 = vsub.f32 0.0, %v12935_v50  ;;  %v7460_v37 = vadd.f32 %v9051_v53, %v12930_v55  ;;  %v7368_v47 = vpop.f32.mrb[35].mxu1 }
 0xa53   : > { %v7489_v20 = vsub.f32 0.0, %v12938_v60  ;;  %v7459_v3 = vadd.f32 %v12930_v55, %v7368_v47 }
 0xa54   : > { %v7507_v41 = vmul.f32 1.442695, %v7490_v21  ;;  %v12945_v11 = vadd.f32 %v7460_v37, %v13310_v63 }
 0xa55   : > { %v7505_v12 = vmul.f32 1.442695, %v7489_v20  ;;  %v12948_v28 = vadd.f32 %v7459_v3, %v13311_v2  ;;  %v9054_v54 = vpop.f32.mrb[36].mxu1  ;;  %v13319_v20 = vld [vmem:[#allocation26_spill] sm:$0xff] }
 0xa56   : > { %10091 = vpow2.f32 %v7507_v41  ;;  %v7492_v49 = vsub.f32 0.0, %v12945_v11  ;;  %v7462_v38 = vadd.f32 %v9054_v54, %v12930_v55  ;;  %v7380_v10 = vpop.f32.mrb[37].mxu1 }
 0xa57   : > { %10093 = vpow2.f32 %v7505_v12  ;;  %v7491_v25 = vsub.f32 0.0, %v12948_v28  ;;  %v7461_v34 = vadd.f32 %v12930_v55, %v7380_v10 }
 0xa58   : > { %v7511_v9 = vmul.f32 1.442695, %v7492_v49  ;;  %v12955_v40 = vadd.f32 %v7462_v38, %v13312_v8 }
 0xa59   : > { %v7509_v5 = vmul.f32 1.442695, %v7491_v25  ;;  %v12958_v33 = vadd.f32 %v7461_v34, %v13313_v48  ;;  %v9057_v22 = vpop.f32.mrb[38].mxu1  ;;  %v13320_v34 = vld [vmem:[#allocation30_spill] sm:$0xff] }
 0xa5a   : > { %10095 = vpow2.f32 %v7511_v9  ;;  %v7494_v1 = vsub.f32 0.0, %v12955_v40  ;;  %v7464_v30 = vadd.f32 %v9057_v22, %v12930_v55  ;;  %v7392_v27 = vpop.f32.mrb[39].mxu1  ;;  %v13321_v22 = vld [vmem:[#allocation28_spill] sm:$0xff] }
 0xa5b   : > { %10097 = vpow2.f32 %v7509_v5  ;;  %v7493_v15 = vsub.f32 0.0, %v12958_v33  ;;  %v7463_v46 = vadd.f32 %v12930_v55, %v7392_v27 }
 0xa5c   : > { %v7515_v19 = vmul.f32 1.442695, %v7494_v1  ;;  %v12965_v56 = vadd.f32 %v7464_v30, %v13314_v31 }
 0xa5d   : > { %v7513_v23 = vmul.f32 1.442695, %v7493_v15  ;;  %v12968_v0 = vadd.f32 %v7463_v46, %v13315_v32  ;;  %v9060_v51 = vpop.f32.mrb[40].mxu1 }
 0xa5e   : > { %10099 = vpow2.f32 %v7515_v19  ;;  %v7496_v29 = vsub.f32 0.0, %v12965_v56  ;;  %v7466_v61 = vadd.f32 %v9060_v51, %v12930_v55  ;;  %v7404_v42 = vpop.f32.mrb[41].mxu1 }
 0xa5f   : > { %10101 = vpow2.f32 %v7513_v23  ;;  %v7495_v26 = vsub.f32 0.0, %v12968_v0  ;;  %v7465_v62 = vadd.f32 %v12930_v55, %v7404_v42 }
 0xa60   : > { %v10092_v57 = vpop.eup %10091  ;;  %v7519_v24 = vmul.f32 1.442695, %v7496_v29  ;;  %v12975_v17 = vadd.f32 %v7466_v61, %v13316_v6  ;;  %v13322_v29 = vld [vmem:[#allocation33_spill] sm:$0xff] }
 0xa61   : > { %v10094_v18 = vpop.eup %10093  ;;  %v7538_v44 = vadd.f32 1.0, %v10092_v57  ;;  %v7517_v7 = vmul.f32 1.442695, %v7495_v26  ;;  %v12978_v39 = vadd.f32 %v7465_v62, %v13317_v59  ;;  %v9063_v14 = vpop.f32.mrb[42].mxu1  ;;  %v13323_v57 = vld [vmem:[#allocation31_spill] sm:$0xff] }
 0xa62   : > { %v7537_v43 = vadd.f32 1.0, %v10094_v18  ;;  %10103 = vpow2.f32 %v7519_v24  ;;  %v7498_v35 = vsub.f32 0.0, %v12975_v17  ;;  %v7468_v13 = vadd.f32 %v9063_v14, %v12930_v55  ;;  %v7416_v45 = vpop.f32.mrb[43].mxu1 }
 0xa63   : > { %10105 = vrcp.f32 %v7538_v44  ;;  %v7497_v16 = vsub.f32 0.0, %v12978_v39  ;;  %v7467_v52 = vadd.f32 %v12930_v55, %v7416_v45 }
 0xa64   : > { %v10096_v36 = vpop.eup %10095  ;;  %10107 = vrcp.f32 %v7537_v43  ;;  %v7523_v4 = vmul.f32 1.442695, %v7498_v35  ;;  %v12985_v53 = vadd.f32 %v7468_v13, %v13318_v58 }
 0xa65   : > { %v10098_v21 = vpop.eup %10097  ;;  %v7540_v37 = vadd.f32 1.0, %v10096_v36  ;;  %10109 = vpow2.f32 %v7517_v7  ;;  %v7521_v47 = vmul.f32 1.442695, %v7497_v16  ;;  %v12988_v3 = vadd.f32 %v7467_v52, %v13319_v20  ;;  %v9066_v41 = vpop.f32.mrb[44].mxu1 }
 0xa66   : > { %v7539_v63 = vadd.f32 1.0, %v10098_v21  ;;  %10111 = vpow2.f32 %v7523_v4  ;;  %v7500_v12 = vsub.f32 0.0, %v12985_v53  ;;  %v7470_v2 = vadd.f32 %v9066_v41, %v12930_v55  ;;  %v7428_v54 = vpop.f32.mrb[45].mxu1 }
 0xa67   : > { %10113 = vrcp.f32 %v7540_v37  ;;  %v7499_v49 = vsub.f32 0.0, %v12988_v3  ;;  %v7469_v38 = vadd.f32 %v12930_v55, %v7428_v54 }
 0xa68   : > { %v10100_v10 = vpop.eup %10099  ;;  %10115 = vrcp.f32 %v7539_v63  ;;  %v7527_v25 = vmul.f32 1.442695, %v7500_v12  ;;  %v12995_v9 = vadd.f32 %v7470_v2, %v13320_v34 }
 0xa69   : > { %v10102_v8 = vpop.eup %10101  ;;  %v7542_v5 = vadd.f32 1.0, %v10100_v10  ;;  %10117 = vpow2.f32 %v7521_v47  ;;  %v7525_v48 = vmul.f32 1.442695, %v7499_v49  ;;  %v12998_v1 = vadd.f32 %v7469_v38, %v13321_v22  ;;  %v9069_v30 = vpop.f32.mrb[46].mxu1 }
 0xa6a   : > { %v7541_v27 = vadd.f32 1.0, %v10102_v8  ;;  %10119 = vpow2.f32 %v7527_v25  ;;  %v7502_v15 = vsub.f32 0.0, %v12995_v9  ;;  %v7472_v46 = vadd.f32 %v9069_v30, %v12930_v55  ;;  %v7440_v19 = vpop.f32.mrb[47].mxu1 }
 0xa6b   : > { %10121 = vrcp.f32 %v7542_v5  ;;  %v7501_v31 = vsub.f32 0.0, %v12998_v1  ;;  %v7471_v23 = vadd.f32 %v12930_v55, %v7440_v19 }
 0xa6c   : > { %v10104_v32 = vpop.eup %10103  ;;  %10123 = vrcp.f32 %v7541_v27  ;;  %v7531_v51 = vmul.f32 1.442695, %v7502_v15  ;;  %v13005_v61 = vadd.f32 %v7472_v46, %v13322_v29 }
 0xa6d   : > { %v10106_v42 = vpop.eup %10105  ;;  %v7544_v26 = vadd.f32 1.0, %v10104_v32  ;;  %10125 = vpow2.f32 %v7525_v48  ;;  %v7529_v62 = vmul.f32 1.442695, %v7501_v31  ;;  %v13015_v55 = vadd.f32 %v7471_v23, %v13323_v57 }
 0xa6e   : > { %v10108_v24 = vpop.eup %10107  ;;  %v7556_v6 = vmul.f32 %v10106_v42, %v12935_v50  ;;  %10127 = vpow2.f32 %v7531_v51  ;;  %v7504_v18 = vsub.f32 0.0, %v13005_v61 }
 0xa6f   : > { %v10110_v44 = vpop.eup %10109  ;;  %v7554_v7 = vmul.f32 %v10108_v24, %v12938_v60  ;;  %10129 = vrcp.f32 %v7544_v26  ;;  %v7503_v59 = vsub.f32 0.0, %v13015_v55 }
 0xa70   : > { %v10112_v14 = vpop.eup %10111  ;;  %7586 = vst.msk [vmem:[%s13012_s14 + $0x8] sm:$0xff] %vm221_vm0, %v7556_v6  ;;  %v7543_v43 = vadd.f32 1.0, %v10110_v44  ;;  %10131 = vpow2.f32 %v7529_v62  ;;  %v7535_v35 = vmul.f32 1.442695, %v7504_v18 }
 0xa71   : > { %v10114_v13 = vpop.eup %10113  ;;  %7585 = vst.msk [vmem:[%s13012_s14] sm:$0xff] %vm221_vm0, %v7554_v7  ;;  %v7546_v50 = vadd.f32 1.0, %v10112_v14  ;;  %v7533_v45 = vmul.f32 1.442695, %v7503_v59 }
 0xa72   : > { %v10116_v16 = vpop.eup %10115  ;;  %v7560_v52 = vmul.f32 %v10114_v13, %v12945_v11  ;;  %10133 = vrcp.f32 %v7543_v43 }
 0xa73   : > { %v10118_v60 = vpop.eup %10117  ;;  %v7558_v36 = vmul.f32 %v10116_v16, %v12948_v28  ;;  %10135 = vrcp.f32 %v7546_v50 }
 0xa74   : > { %v10120_v4 = vpop.eup %10119  ;;  %7588 = vst.msk [vmem:[%s13012_s14 + $0x18] sm:$0xff] %vm221_vm0, %v7560_v52  ;;  %v7545_v58 = vadd.f32 1.0, %v10118_v60  ;;  %10137 = vpow2.f32 %v7535_v35 }
 0xa75   : > { %v10122_v21 = vpop.eup %10121  ;;  %7587 = vst.msk [vmem:[%s13012_s14 + $0x10] sm:$0xff] %vm221_vm0, %v7558_v36  ;;  %v7548_v37 = vadd.f32 1.0, %v10120_v4  ;;  %10139 = vpow2.f32 %v7533_v45 }
 0xa76   : > { %v10124_v47 = vpop.eup %10123  ;;  %v7564_v11 = vmul.f32 %v10122_v21, %v12955_v40  ;;  %10141 = vrcp.f32 %v7545_v58 }
 0xa77   : > { %v10126_v20 = vpop.eup %10125  ;;  %v7562_v28 = vmul.f32 %v10124_v47, %v12958_v33  ;;  %10143 = vrcp.f32 %v7548_v37 }
 0xa78   : > { %v10128_v41 = vpop.eup %10127  ;;  %7590 = vst.msk [vmem:[%s13012_s14 + $0x28] sm:$0xff] %vm221_vm0, %v7564_v11  ;;  %v7547_v63 = vadd.f32 1.0, %v10126_v20 }
 0xa79   : > { %v10130_v12 = vpop.eup %10129  ;;  %7589 = vst.msk [vmem:[%s13012_s14 + $0x20] sm:$0xff] %vm221_vm0, %v7562_v28  ;;  %v7550_v2 = vadd.f32 1.0, %v10128_v41 }
 0xa7a   : > { %v10132_v54 = vpop.eup %10131  ;;  %v7568_v49 = vmul.f32 %v10130_v12, %v12965_v56  ;;  %10145 = vrcp.f32 %v7547_v63 }
 0xa7b   : > { %10147 = vrcp.f32 %v7550_v2  ;;  %v7549_v40 = vadd.f32 1.0, %v10132_v54 }
 0xa7c   : > { %v10134_v38 = vpop.eup %10133  ;;  %7592 = vst.msk [vmem:[%s13012_s14 + $0x38] sm:$0xff] %vm221_vm0, %v7568_v49 }
 0xa7d   : > { %v10136_v33 = vpop.eup %10135  ;;  %v7566_v10 = vmul.f32 %v10134_v38, %v12968_v0  ;;  %10149 = vrcp.f32 %v7549_v40 }
 0xa7e   : > { %v10138_v25 = vpop.eup %10137  ;;  %v7572_v34 = vmul.f32 %v10136_v33, %v12975_v17 }
 0xa7f   : > { %v10140_v8 = vpop.eup %10139  ;;  %7591 = vst.msk [vmem:[%s13012_s14 + $0x30] sm:$0xff] %vm221_vm0, %v7566_v10  ;;  %v7552_v5 = vadd.f32 1.0, %v10138_v25 }
 0xa80   : > { %v10142_v56 = vpop.eup %10141  ;;  %7594 = vst.msk [vmem:[%s13012_s14 + $0x48] sm:$0xff] %vm221_vm0, %v7572_v34  ;;  %v7551_v48 = vadd.f32 1.0, %v10140_v8 }
 0xa81   : > { %v10144_v22 = vpop.eup %10143  ;;  %v7570_v30 = vmul.f32 %v10142_v56, %v12978_v39  ;;  %10151 = vrcp.f32 %v7552_v5 }
 0xa82   : > { %v7576_v0 = vmul.f32 %v10144_v22, %v12985_v53  ;;  %10153 = vrcp.f32 %v7551_v48 }
 0xa83   : > { %7593 = vst.msk [vmem:[%s13012_s14 + $0x40] sm:$0xff] %vm221_vm0, %v7570_v30 }
 0xa84   : > { %v10146_v17 = vpop.eup %10145  ;;  %7596 = vst.msk [vmem:[%s13012_s14 + $0x58] sm:$0xff] %vm221_vm0, %v7576_v0 }
 0xa85   : > { %v10148_v27 = vpop.eup %10147  ;;  %v7574_v15 = vmul.f32 %v10146_v17, %v12988_v3 }
 0xa86   : > { %v7580_v46 = vmul.f32 %v10148_v27, %v12995_v9 }
 0xa87   : > { %v10150_v19 = vpop.eup %10149  ;;  %7595 = vst.msk [vmem:[%s13012_s14 + $0x50] sm:$0xff] %vm221_vm0, %v7574_v15 }
 0xa88   : > { %7598 = vst.msk [vmem:[%s13012_s14 + $0x68] sm:$0xff] %vm221_vm0, %v7580_v46  ;;  %v7578_v39 = vmul.f32 %v10150_v19, %v12998_v1 }
 0xa8a   : > { %7597 = vst.msk [vmem:[%s13012_s14 + $0x60] sm:$0xff] %vm221_vm0, %v7578_v39 }
 0xa8b   : > { %v10152_v53 = vpop.eup %10151 }
 0xa8c   : > { %v10154_v31 = vpop.eup %10153  ;;  %v7584_v23 = vmul.f32 %v10152_v53, %v13005_v61 }
 0xa8d   : > { %v7582_v32 = vmul.f32 %v10154_v31, %v13015_v55 }
 0xa8e   : > { %7600 = vst.msk [vmem:[%s13012_s14 + $0x78] sm:$0xff] %vm221_vm0, %v7584_v23 }
 0xa8f   : > { %7599 = vst.msk [vmem:[%s13012_s14 + $0x70] sm:$0xff] %vm221_vm0, %v7582_v32 }
 0xa90 PF: > { %s14_s15 = sadd.s32 1, %s10177_s15  }
 0xa91   : > { %p11_p4 = scmp.ge.s32.totalorder %s14_s15, 6  }
 0xa93   :  { %13 = sbr.rel (!%p11_p4) target bundleno = 1 (0x1), region = 66 }

</bundles_post_ra>
